<compile_context>
chip_gen: v7x
topology: tpu7x:2x2x1
jax: 0.10.0
libtpu: 0.0.40
codegen_flags: <defaults>
</compile_context>

<pallas_src>
import math

import jax
import jax.numpy as jnp
import numpy as np
from jax.experimental import pallas as pl
from jax.experimental.pallas import tpu as pltpu

# ---- synthetic (small) GPT-J-like config (lane-dense) -----------------------
B = 2            # batch
S = 16           # sequence length
D = 128          # hidden size = H * HD   (multiple of 128 -> unmasked vst)
H = 4            # attention heads
HD = 32          # head dim
ROT = 8          # rotary dims per head (partial rotary, like GPT-J)
R2 = ROT // 2
F = 4 * D        # MLP hidden
V = 256          # vocab size (synthetic, multiple of 128)
NUM_LAYERS = 2   # real GPT-J-6B has 28
EPS = 1e-5
NEG = -1e9
TV = V           # lm_head vocab tile (whole synthetic vocab in one tile)


# ---------------------------------------------------------------------------
# Kernel 1: the whole transformer stack.  grid = (layer,); the residual stream
# for the WHOLE batch lives in the resident output block across layers, and
# the final LayerNorm output (bf16) is emitted at the last layer.
# ---------------------------------------------------------------------------
def gptj_stack_kernel(x_ref, bias_ref, lng_ref, lnb_ref,
                      wqkv_ref, wo_ref, win_ref, bin_ref, wout_ref, bout_ref,
                      lnfg_ref, lnfb_ref, cos_ref, sin_ref,
                      out_ref, hn_ref):
    l = pl.program_id(0)
    n_layers = pl.num_programs(0)

    @pl.when(l == 0)
    def _():                          # seed residual stream with embeddings
        out_ref[...] = x_ref[...]

    x = out_ref[...]                  # [B, S, D] residual stream (f32)
    x2 = x.reshape(B * S, D)
    bias = bias_ref[...]              # [B, S, S] additive causal/padding mask

    # ln_1 (shared by attention and MLP in GPT-J), f32 math.
    mu = jnp.mean(x2, axis=-1, keepdims=True)
    var = jnp.mean((x2 - mu) ** 2, axis=-1, keepdims=True)
    h = (x2 - mu) * jax.lax.rsqrt(var + EPS) * lng_ref[0] + lnb_ref[0]
    h16 = h.astype(jnp.bfloat16)

    # Fused Q/K/V projection: one [B*S, D] x [D, 3D] matmul (bf16 in, f32 acc).
    qkv = jnp.dot(h16, wqkv_ref[0], preferred_element_type=jnp.float32)

    # Rotary tables in the permuted (rotate-half) layout; sign baked into sin.
    cos = cos_ref[...][None]          # [1, S, ROT] f32
    sin = sin_ref[...][None]          # [1, S, ROT] f32 (first half negated)

    def rope(t):                      # t: [B, S, HD] f32
        tr, tp = t[..., :ROT], t[..., ROT:]
        half = jnp.concatenate([tr[..., R2:], tr[..., :R2]], axis=-1)
        return jnp.concatenate([tr * cos + half * sin, tp], axis=-1)

    scale = 1.0 / math.sqrt(HD)       # softmax scale folded into Q once

    # Per-head attention (heads come off the fused projection as lane slices;
    # batch is the einsum batch dim).  The f32 probabilities are the cloud's
    # "attn_weights"; the context / out-proj path is the edge side.
    ctx_heads = []
    for hd in range(H):
        qh = qkv[:, hd * HD:(hd + 1) * HD].reshape(B, S, HD) * scale
        kh = qkv[:, D + hd * HD:D + (hd + 1) * HD].reshape(B, S, HD)
        vh = qkv[:, 2 * D + hd * HD:2 * D + (hd + 1) * HD].reshape(B, S, HD)

        qh = rope(qh)
        kh = rope(kh)

        sc = jnp.einsum('bqe,bke->bqk', qh.astype(jnp.bfloat16),
                        kh.astype(jnp.bfloat16),
                        preferred_element_type=jnp.float32) + bias
        m = jnp.max(sc, axis=-1, keepdims=True)
        e = jnp.exp(sc - m)
        p = e * pl.reciprocal(jnp.sum(e, axis=-1, keepdims=True), approx=True)
        ctx_heads.append(
            jnp.einsum('bqk,bke->bqe', p.astype(jnp.bfloat16),
                       vh.astype(jnp.bfloat16),
                       preferred_element_type=jnp.float32))   # [B, S, HD]

    # Out-projection: head-sum folded into one [B*S, H*HD] x [H*HD, D] matmul.
    ctx_all = jnp.concatenate(ctx_heads, axis=-1).reshape(B * S, D)
    attn_out = jnp.dot(ctx_all.astype(jnp.bfloat16), wo_ref[0],
                       preferred_element_type=jnp.float32)     # [B*S, D]

    # Parallel MLP (fc_in -> gelu_new -> fc_out), fed from the same ln_1 out.
    hin = jnp.dot(h16, win_ref[0],
                  preferred_element_type=jnp.float32) + bin_ref[0]
    g3 = hin + 0.044715 * hin * hin * hin
    act = 0.5 * hin * (1.0 + jnp.tanh(0.7978845608028654 * g3))
    mlp = jnp.dot(act.astype(jnp.bfloat16), wout_ref[0],
                  preferred_element_type=jnp.float32) + bout_ref[0]

    x_new = x2 + attn_out + mlp                  # GPT-J parallel residual
    out_ref[...] = x_new.reshape(B, S, D)

    # Final LayerNorm + bf16 cast emitted once, at the last layer, so the
    # vocab-tiled lm_head kernel never recomputes LN per tile.
    @pl.when(l == n_layers - 1)
    def _():
        mu2 = jnp.mean(x_new, axis=-1, keepdims=True)
        var2 = jnp.mean((x_new - mu2) ** 2, axis=-1, keepdims=True)
        hf = (x_new - mu2) * jax.lax.rsqrt(var2 + EPS) * lnfg_ref[...] \
            + lnfb_ref[...]
        hn_ref[...] = hf.astype(jnp.bfloat16).reshape(B, S, D)


def gptj_blocks(x, bias, stacked, lnf_g, lnf_b, cos_r, sin_r):
    def w_spec(shape):        # stacked per-layer weight: block = one layer slab
        return pl.BlockSpec((1,) + shape, lambda l: (0,) * (len(shape) + 1)[:0] or (l,) + (0,) * len(shape))

    # (simpler, explicit form of the above)
    def w_spec(shape):
        n = len(shape)
        return pl.BlockSpec((1,) + shape, lambda l, _n=n: (l,) + (0,) * _n)

    def const_spec(shape):    # grid-invariant block -> DMA'd exactly once
        n = len(shape)
        return pl.BlockSpec(shape, lambda l, _n=n: (0,) * _n)

    return pl.pallas_call(
        gptj_stack_kernel,
        out_shape=(jax.ShapeDtypeStruct((B, S, D), jnp.float32),    # residual
                   jax.ShapeDtypeStruct((B, S, D), jnp.bfloat16)),  # ln_f out
        grid=(NUM_LAYERS,),
        in_specs=[
            const_spec((B, S, D)),            # embeddings (fetched once)
            const_spec((B, S, S)),            # additive mask (fetched once)
            w_spec((1, D)), w_spec((1, D)),   # ln_1 gamma/beta
            w_spec((D, 3 * D)),               # fused [wq|wk|wv]
            w_spec((D, D)),                   # out_proj
            w_spec((D, F)), w_spec((1, F)),   # fc_in
            w_spec((F, D)), w_spec((1, D)),   # fc_out
            const_spec((1, D)), const_spec((1, D)),   # ln_f gamma/beta
            const_spec((S, ROT)), const_spec((S, ROT)),  # rotary cos / signed-sin
        ],
        out_specs=(pl.BlockSpec((B, S, D), lambda l: (0, 0, 0)),
                   pl.BlockSpec((B, S, D), lambda l: (0, 0, 0))),
        compiler_params=pltpu.CompilerParams(
            dimension_semantics=("arbitrary",)),
    )(x, bias, stacked["ln_g"], stacked["ln_b"],
      stacked["wqkv"], stacked["wo"],
      stacked["w_in"], stacked["b_in"], stacked["w_out"], stacked["b_out"],
      lnf_g, lnf_b, cos_r, sin_r)


# ---------------------------------------------------------------------------
# Kernel 2: lm_head, vocab-tiled pure matmul on the pre-normalized bf16
# activation (LN was already applied inside the stack kernel).
# ---------------------------------------------------------------------------
def lm_head_kernel(h_ref, w_ref, b_ref, out_ref):
    out_ref[...] = jnp.dot(h_ref[...], w_ref[...],
                           preferred_element_type=jnp.float32) + b_ref[...]


def lm_head(h_bf16, params):
    n = h_bf16.shape[0]
    # TODO(synk): at real GPT-J scale (V=50400) pad V, use TV=512-2048 on
    # v5e/v6e and ~1024 on v7x (64 MiB VMEM), tile the token axis, and set
    # vmem_limit_bytes / CORE_PARALLEL on the vocab axis for v7x.
    return pl.pallas_call(
        lm_head_kernel,
        out_shape=jax.ShapeDtypeStruct((n, V), jnp.float32),
        grid=(V // TV,),
        in_specs=[
            pl.BlockSpec((n, D), lambda j: (0, 0)),
            pl.BlockSpec((D, TV), lambda j: (0, j)),
            pl.BlockSpec((1, TV), lambda j: (0, j)),
        ],
        out_specs=pl.BlockSpec((n, TV), lambda j: (0, j)),
        compiler_params=pltpu.CompilerParams(
            dimension_semantics=("parallel",)),
    )(h_bf16, params["w_lm"], params["b_lm"])


# ---------------------------------------------------------------------------
# Glue: rotary tables, weight layout prep, parameters, forward driver
# ---------------------------------------------------------------------------
def build_rotary_tables(seq, rot):
    """cos / sign-baked sin [S, ROT] for the permuted rotate-half layout."""
    pos = jnp.arange(seq, dtype=jnp.float32)[:, None]
    inv_freq = 1.0 / (10000.0 ** (jnp.arange(0, rot, 2, dtype=jnp.float32) / rot))
    ang = pos * inv_freq[None, :]                           # [S, ROT/2]
    cos = jnp.concatenate([jnp.cos(ang), jnp.cos(ang)], axis=-1)
    sin_signed = jnp.concatenate([-jnp.sin(ang), jnp.sin(ang)], axis=-1)
    return cos, sin_signed


# Per-head output-dim permutation: interleaved (even/odd pairs) -> rotate-half
# layout.  Applied identically to wq and wk, so Q.K^T (and hence the cloud's
# attn_weights and the final logits) are unchanged.
_HEAD_PERM = np.concatenate([np.arange(0, ROT, 2), np.arange(1, ROT, 2),
                             np.arange(ROT, HD)]).astype(np.int32)


def _perm_heads(w):                              # [D, D] -> [D, D] permuted
    return w.reshape(D, H, HD)[:, :, _HEAD_PERM].reshape(D, D)


def stack_layer_params(layers):
    """Stack per-layer weights; fuse Q/K/V into one [D, 3D] slab per layer."""
    wqkv = jnp.stack([jnp.concatenate(
        [_perm_heads(lp["wq"]), _perm_heads(lp["wk"]), lp["wv"]], axis=1)
        for lp in layers], axis=0)
    stk = lambda name: jnp.stack([lp[name] for lp in layers], axis=0)
    return dict(
        ln_g=stk("ln_g"), ln_b=stk("ln_b"),
        wqkv=wqkv, wo=stk("wo"),
        w_in=stk("w_in"), b_in=stk("b_in"),
        w_out=stk("w_out"), b_out=stk("b_out"),
    )


def init_params(key):
    keys = jax.random.split(key, 2 + NUM_LAYERS)

    def w(k, shape):   # matmul weights stored in bf16 (operands); accum is f32
        return (jax.random.normal(k, shape, jnp.float32) * 0.02).astype(jnp.bfloat16)

    params = dict(
        wte=jax.random.normal(keys[0], (V, D), jnp.float32) * 0.02,
        lnf_g=jnp.ones((1, D), jnp.float32),
        lnf_b=jnp.zeros((1, D), jnp.float32),
        w_lm=w(keys[1], (D, V)),
        b_lm=jnp.zeros((1, V), jnp.float32),
        layers=[],
    )
    # TODO(synk): the real edge layers optionally hold SVD-factored (U, V)
    # weights; here we use equivalent full-rank weights W = U @ V.
    for li in range(NUM_LAYERS):
        k = jax.random.split(keys[2 + li], 6)
        params["layers"].append(dict(
            ln_g=jnp.ones((1, D), jnp.float32),
            ln_b=jnp.zeros((1, D), jnp.float32),
            wq=w(k[0], (D, D)), wk=w(k[1], (D, D)),
            wv=w(k[2], (D, D)), wo=w(k[3], (D, D)),
            w_in=w(k[4], (D, F)), b_in=jnp.zeros((1, F), jnp.float32),
            w_out=w(k[5], (F, D)), b_out=jnp.zeros((1, D), jnp.float32),
        ))
    return params


def make_bias(attention_mask, seq):
    causal = jnp.tril(jnp.ones((seq, seq), jnp.float32))
    allowed = causal[None, :, :] * attention_mask[:, None, :].astype(jnp.float32)
    return (1.0 - allowed) * NEG                                     # [B, S, S]


def forward(params, input_ids, attention_mask=None):
    bsz, seq = input_ids.shape
    x = jnp.take(params["wte"], input_ids, axis=0)     # embedding gather (glue)
    if attention_mask is None:
        attention_mask = jnp.ones((bsz, seq), jnp.float32)
    bias = make_bias(attention_mask, seq)
    cos_r, sin_r = build_rotary_tables(seq, ROT)
    stacked = stack_layer_params(params["layers"])
    _, h_norm = gptj_blocks(x, bias, stacked, params["lnf_g"], params["lnf_b"],
                            cos_r, sin_r)              # all layers, one call
    logits = lm_head(h_norm.reshape(bsz * seq, D), params)
    return logits.reshape(bsz, seq, V)


# ---------------------------------------------------------------------------
# Pure-JAX reference (same math, same bf16-operand / f32-accum precision,
# GPT-J's original interleaved rotary) for correctness checking.
# ---------------------------------------------------------------------------
def _rotate_every_two(x):
    x1 = x[..., 0::2]
    x2 = x[..., 1::2]
    return jnp.stack([-x2, x1], axis=-1).reshape(x.shape)


def ref_forward(params, input_ids, attention_mask=None):
    bsz, seq = input_ids.shape
    x = jnp.take(params["wte"], input_ids, axis=0)
    if attention_mask is None:
        attention_mask = jnp.ones((bsz, seq), jnp.float32)
    bias = make_bias(attention_mask, seq)

    pos = jnp.arange(seq, dtype=jnp.float32)[:, None]
    inv_freq = 1.0 / (10000.0 ** (jnp.arange(0, ROT, 2, dtype=jnp.float32) / ROT))
    ang = pos * inv_freq[None, :]
    cos_il = jnp.repeat(jnp.cos(ang), 2, axis=-1)            # [S, ROT]
    sin_il = jnp.repeat(jnp.sin(ang), 2, axis=-1)

    def mm(a, w):          # bf16 operands, f32 accumulation (matches kernel)
        return jnp.dot(a.astype(jnp.bfloat16), w.astype(jnp.bfloat16),
                       preferred_element_type=jnp.float32)

    for lp in params["layers"]:
        mu = x.mean(-1, keepdims=True)
        var = ((x - mu) ** 2).mean(-1, keepdims=True)
        h = (x - mu) / jnp.sqrt(var + EPS) * lp["ln_g"] + lp["ln_b"]
        q = mm(h, lp["wq"]) * (1.0 / math.sqrt(HD))
        k = mm(h, lp["wk"])
        v = mm(h, lp["wv"])
        q = q.reshape(bsz, seq, H, HD)
        k = k.reshape(bsz, seq, H, HD)
        v = v.reshape(bsz, seq, H, HD)

        def rope(t):
            tr, tp = t[..., :ROT], t[..., ROT:]
            tr = (tr * cos_il[None, :, None, :]
                  + _rotate_every_two(tr) * sin_il[None, :, None, :])
            return jnp.concatenate([tr, tp], axis=-1)

        q, k = rope(q), rope(k)
        sc = jnp.einsum("bqhe,bkhe->bhqk", q.astype(jnp.bfloat16),
                        k.astype(jnp.bfloat16),
                        preferred_element_type=jnp.float32) + bias[:, None]
        p = jax.nn.softmax(sc, axis=-1)
        ctx = jnp.einsum("bhqk,bkhe->bqhe", p.astype(jnp.bfloat16),
                         v.astype(jnp.bfloat16),
                         preferred_element_type=jnp.float32)
        attn = mm(ctx.reshape(bsz, seq, D), lp["wo"])
        hin = mm(h, lp["w_in"]) + lp["b_in"]
        act = 0.5 * hin * (1.0 + jnp.tanh(0.7978845608028654
                                          * (hin + 0.044715 * hin ** 3)))
        mlp = mm(act, lp["w_out"]) + lp["b_out"]
        x = x + attn + mlp

    mu = x.mean(-1, keepdims=True)
    var = ((x - mu) ** 2).mean(-1, keepdims=True)
    h = (x - mu) / jnp.sqrt(var + EPS) * params["lnf_g"] + params["lnf_b"]
    return mm(h, params["w_lm"]) + params["b_lm"]


if __name__ == "__main__":
    key = jax.random.PRNGKey(0)
    pkey, ikey = jax.random.split(key)
    params = init_params(pkey)
    input_ids = jax.random.randint(ikey, (B, S), 0, V)

    logits = forward(params, input_ids)
    logits = jax.block_until_ready(logits)

    ref = ref_forward(params, input_ids)
    np.testing.assert_allclose(np.asarray(logits),
                               np.asarray(ref).reshape(B, S, V),
                               rtol=2e-2, atol=2e-2)
    assert logits.shape == (B, S, V)
    print("KERNEL_OK")
</pallas_src>

<mosaic_0001>
module attributes {stable_mosaic.version = 11 : i64} {
  func.func @gptj_stack_kernel(%arg0: i32, %arg1: memref<2x16x128xf32, #tpu.memory_space<vmem>>, %arg2: memref<2x16x16xf32, #tpu.memory_space<vmem>>, %arg3: memref<1x1x128xf32, #tpu.memory_space<vmem>>, %arg4: memref<1x1x128xf32, #tpu.memory_space<vmem>>, %arg5: memref<1x128x384xbf16, #tpu.memory_space<vmem>>, %arg6: memref<1x128x128xbf16, #tpu.memory_space<vmem>>, %arg7: memref<1x128x512xbf16, #tpu.memory_space<vmem>>, %arg8: memref<1x1x512xf32, #tpu.memory_space<vmem>>, %arg9: memref<1x512x128xbf16, #tpu.memory_space<vmem>>, %arg10: memref<1x1x128xf32, #tpu.memory_space<vmem>>, %arg11: memref<1x128xf32, #tpu.memory_space<vmem>>, %arg12: memref<1x128xf32, #tpu.memory_space<vmem>>, %arg13: memref<16x8xf32, #tpu.memory_space<vmem>>, %arg14: memref<16x8xf32, #tpu.memory_space<vmem>>, %arg15: memref<2x16x128xf32, #tpu.memory_space<vmem>>, %arg16: memref<2x16x128xbf16, #tpu.memory_space<vmem>>) attributes {dimension_semantics = [#tpu.dimension_semantics<arbitrary>], iteration_bounds = array<i64: 2>, scalar_prefetch = 0 : i64, scratch_operands = 0 : i64, tpu.core_type = #tpu.core_type<tc>, window_params = [{pipeline_mode = #tpu.pipeline_mode<synchronous>, transform_indices = @transform_0, window_bounds = array<i64: 2, 16, 128>}, {pipeline_mode = #tpu.pipeline_mode<synchronous>, transform_indices = @transform_1, window_bounds = array<i64: 2, 16, 16>}, {transform_indices = @transform_2, window_bounds = array<i64: 1, 1, 128>}, {transform_indices = @transform_3, window_bounds = array<i64: 1, 1, 128>}, {transform_indices = @transform_4, window_bounds = array<i64: 1, 128, 384>}, {transform_indices = @transform_5, window_bounds = array<i64: 1, 128, 128>}, {transform_indices = @transform_6, window_bounds = array<i64: 1, 128, 512>}, {transform_indices = @transform_7, window_bounds = array<i64: 1, 1, 512>}, {transform_indices = @transform_8, window_bounds = array<i64: 1, 512, 128>}, {transform_indices = @transform_9, window_bounds = array<i64: 1, 1, 128>}, {pipeline_mode = #tpu.pipeline_mode<synchronous>, transform_indices = @transform_10, window_bounds = array<i64: 1, 128>}, {pipeline_mode = #tpu.pipeline_mode<synchronous>, transform_indices = @transform_11, window_bounds = array<i64: 1, 128>}, {pipeline_mode = #tpu.pipeline_mode<synchronous>, transform_indices = @transform_12, window_bounds = array<i64: 16, 8>}, {pipeline_mode = #tpu.pipeline_mode<synchronous>, transform_indices = @transform_13, window_bounds = array<i64: 16, 8>}, {pipeline_mode = #tpu.pipeline_mode<synchronous>, transform_indices = @transform_14, window_bounds = array<i64: 2, 16, 128>}, {pipeline_mode = #tpu.pipeline_mode<synchronous>, transform_indices = @transform_15, window_bounds = array<i64: 2, 16, 128>}]} {
    %c0_i32 = arith.constant 0 : i32
    %0 = arith.cmpi eq, %arg0, %c0_i32 : i32
    %1 = arith.extui %0 : i1 to i32
    %c0_i32_0 = arith.constant 0 : i32
    %2 = arith.cmpi ne, %1, %c0_i32_0 : i32
    scf.if %2 {
      %c0_70 = arith.constant 0 : index
      %c0_71 = arith.constant 0 : index
      %c0_72 = arith.constant 0 : index
      %269 = vector.load %arg1[%c0_70, %c0_71, %c0_72] : memref<2x16x128xf32, #tpu.memory_space<vmem>>, vector<2x16x128xf32>
      %c0_73 = arith.constant 0 : index
      %c0_74 = arith.constant 0 : index
      %c0_75 = arith.constant 0 : index
      %270 = vector.load %arg15[%c0_73, %c0_74, %c0_75] : memref<2x16x128xf32, #tpu.memory_space<vmem>>, vector<2x16x128xf32>
      tpu.vector_store %arg15[%c0_73, %c0_74, %c0_75], %269 {strides = array<i32>} : memref<2x16x128xf32, #tpu.memory_space<vmem>>, vector<2x16x128xf32>,
    } else {
    }
    %c0 = arith.constant 0 : index
    %c0_1 = arith.constant 0 : index
    %c0_2 = arith.constant 0 : index
    %3 = vector.load %arg15[%c0, %c0_1, %c0_2] : memref<2x16x128xf32, #tpu.memory_space<vmem>>, vector<2x16x128xf32>
    %4 = vector.shape_cast %3 : vector<2x16x128xf32> to vector<32x128xf32>
    %c0_3 = arith.constant 0 : index
    %c0_4 = arith.constant 0 : index
    %c0_5 = arith.constant 0 : index
    %5 = vector.load %arg2[%c0_3, %c0_4, %c0_5] : memref<2x16x16xf32, #tpu.memory_space<vmem>>, vector<2x16x16xf32>
    %cst = arith.constant dense<0.000000e+00> : vector<32xf32>
    %6 = vector.multi_reduction <add>, %4, %cst [1] : vector<32x128xf32> to vector<32xf32>
    %7 = vector.shape_cast %6 : vector<32xf32> to vector<32x1xf32>
    %cst_6 = arith.constant 1.280000e+02 : f32
    %8 = vector.broadcast %cst_6 : f32 to vector<32x1xf32>
    %9 = arith.divf %7, %8 : vector<32x1xf32>
    %10 = vector.broadcast %9 : vector<32x1xf32> to vector<32x128xf32>
    %11 = arith.subf %4, %10 : vector<32x128xf32>
    %12 = arith.mulf %11, %11 : vector<32x128xf32>
    %cst_7 = arith.constant dense<0.000000e+00> : vector<32xf32>
    %13 = vector.multi_reduction <add>, %12, %cst_7 [1] : vector<32x128xf32> to vector<32xf32>
    %14 = vector.shape_cast %13 : vector<32xf32> to vector<32x1xf32>
    %cst_8 = arith.constant 1.280000e+02 : f32
    %15 = vector.broadcast %cst_8 : f32 to vector<32x1xf32>
    %16 = arith.divf %14, %15 : vector<32x1xf32>
    %17 = vector.broadcast %9 : vector<32x1xf32> to vector<32x128xf32>
    %18 = arith.subf %4, %17 : vector<32x128xf32>
    %cst_9 = arith.constant 9.99999974E-6 : f32
    %19 = vector.broadcast %cst_9 : f32 to vector<32x1xf32>
    %20 = arith.addf %16, %19 : vector<32x1xf32>
    %21 = math.rsqrt %20 : vector<32x1xf32>
    %22 = vector.broadcast %21 : vector<32x1xf32> to vector<32x128xf32>
    %23 = arith.mulf %18, %22 : vector<32x128xf32>
    %c0_10 = arith.constant 0 : index
    %c0_11 = arith.constant 0 : index
    %c0_12 = arith.constant 0 : index
    %24 = vector.load %arg3[%c0_10, %c0_11, %c0_12] : memref<1x1x128xf32, #tpu.memory_space<vmem>>, vector<1x1x128xf32>
    %25 = vector.shape_cast %24 : vector<1x1x128xf32> to vector<1x128xf32>
    %26 = vector.broadcast %25 : vector<1x128xf32> to vector<32x128xf32>
    %27 = arith.mulf %23, %26 : vector<32x128xf32>
    %c0_13 = arith.constant 0 : index
    %c0_14 = arith.constant 0 : index
    %c0_15 = arith.constant 0 : index
    %28 = vector.load %arg4[%c0_13, %c0_14, %c0_15] : memref<1x1x128xf32, #tpu.memory_space<vmem>>, vector<1x1x128xf32>
    %29 = vector.shape_cast %28 : vector<1x1x128xf32> to vector<1x128xf32>
    %30 = vector.broadcast %29 : vector<1x128xf32> to vector<32x128xf32>
    %31 = arith.addf %27, %30 : vector<32x128xf32>
    %32 = arith.truncf %31 : vector<32x128xf32> to vector<32x128xbf16>
    %c0_16 = arith.constant 0 : index
    %c0_17 = arith.constant 0 : index
    %c0_18 = arith.constant 0 : index
    %33 = vector.load %arg5[%c0_16, %c0_17, %c0_18] : memref<1x128x384xbf16, #tpu.memory_space<vmem>>, vector<1x128x384xbf16>
    %34 = vector.shape_cast %33 : vector<1x128x384xbf16> to vector<128x384xbf16>
    %cst_19 = arith.constant dense<0.000000e+00> : vector<32x384xf32>
    %35 = tpu.matmul %32, %34, %cst_19 {dimension_numbers = #tpu.dot_dimension_numbers<[1], [0], [0], [1], [0, 0, 1, 1], [], []>} : vector<32x128xbf16>, vector<128x384xbf16>, vector<32x384xf32> -> vector<32x384xf32>
    %c0_20 = arith.constant 0 : index
    %c0_21 = arith.constant 0 : index
    %36 = vector.load %arg13[%c0_20, %c0_21] : memref<16x8xf32, #tpu.memory_space<vmem>>, vector<16x8xf32>
    %37 = vector.shape_cast %36 : vector<16x8xf32> to vector<1x16x8xf32>
    %c0_22 = arith.constant 0 : index
    %c0_23 = arith.constant 0 : index
    %38 = vector.load %arg14[%c0_22, %c0_23] : memref<16x8xf32, #tpu.memory_space<vmem>>, vector<16x8xf32>
    %39 = vector.shape_cast %38 : vector<16x8xf32> to vector<1x16x8xf32>
    %40 = vector.extract_strided_slice %35 {offsets = [0, 0], sizes = [32, 32], strides = [1, 1]} : vector<32x384xf32> to vector<32x32xf32>
    %41 = vector.shape_cast %40 : vector<32x32xf32> to vector<2x16x32xf32>
    %cst_24 = arith.constant 0.176776692 : f32
    %42 = vector.broadcast %cst_24 : f32 to vector<2x16x32xf32>
    %43 = arith.mulf %41, %42 : vector<2x16x32xf32>
    %44 = vector.extract_strided_slice %35 {offsets = [0, 128], sizes = [32, 32], strides = [1, 1]} : vector<32x384xf32> to vector<32x32xf32>
    %45 = vector.shape_cast %44 : vector<32x32xf32> to vector<2x16x32xf32>
    %46 = vector.extract_strided_slice %35 {offsets = [0, 256], sizes = [32, 32], strides = [1, 1]} : vector<32x384xf32> to vector<32x32xf32>
    %47 = vector.shape_cast %46 : vector<32x32xf32> to vector<2x16x32xf32>
    %48 = vector.extract_strided_slice %43 {offsets = [0, 0, 0], sizes = [2, 16, 8], strides = [1, 1, 1]} : vector<2x16x32xf32> to vector<2x16x8xf32>
    %49 = vector.extract_strided_slice %43 {offsets = [0, 0, 8], sizes = [2, 16, 24], strides = [1, 1, 1]} : vector<2x16x32xf32> to vector<2x16x24xf32>
    %50 = vector.extract_strided_slice %48 {offsets = [0, 0, 4], sizes = [2, 16, 4], strides = [1, 1, 1]} : vector<2x16x8xf32> to vector<2x16x4xf32>
    %51 = vector.extract_strided_slice %48 {offsets = [0, 0, 0], sizes = [2, 16, 4], strides = [1, 1, 1]} : vector<2x16x8xf32> to vector<2x16x4xf32>
    %52 = tpu.concatenate %50, %51 in 2 : vector<2x16x4xf32>, vector<2x16x4xf32> -> vector<2x16x8xf32>
    %53 = vector.broadcast %37 : vector<1x16x8xf32> to vector<2x16x8xf32>
    %54 = arith.mulf %48, %53 : vector<2x16x8xf32>
    %55 = vector.broadcast %39 : vector<1x16x8xf32> to vector<2x16x8xf32>
    %56 = arith.mulf %52, %55 : vector<2x16x8xf32>
    %57 = arith.addf %54, %56 : vector<2x16x8xf32>
    %58 = tpu.concatenate %57, %49 in 2 : vector<2x16x8xf32>, vector<2x16x24xf32> -> vector<2x16x32xf32>
    %59 = vector.extract_strided_slice %45 {offsets = [0, 0, 0], sizes = [2, 16, 8], strides = [1, 1, 1]} : vector<2x16x32xf32> to vector<2x16x8xf32>
    %60 = vector.extract_strided_slice %45 {offsets = [0, 0, 8], sizes = [2, 16, 24], strides = [1, 1, 1]} : vector<2x16x32xf32> to vector<2x16x24xf32>
    %61 = vector.extract_strided_slice %59 {offsets = [0, 0, 4], sizes = [2, 16, 4], strides = [1, 1, 1]} : vector<2x16x8xf32> to vector<2x16x4xf32>
    %62 = vector.extract_strided_slice %59 {offsets = [0, 0, 0], sizes = [2, 16, 4], strides = [1, 1, 1]} : vector<2x16x8xf32> to vector<2x16x4xf32>
    %63 = tpu.concatenate %61, %62 in 2 : vector<2x16x4xf32>, vector<2x16x4xf32> -> vector<2x16x8xf32>
    %64 = vector.broadcast %37 : vector<1x16x8xf32> to vector<2x16x8xf32>
    %65 = arith.mulf %59, %64 : vector<2x16x8xf32>
    %66 = vector.broadcast %39 : vector<1x16x8xf32> to vector<2x16x8xf32>
    %67 = arith.mulf %63, %66 : vector<2x16x8xf32>
    %68 = arith.addf %65, %67 : vector<2x16x8xf32>
    %69 = tpu.concatenate %68, %60 in 2 : vector<2x16x8xf32>, vector<2x16x24xf32> -> vector<2x16x32xf32>
    %70 = arith.truncf %58 : vector<2x16x32xf32> to vector<2x16x32xbf16>
    %71 = arith.truncf %69 : vector<2x16x32xf32> to vector<2x16x32xbf16>
    "tpu.trace_start"() <{level = 10 : i32, message = "bqe,bke->bqk"}> : () -> ()
    %cst_25 = arith.constant dense<0.000000e+00> : vector<2x16x16xf32>
    %72 = tpu.matmul %70, %71, %cst_25 {dimension_numbers = #tpu.dot_dimension_numbers<[2], [2], [1], [1], [0, 0, 0, 1, 1, 1], [0], [0]>} : vector<2x16x32xbf16>, vector<2x16x32xbf16>, vector<2x16x16xf32> -> vector<2x16x16xf32>
    "tpu.trace_stop"() : () -> ()
    %73 = arith.addf %72, %5 : vector<2x16x16xf32>
    %cst_26 = arith.constant dense<0xFF800000> : vector<2x16xf32>
    %74 = vector.multi_reduction <maximumf>, %73, %cst_26 [2] : vector<2x16x16xf32> to vector<2x16xf32>
    %75 = vector.shape_cast %74 : vector<2x16xf32> to vector<2x16x1xf32>
    %76 = vector.broadcast %75 : vector<2x16x1xf32> to vector<2x16x16xf32>
    %77 = arith.subf %73, %76 : vector<2x16x16xf32>
    %78 = math.exp %77 : vector<2x16x16xf32>
    %cst_27 = arith.constant dense<0.000000e+00> : vector<2x16xf32>
    %79 = vector.multi_reduction <add>, %78, %cst_27 [2] : vector<2x16x16xf32> to vector<2x16xf32>
    %80 = vector.shape_cast %79 : vector<2x16xf32> to vector<2x16x1xf32>
    %81 = tpu.reciprocal %80 {approx = true} : vector<2x16x1xf32> -> vector<2x16x1xf32>
    %82 = vector.broadcast %81 : vector<2x16x1xf32> to vector<2x16x16xf32>
    %83 = arith.mulf %78, %82 : vector<2x16x16xf32>
    %84 = arith.truncf %83 : vector<2x16x16xf32> to vector<2x16x16xbf16>
    %85 = arith.truncf %47 : vector<2x16x32xf32> to vector<2x16x32xbf16>
    "tpu.trace_start"() <{level = 10 : i32, message = "bqk,bke->bqe"}> : () -> ()
    %cst_28 = arith.constant dense<0.000000e+00> : vector<2x16x32xf32>
    %86 = tpu.matmul %84, %85, %cst_28 {dimension_numbers = #tpu.dot_dimension_numbers<[2], [1], [1], [2], [0, 0, 0, 1, 1, 2], [0], [0]>} : vector<2x16x16xbf16>, vector<2x16x32xbf16>, vector<2x16x32xf32> -> vector<2x16x32xf32>
    "tpu.trace_stop"() : () -> ()
    %87 = vector.extract_strided_slice %35 {offsets = [0, 32], sizes = [32, 32], strides = [1, 1]} : vector<32x384xf32> to vector<32x32xf32>
    %88 = vector.shape_cast %87 : vector<32x32xf32> to vector<2x16x32xf32>
    %cst_29 = arith.constant 0.176776692 : f32
    %89 = vector.broadcast %cst_29 : f32 to vector<2x16x32xf32>
    %90 = arith.mulf %88, %89 : vector<2x16x32xf32>
    %91 = vector.extract_strided_slice %35 {offsets = [0, 160], sizes = [32, 32], strides = [1, 1]} : vector<32x384xf32> to vector<32x32xf32>
    %92 = vector.shape_cast %91 : vector<32x32xf32> to vector<2x16x32xf32>
    %93 = vector.extract_strided_slice %35 {offsets = [0, 288], sizes = [32, 32], strides = [1, 1]} : vector<32x384xf32> to vector<32x32xf32>
    %94 = vector.shape_cast %93 : vector<32x32xf32> to vector<2x16x32xf32>
    %95 = vector.extract_strided_slice %90 {offsets = [0, 0, 0], sizes = [2, 16, 8], strides = [1, 1, 1]} : vector<2x16x32xf32> to vector<2x16x8xf32>
    %96 = vector.extract_strided_slice %90 {offsets = [0, 0, 8], sizes = [2, 16, 24], strides = [1, 1, 1]} : vector<2x16x32xf32> to vector<2x16x24xf32>
    %97 = vector.extract_strided_slice %95 {offsets = [0, 0, 4], sizes = [2, 16, 4], strides = [1, 1, 1]} : vector<2x16x8xf32> to vector<2x16x4xf32>
    %98 = vector.extract_strided_slice %95 {offsets = [0, 0, 0], sizes = [2, 16, 4], strides = [1, 1, 1]} : vector<2x16x8xf32> to vector<2x16x4xf32>
    %99 = tpu.concatenate %97, %98 in 2 : vector<2x16x4xf32>, vector<2x16x4xf32> -> vector<2x16x8xf32>
    %100 = vector.broadcast %37 : vector<1x16x8xf32> to vector<2x16x8xf32>
    %101 = arith.mulf %95, %100 : vector<2x16x8xf32>
    %102 = vector.broadcast %39 : vector<1x16x8xf32> to vector<2x16x8xf32>
    %103 = arith.mulf %99, %102 : vector<2x16x8xf32>
    %104 = arith.addf %101, %103 : vector<2x16x8xf32>
    %105 = tpu.concatenate %104, %96 in 2 : vector<2x16x8xf32>, vector<2x16x24xf32> -> vector<2x16x32xf32>
    %106 = vector.extract_strided_slice %92 {offsets = [0, 0, 0], sizes = [2, 16, 8], strides = [1, 1, 1]} : vector<2x16x32xf32> to vector<2x16x8xf32>
    %107 = vector.extract_strided_slice %92 {offsets = [0, 0, 8], sizes = [2, 16, 24], strides = [1, 1, 1]} : vector<2x16x32xf32> to vector<2x16x24xf32>
    %108 = vector.extract_strided_slice %106 {offsets = [0, 0, 4], sizes = [2, 16, 4], strides = [1, 1, 1]} : vector<2x16x8xf32> to vector<2x16x4xf32>
    %109 = vector.extract_strided_slice %106 {offsets = [0, 0, 0], sizes = [2, 16, 4], strides = [1, 1, 1]} : vector<2x16x8xf32> to vector<2x16x4xf32>
    %110 = tpu.concatenate %108, %109 in 2 : vector<2x16x4xf32>, vector<2x16x4xf32> -> vector<2x16x8xf32>
    %111 = vector.broadcast %37 : vector<1x16x8xf32> to vector<2x16x8xf32>
    %112 = arith.mulf %106, %111 : vector<2x16x8xf32>
    %113 = vector.broadcast %39 : vector<1x16x8xf32> to vector<2x16x8xf32>
    %114 = arith.mulf %110, %113 : vector<2x16x8xf32>
    %115 = arith.addf %112, %114 : vector<2x16x8xf32>
    %116 = tpu.concatenate %115, %107 in 2 : vector<2x16x8xf32>, vector<2x16x24xf32> -> vector<2x16x32xf32>
    %117 = arith.truncf %105 : vector<2x16x32xf32> to vector<2x16x32xbf16>
    %118 = arith.truncf %116 : vector<2x16x32xf32> to vector<2x16x32xbf16>
    "tpu.trace_start"() <{level = 10 : i32, message = "bqe,bke->bqk"}> : () -> ()
    %cst_30 = arith.constant dense<0.000000e+00> : vector<2x16x16xf32>
    %119 = tpu.matmul %117, %118, %cst_30 {dimension_numbers = #tpu.dot_dimension_numbers<[2], [2], [1], [1], [0, 0, 0, 1, 1, 1], [0], [0]>} : vector<2x16x32xbf16>, vector<2x16x32xbf16>, vector<2x16x16xf32> -> vector<2x16x16xf32>
    "tpu.trace_stop"() : () -> ()
    %120 = arith.addf %119, %5 : vector<2x16x16xf32>
    %cst_31 = arith.constant dense<0xFF800000> : vector<2x16xf32>
    %121 = vector.multi_reduction <maximumf>, %120, %cst_31 [2] : vector<2x16x16xf32> to vector<2x16xf32>
    %122 = vector.shape_cast %121 : vector<2x16xf32> to vector<2x16x1xf32>
    %123 = vector.broadcast %122 : vector<2x16x1xf32> to vector<2x16x16xf32>
    %124 = arith.subf %120, %123 : vector<2x16x16xf32>
    %125 = math.exp %124 : vector<2x16x16xf32>
    %cst_32 = arith.constant dense<0.000000e+00> : vector<2x16xf32>
    %126 = vector.multi_reduction <add>, %125, %cst_32 [2] : vector<2x16x16xf32> to vector<2x16xf32>
    %127 = vector.shape_cast %126 : vector<2x16xf32> to vector<2x16x1xf32>
    %128 = tpu.reciprocal %127 {approx = true} : vector<2x16x1xf32> -> vector<2x16x1xf32>
    %129 = vector.broadcast %128 : vector<2x16x1xf32> to vector<2x16x16xf32>
    %130 = arith.mulf %125, %129 : vector<2x16x16xf32>
    %131 = arith.truncf %130 : vector<2x16x16xf32> to vector<2x16x16xbf16>
    %132 = arith.truncf %94 : vector<2x16x32xf32> to vector<2x16x32xbf16>
    "tpu.trace_start"() <{level = 10 : i32, message = "bqk,bke->bqe"}> : () -> ()
    %cst_33 = arith.constant dense<0.000000e+00> : vector<2x16x32xf32>
    %133 = tpu.matmul %131, %132, %cst_33 {dimension_numbers = #tpu.dot_dimension_numbers<[2], [1], [1], [2], [0, 0, 0, 1, 1, 2], [0], [0]>} : vector<2x16x16xbf16>, vector<2x16x32xbf16>, vector<2x16x32xf32> -> vector<2x16x32xf32>
    "tpu.trace_stop"() : () -> ()
    %134 = vector.extract_strided_slice %35 {offsets = [0, 64], sizes = [32, 32], strides = [1, 1]} : vector<32x384xf32> to vector<32x32xf32>
    %135 = vector.shape_cast %134 : vector<32x32xf32> to vector<2x16x32xf32>
    %cst_34 = arith.constant 0.176776692 : f32
    %136 = vector.broadcast %cst_34 : f32 to vector<2x16x32xf32>
    %137 = arith.mulf %135, %136 : vector<2x16x32xf32>
    %138 = vector.extract_strided_slice %35 {offsets = [0, 192], sizes = [32, 32], strides = [1, 1]} : vector<32x384xf32> to vector<32x32xf32>
    %139 = vector.shape_cast %138 : vector<32x32xf32> to vector<2x16x32xf32>
    %140 = vector.extract_strided_slice %35 {offsets = [0, 320], sizes = [32, 32], strides = [1, 1]} : vector<32x384xf32> to vector<32x32xf32>
    %141 = vector.shape_cast %140 : vector<32x32xf32> to vector<2x16x32xf32>
    %142 = vector.extract_strided_slice %137 {offsets = [0, 0, 0], sizes = [2, 16, 8], strides = [1, 1, 1]} : vector<2x16x32xf32> to vector<2x16x8xf32>
    %143 = vector.extract_strided_slice %137 {offsets = [0, 0, 8], sizes = [2, 16, 24], strides = [1, 1, 1]} : vector<2x16x32xf32> to vector<2x16x24xf32>
    %144 = vector.extract_strided_slice %142 {offsets = [0, 0, 4], sizes = [2, 16, 4], strides = [1, 1, 1]} : vector<2x16x8xf32> to vector<2x16x4xf32>
    %145 = vector.extract_strided_slice %142 {offsets = [0, 0, 0], sizes = [2, 16, 4], strides = [1, 1, 1]} : vector<2x16x8xf32> to vector<2x16x4xf32>
    %146 = tpu.concatenate %144, %145 in 2 : vector<2x16x4xf32>, vector<2x16x4xf32> -> vector<2x16x8xf32>
    %147 = vector.broadcast %37 : vector<1x16x8xf32> to vector<2x16x8xf32>
    %148 = arith.mulf %142, %147 : vector<2x16x8xf32>
    %149 = vector.broadcast %39 : vector<1x16x8xf32> to vector<2x16x8xf32>
    %150 = arith.mulf %146, %149 : vector<2x16x8xf32>
    %151 = arith.addf %148, %150 : vector<2x16x8xf32>
    %152 = tpu.concatenate %151, %143 in 2 : vector<2x16x8xf32>, vector<2x16x24xf32> -> vector<2x16x32xf32>
    %153 = vector.extract_strided_slice %139 {offsets = [0, 0, 0], sizes = [2, 16, 8], strides = [1, 1, 1]} : vector<2x16x32xf32> to vector<2x16x8xf32>
    %154 = vector.extract_strided_slice %139 {offsets = [0, 0, 8], sizes = [2, 16, 24], strides = [1, 1, 1]} : vector<2x16x32xf32> to vector<2x16x24xf32>
    %155 = vector.extract_strided_slice %153 {offsets = [0, 0, 4], sizes = [2, 16, 4], strides = [1, 1, 1]} : vector<2x16x8xf32> to vector<2x16x4xf32>
    %156 = vector.extract_strided_slice %153 {offsets = [0, 0, 0], sizes = [2, 16, 4], strides = [1, 1, 1]} : vector<2x16x8xf32> to vector<2x16x4xf32>
    %157 = tpu.concatenate %155, %156 in 2 : vector<2x16x4xf32>, vector<2x16x4xf32> -> vector<2x16x8xf32>
    %158 = vector.broadcast %37 : vector<1x16x8xf32> to vector<2x16x8xf32>
    %159 = arith.mulf %153, %158 : vector<2x16x8xf32>
    %160 = vector.broadcast %39 : vector<1x16x8xf32> to vector<2x16x8xf32>
    %161 = arith.mulf %157, %160 : vector<2x16x8xf32>
    %162 = arith.addf %159, %161 : vector<2x16x8xf32>
    %163 = tpu.concatenate %162, %154 in 2 : vector<2x16x8xf32>, vector<2x16x24xf32> -> vector<2x16x32xf32>
    %164 = arith.truncf %152 : vector<2x16x32xf32> to vector<2x16x32xbf16>
    %165 = arith.truncf %163 : vector<2x16x32xf32> to vector<2x16x32xbf16>
    "tpu.trace_start"() <{level = 10 : i32, message = "bqe,bke->bqk"}> : () -> ()
    %cst_35 = arith.constant dense<0.000000e+00> : vector<2x16x16xf32>
    %166 = tpu.matmul %164, %165, %cst_35 {dimension_numbers = #tpu.dot_dimension_numbers<[2], [2], [1], [1], [0, 0, 0, 1, 1, 1], [0], [0]>} : vector<2x16x32xbf16>, vector<2x16x32xbf16>, vector<2x16x16xf32> -> vector<2x16x16xf32>
    "tpu.trace_stop"() : () -> ()
    %167 = arith.addf %166, %5 : vector<2x16x16xf32>
    %cst_36 = arith.constant dense<0xFF800000> : vector<2x16xf32>
    %168 = vector.multi_reduction <maximumf>, %167, %cst_36 [2] : vector<2x16x16xf32> to vector<2x16xf32>
    %169 = vector.shape_cast %168 : vector<2x16xf32> to vector<2x16x1xf32>
    %170 = vector.broadcast %169 : vector<2x16x1xf32> to vector<2x16x16xf32>
    %171 = arith.subf %167, %170 : vector<2x16x16xf32>
    %172 = math.exp %171 : vector<2x16x16xf32>
    %cst_37 = arith.constant dense<0.000000e+00> : vector<2x16xf32>
    %173 = vector.multi_reduction <add>, %172, %cst_37 [2] : vector<2x16x16xf32> to vector<2x16xf32>
    %174 = vector.shape_cast %173 : vector<2x16xf32> to vector<2x16x1xf32>
    %175 = tpu.reciprocal %174 {approx = true} : vector<2x16x1xf32> -> vector<2x16x1xf32>
    %176 = vector.broadcast %175 : vector<2x16x1xf32> to vector<2x16x16xf32>
    %177 = arith.mulf %172, %176 : vector<2x16x16xf32>
    %178 = arith.truncf %177 : vector<2x16x16xf32> to vector<2x16x16xbf16>
    %179 = arith.truncf %141 : vector<2x16x32xf32> to vector<2x16x32xbf16>
    "tpu.trace_start"() <{level = 10 : i32, message = "bqk,bke->bqe"}> : () -> ()
    %cst_38 = arith.constant dense<0.000000e+00> : vector<2x16x32xf32>
    %180 = tpu.matmul %178, %179, %cst_38 {dimension_numbers = #tpu.dot_dimension_numbers<[2], [1], [1], [2], [0, 0, 0, 1, 1, 2], [0], [0]>} : vector<2x16x16xbf16>, vector<2x16x32xbf16>, vector<2x16x32xf32> -> vector<2x16x32xf32>
    "tpu.trace_stop"() : () -> ()
    %181 = vector.extract_strided_slice %35 {offsets = [0, 96], sizes = [32, 32], strides = [1, 1]} : vector<32x384xf32> to vector<32x32xf32>
    %182 = vector.shape_cast %181 : vector<32x32xf32> to vector<2x16x32xf32>
    %cst_39 = arith.constant 0.176776692 : f32
    %183 = vector.broadcast %cst_39 : f32 to vector<2x16x32xf32>
    %184 = arith.mulf %182, %183 : vector<2x16x32xf32>
    %185 = vector.extract_strided_slice %35 {offsets = [0, 224], sizes = [32, 32], strides = [1, 1]} : vector<32x384xf32> to vector<32x32xf32>
    %186 = vector.shape_cast %185 : vector<32x32xf32> to vector<2x16x32xf32>
    %187 = vector.extract_strided_slice %35 {offsets = [0, 352], sizes = [32, 32], strides = [1, 1]} : vector<32x384xf32> to vector<32x32xf32>
    %188 = vector.shape_cast %187 : vector<32x32xf32> to vector<2x16x32xf32>
    %189 = vector.extract_strided_slice %184 {offsets = [0, 0, 0], sizes = [2, 16, 8], strides = [1, 1, 1]} : vector<2x16x32xf32> to vector<2x16x8xf32>
    %190 = vector.extract_strided_slice %184 {offsets = [0, 0, 8], sizes = [2, 16, 24], strides = [1, 1, 1]} : vector<2x16x32xf32> to vector<2x16x24xf32>
    %191 = vector.extract_strided_slice %189 {offsets = [0, 0, 4], sizes = [2, 16, 4], strides = [1, 1, 1]} : vector<2x16x8xf32> to vector<2x16x4xf32>
    %192 = vector.extract_strided_slice %189 {offsets = [0, 0, 0], sizes = [2, 16, 4], strides = [1, 1, 1]} : vector<2x16x8xf32> to vector<2x16x4xf32>
    %193 = tpu.concatenate %191, %192 in 2 : vector<2x16x4xf32>, vector<2x16x4xf32> -> vector<2x16x8xf32>
    %194 = vector.broadcast %37 : vector<1x16x8xf32> to vector<2x16x8xf32>
    %195 = arith.mulf %189, %194 : vector<2x16x8xf32>
    %196 = vector.broadcast %39 : vector<1x16x8xf32> to vector<2x16x8xf32>
    %197 = arith.mulf %193, %196 : vector<2x16x8xf32>
    %198 = arith.addf %195, %197 : vector<2x16x8xf32>
    %199 = tpu.concatenate %198, %190 in 2 : vector<2x16x8xf32>, vector<2x16x24xf32> -> vector<2x16x32xf32>
    %200 = vector.extract_strided_slice %186 {offsets = [0, 0, 0], sizes = [2, 16, 8], strides = [1, 1, 1]} : vector<2x16x32xf32> to vector<2x16x8xf32>
    %201 = vector.extract_strided_slice %186 {offsets = [0, 0, 8], sizes = [2, 16, 24], strides = [1, 1, 1]} : vector<2x16x32xf32> to vector<2x16x24xf32>
    %202 = vector.extract_strided_slice %200 {offsets = [0, 0, 4], sizes = [2, 16, 4], strides = [1, 1, 1]} : vector<2x16x8xf32> to vector<2x16x4xf32>
    %203 = vector.extract_strided_slice %200 {offsets = [0, 0, 0], sizes = [2, 16, 4], strides = [1, 1, 1]} : vector<2x16x8xf32> to vector<2x16x4xf32>
    %204 = tpu.concatenate %202, %203 in 2 : vector<2x16x4xf32>, vector<2x16x4xf32> -> vector<2x16x8xf32>
    %205 = vector.broadcast %37 : vector<1x16x8xf32> to vector<2x16x8xf32>
    %206 = arith.mulf %200, %205 : vector<2x16x8xf32>
    %207 = vector.broadcast %39 : vector<1x16x8xf32> to vector<2x16x8xf32>
    %208 = arith.mulf %204, %207 : vector<2x16x8xf32>
    %209 = arith.addf %206, %208 : vector<2x16x8xf32>
    %210 = tpu.concatenate %209, %201 in 2 : vector<2x16x8xf32>, vector<2x16x24xf32> -> vector<2x16x32xf32>
    %211 = arith.truncf %199 : vector<2x16x32xf32> to vector<2x16x32xbf16>
    %212 = arith.truncf %210 : vector<2x16x32xf32> to vector<2x16x32xbf16>
    "tpu.trace_start"() <{level = 10 : i32, message = "bqe,bke->bqk"}> : () -> ()
    %cst_40 = arith.constant dense<0.000000e+00> : vector<2x16x16xf32>
    %213 = tpu.matmul %211, %212, %cst_40 {dimension_numbers = #tpu.dot_dimension_numbers<[2], [2], [1], [1], [0, 0, 0, 1, 1, 1], [0], [0]>} : vector<2x16x32xbf16>, vector<2x16x32xbf16>, vector<2x16x16xf32> -> vector<2x16x16xf32>
    "tpu.trace_stop"() : () -> ()
    %214 = arith.addf %213, %5 : vector<2x16x16xf32>
    %cst_41 = arith.constant dense<0xFF800000> : vector<2x16xf32>
    %215 = vector.multi_reduction <maximumf>, %214, %cst_41 [2] : vector<2x16x16xf32> to vector<2x16xf32>
    %216 = vector.shape_cast %215 : vector<2x16xf32> to vector<2x16x1xf32>
    %217 = vector.broadcast %216 : vector<2x16x1xf32> to vector<2x16x16xf32>
    %218 = arith.subf %214, %217 : vector<2x16x16xf32>
    %219 = math.exp %218 : vector<2x16x16xf32>
    %cst_42 = arith.constant dense<0.000000e+00> : vector<2x16xf32>
    %220 = vector.multi_reduction <add>, %219, %cst_42 [2] : vector<2x16x16xf32> to vector<2x16xf32>
    %221 = vector.shape_cast %220 : vector<2x16xf32> to vector<2x16x1xf32>
    %222 = tpu.reciprocal %221 {approx = true} : vector<2x16x1xf32> -> vector<2x16x1xf32>
    %223 = vector.broadcast %222 : vector<2x16x1xf32> to vector<2x16x16xf32>
    %224 = arith.mulf %219, %223 : vector<2x16x16xf32>
    %225 = arith.truncf %224 : vector<2x16x16xf32> to vector<2x16x16xbf16>
    %226 = arith.truncf %188 : vector<2x16x32xf32> to vector<2x16x32xbf16>
    "tpu.trace_start"() <{level = 10 : i32, message = "bqk,bke->bqe"}> : () -> ()
    %cst_43 = arith.constant dense<0.000000e+00> : vector<2x16x32xf32>
    %227 = tpu.matmul %225, %226, %cst_43 {dimension_numbers = #tpu.dot_dimension_numbers<[2], [1], [1], [2], [0, 0, 0, 1, 1, 2], [0], [0]>} : vector<2x16x16xbf16>, vector<2x16x32xbf16>, vector<2x16x32xf32> -> vector<2x16x32xf32>
    "tpu.trace_stop"() : () -> ()
    %228 = tpu.concatenate %86, %133, %180, %227 in 2 : vector<2x16x32xf32>, vector<2x16x32xf32>, vector<2x16x32xf32>, vector<2x16x32xf32> -> vector<2x16x128xf32>
    %229 = vector.shape_cast %228 : vector<2x16x128xf32> to vector<32x128xf32>
    %230 = arith.truncf %229 : vector<32x128xf32> to vector<32x128xbf16>
    %c0_44 = arith.constant 0 : index
    %c0_45 = arith.constant 0 : index
    %c0_46 = arith.constant 0 : index
    %231 = vector.load %arg6[%c0_44, %c0_45, %c0_46] : memref<1x128x128xbf16, #tpu.memory_space<vmem>>, vector<1x128x128xbf16>
    %232 = vector.shape_cast %231 : vector<1x128x128xbf16> to vector<128x128xbf16>
    %cst_47 = arith.constant dense<0.000000e+00> : vector<32x128xf32>
    %233 = tpu.matmul %230, %232, %cst_47 {dimension_numbers = #tpu.dot_dimension_numbers<[1], [0], [0], [1], [0, 0, 1, 1], [], []>} : vector<32x128xbf16>, vector<128x128xbf16>, vector<32x128xf32> -> vector<32x128xf32>
    %c0_48 = arith.constant 0 : index
    %c0_49 = arith.constant 0 : index
    %c0_50 = arith.constant 0 : index
    %234 = vector.load %arg7[%c0_48, %c0_49, %c0_50] : memref<1x128x512xbf16, #tpu.memory_space<vmem>>, vector<1x128x512xbf16>
    %235 = vector.shape_cast %234 : vector<1x128x512xbf16> to vector<128x512xbf16>
    %cst_51 = arith.constant dense<0.000000e+00> : vector<32x512xf32>
    %236 = tpu.matmul %32, %235, %cst_51 {dimension_numbers = #tpu.dot_dimension_numbers<[1], [0], [0], [1], [0, 0, 1, 1], [], []>} : vector<32x128xbf16>, vector<128x512xbf16>, vector<32x512xf32> -> vector<32x512xf32>
    %c0_52 = arith.constant 0 : index
    %c0_53 = arith.constant 0 : index
    %c0_54 = arith.constant 0 : index
    %237 = vector.load %arg8[%c0_52, %c0_53, %c0_54] : memref<1x1x512xf32, #tpu.memory_space<vmem>>, vector<1x1x512xf32>
    %238 = vector.shape_cast %237 : vector<1x1x512xf32> to vector<1x512xf32>
    %239 = vector.broadcast %238 : vector<1x512xf32> to vector<32x512xf32>
    %240 = arith.addf %236, %239 : vector<32x512xf32>
    %cst_55 = arith.constant 4.471500e-02 : f32
    %241 = vector.broadcast %cst_55 : f32 to vector<32x512xf32>
    %242 = arith.mulf %241, %240 : vector<32x512xf32>
    %243 = arith.mulf %242, %240 : vector<32x512xf32>
    %244 = arith.mulf %243, %240 : vector<32x512xf32>
    %245 = arith.addf %240, %244 : vector<32x512xf32>
    %cst_56 = arith.constant 5.000000e-01 : f32
    %246 = vector.broadcast %cst_56 : f32 to vector<32x512xf32>
    %247 = arith.mulf %246, %240 : vector<32x512xf32>
    %cst_57 = arith.constant 0.797884583 : f32
    %248 = vector.broadcast %cst_57 : f32 to vector<32x512xf32>
    %249 = arith.mulf %248, %245 : vector<32x512xf32>
    %250 = math.tanh %249 : vector<32x512xf32>
    %cst_58 = arith.constant 1.000000e+00 : f32
    %251 = vector.broadcast %cst_58 : f32 to vector<32x512xf32>
    %252 = arith.addf %251, %250 : vector<32x512xf32>
    %253 = arith.mulf %247, %252 : vector<32x512xf32>
    %254 = arith.truncf %253 : vector<32x512xf32> to vector<32x512xbf16>
    %c0_59 = arith.constant 0 : index
    %c0_60 = arith.constant 0 : index
    %c0_61 = arith.constant 0 : index
    %255 = vector.load %arg9[%c0_59, %c0_60, %c0_61] : memref<1x512x128xbf16, #tpu.memory_space<vmem>>, vector<1x512x128xbf16>
    %256 = vector.shape_cast %255 : vector<1x512x128xbf16> to vector<512x128xbf16>
    %cst_62 = arith.constant dense<0.000000e+00> : vector<32x128xf32>
    %257 = tpu.matmul %254, %256, %cst_62 {dimension_numbers = #tpu.dot_dimension_numbers<[1], [0], [0], [1], [0, 0, 1, 1], [], []>} : vector<32x512xbf16>, vector<512x128xbf16>, vector<32x128xf32> -> vector<32x128xf32>
    %c0_63 = arith.constant 0 : index
    %c0_64 = arith.constant 0 : index
    %c0_65 = arith.constant 0 : index
    %258 = vector.load %arg10[%c0_63, %c0_64, %c0_65] : memref<1x1x128xf32, #tpu.memory_space<vmem>>, vector<1x1x128xf32>
    %259 = vector.shape_cast %258 : vector<1x1x128xf32> to vector<1x128xf32>
    %260 = vector.broadcast %259 : vector<1x128xf32> to vector<32x128xf32>
    %261 = arith.addf %257, %260 : vector<32x128xf32>
    %262 = arith.addf %4, %233 : vector<32x128xf32>
    %263 = arith.addf %262, %261 : vector<32x128xf32>
    %264 = vector.shape_cast %263 : vector<32x128xf32> to vector<2x16x128xf32>
    %c0_66 = arith.constant 0 : index
    %c0_67 = arith.constant 0 : index
    %c0_68 = arith.constant 0 : index
    %265 = vector.load %arg15[%c0_66, %c0_67, %c0_68] : memref<2x16x128xf32, #tpu.memory_space<vmem>>, vector<2x16x128xf32>
    tpu.vector_store %arg15[%c0_66, %c0_67, %c0_68], %264 {strides = array<i32>} : memref<2x16x128xf32, #tpu.memory_space<vmem>>, vector<2x16x128xf32>,
    %c1_i32 = arith.constant 1 : i32
    %266 = arith.cmpi eq, %arg0, %c1_i32 : i32
    %267 = arith.extui %266 : i1 to i32
    %c0_i32_69 = arith.constant 0 : i32
    %268 = arith.cmpi ne, %267, %c0_i32_69 : i32
    scf.if %268 {
      %cst_70 = arith.constant dense<0.000000e+00> : vector<32xf32>
      %269 = vector.multi_reduction <add>, %263, %cst_70 [1] : vector<32x128xf32> to vector<32xf32>
      %270 = vector.shape_cast %269 : vector<32xf32> to vector<32x1xf32>
      %cst_71 = arith.constant 1.280000e+02 : f32
      %271 = vector.broadcast %cst_71 : f32 to vector<32x1xf32>
      %272 = arith.divf %270, %271 : vector<32x1xf32>
      %273 = vector.broadcast %272 : vector<32x1xf32> to vector<32x128xf32>
      %274 = arith.subf %263, %273 : vector<32x128xf32>
      %275 = arith.mulf %274, %274 : vector<32x128xf32>
      %cst_72 = arith.constant dense<0.000000e+00> : vector<32xf32>
      %276 = vector.multi_reduction <add>, %275, %cst_72 [1] : vector<32x128xf32> to vector<32xf32>
      %277 = vector.shape_cast %276 : vector<32xf32> to vector<32x1xf32>
      %cst_73 = arith.constant 1.280000e+02 : f32
      %278 = vector.broadcast %cst_73 : f32 to vector<32x1xf32>
      %279 = arith.divf %277, %278 : vector<32x1xf32>
      %280 = vector.broadcast %272 : vector<32x1xf32> to vector<32x128xf32>
      %281 = arith.subf %263, %280 : vector<32x128xf32>
      %cst_74 = arith.constant 9.99999974E-6 : f32
      %282 = vector.broadcast %cst_74 : f32 to vector<32x1xf32>
      %283 = arith.addf %279, %282 : vector<32x1xf32>
      %284 = math.rsqrt %283 : vector<32x1xf32>
      %285 = vector.broadcast %284 : vector<32x1xf32> to vector<32x128xf32>
      %286 = arith.mulf %281, %285 : vector<32x128xf32>
      %c0_75 = arith.constant 0 : index
      %c0_76 = arith.constant 0 : index
      %287 = vector.load %arg11[%c0_75, %c0_76] : memref<1x128xf32, #tpu.memory_space<vmem>>, vector<1x128xf32>
      %288 = vector.broadcast %287 : vector<1x128xf32> to vector<32x128xf32>
      %289 = arith.mulf %286, %288 : vector<32x128xf32>
      %c0_77 = arith.constant 0 : index
      %c0_78 = arith.constant 0 : index
      %290 = vector.load %arg12[%c0_77, %c0_78] : memref<1x128xf32, #tpu.memory_space<vmem>>, vector<1x128xf32>
      %291 = vector.broadcast %290 : vector<1x128xf32> to vector<32x128xf32>
      %292 = arith.addf %289, %291 : vector<32x128xf32>
      %293 = arith.truncf %292 : vector<32x128xf32> to vector<32x128xbf16>
      %294 = vector.shape_cast %293 : vector<32x128xbf16> to vector<2x16x128xbf16>
      %c0_79 = arith.constant 0 : index
      %c0_80 = arith.constant 0 : index
      %c0_81 = arith.constant 0 : index
      %295 = vector.load %arg16[%c0_79, %c0_80, %c0_81] : memref<2x16x128xbf16, #tpu.memory_space<vmem>>, vector<2x16x128xbf16>
      tpu.vector_store %arg16[%c0_79, %c0_80, %c0_81], %294 {strides = array<i32>} : memref<2x16x128xbf16, #tpu.memory_space<vmem>>, vector<2x16x128xbf16>,
    } else {
    }
    return
  }
  func.func @transform_0(%arg0: i32) -> (i32, i32, i32) {
    %c0_i32 = arith.constant 0 : i32
    %c0_i32_0 = arith.constant 0 : i32
    %c0_i32_1 = arith.constant 0 : i32
    %c0_i32_2 = arith.constant 0 : i32
    return %c0_i32, %c0_i32_0, %c0_i32_1 : i32, i32, i32
  }
  func.func @transform_1(%arg0: i32) -> (i32, i32, i32) {
    %c0_i32 = arith.constant 0 : i32
    %c0_i32_0 = arith.constant 0 : i32
    %c0_i32_1 = arith.constant 0 : i32
    %c0_i32_2 = arith.constant 0 : i32
    return %c0_i32, %c0_i32_0, %c0_i32_1 : i32, i32, i32
  }
  func.func @transform_2(%arg0: i32) -> (i32, i32, i32) {
    %c0_i32 = arith.constant 0 : i32
    %c0_i32_0 = arith.constant 0 : i32
    %c0_i32_1 = arith.constant 0 : i32
    return %arg0, %c0_i32, %c0_i32_0 : i32, i32, i32
  }
  func.func @transform_3(%arg0: i32) -> (i32, i32, i32) {
    %c0_i32 = arith.constant 0 : i32
    %c0_i32_0 = arith.constant 0 : i32
    %c0_i32_1 = arith.constant 0 : i32
    return %arg0, %c0_i32, %c0_i32_0 : i32, i32, i32
  }
  func.func @transform_4(%arg0: i32) -> (i32, i32, i32) {
    %c0_i32 = arith.constant 0 : i32
    %c0_i32_0 = arith.constant 0 : i32
    %c0_i32_1 = arith.constant 0 : i32
    return %arg0, %c0_i32, %c0_i32_0 : i32, i32, i32
  }
  func.func @transform_5(%arg0: i32) -> (i32, i32, i32) {
    %c0_i32 = arith.constant 0 : i32
    %c0_i32_0 = arith.constant 0 : i32
    %c0_i32_1 = arith.constant 0 : i32
    return %arg0, %c0_i32, %c0_i32_0 : i32, i32, i32
  }
  func.func @transform_6(%arg0: i32) -> (i32, i32, i32) {
    %c0_i32 = arith.constant 0 : i32
    %c0_i32_0 = arith.constant 0 : i32
    %c0_i32_1 = arith.constant 0 : i32
    return %arg0, %c0_i32, %c0_i32_0 : i32, i32, i32
  }
  func.func @transform_7(%arg0: i32) -> (i32, i32, i32) {
    %c0_i32 = arith.constant 0 : i32
    %c0_i32_0 = arith.constant 0 : i32
    %c0_i32_1 = arith.constant 0 : i32
    return %arg0, %c0_i32, %c0_i32_0 : i32, i32, i32
  }
  func.func @transform_8(%arg0: i32) -> (i32, i32, i32) {
    %c0_i32 = arith.constant 0 : i32
    %c0_i32_0 = arith.constant 0 : i32
    %c0_i32_1 = arith.constant 0 : i32
    return %arg0, %c0_i32, %c0_i32_0 : i32, i32, i32
  }
  func.func @transform_9(%arg0: i32) -> (i32, i32, i32) {
    %c0_i32 = arith.constant 0 : i32
    %c0_i32_0 = arith.constant 0 : i32
    %c0_i32_1 = arith.constant 0 : i32
    return %arg0, %c0_i32, %c0_i32_0 : i32, i32, i32
  }
  func.func @transform_10(%arg0: i32) -> (i32, i32) {
    %c0_i32 = arith.constant 0 : i32
    %c0_i32_0 = arith.constant 0 : i32
    %c0_i32_1 = arith.constant 0 : i32
    return %c0_i32, %c0_i32_0 : i32, i32
  }
  func.func @transform_11(%arg0: i32) -> (i32, i32) {
    %c0_i32 = arith.constant 0 : i32
    %c0_i32_0 = arith.constant 0 : i32
    %c0_i32_1 = arith.constant 0 : i32
    return %c0_i32, %c0_i32_0 : i32, i32
  }
  func.func @transform_12(%arg0: i32) -> (i32, i32) {
    %c0_i32 = arith.constant 0 : i32
    %c0_i32_0 = arith.constant 0 : i32
    %c0_i32_1 = arith.constant 0 : i32
    return %c0_i32, %c0_i32_0 : i32, i32
  }
  func.func @transform_13(%arg0: i32) -> (i32, i32) {
    %c0_i32 = arith.constant 0 : i32
    %c0_i32_0 = arith.constant 0 : i32
    %c0_i32_1 = arith.constant 0 : i32
    return %c0_i32, %c0_i32_0 : i32, i32
  }
  func.func @transform_14(%arg0: i32) -> (i32, i32, i32) {
    %c0_i32 = arith.constant 0 : i32
    %c0_i32_0 = arith.constant 0 : i32
    %c0_i32_1 = arith.constant 0 : i32
    %c0_i32_2 = arith.constant 0 : i32
    return %c0_i32, %c0_i32_0, %c0_i32_1 : i32, i32, i32
  }
  func.func @transform_15(%arg0: i32) -> (i32, i32, i32) {
    %c0_i32 = arith.constant 0 : i32
    %c0_i32_0 = arith.constant 0 : i32
    %c0_i32_1 = arith.constant 0 : i32
    %c0_i32_2 = arith.constant 0 : i32
    return %c0_i32, %c0_i32_0, %c0_i32_1 : i32, i32, i32
  }
}

</mosaic_0001>

<bundles_post_ra>
// kernel: tpu_custom_call.1
= control target key start
LH: loop header
LB: loop body
LE: loop exit
PB: predicated region body
PF: predicated region fallthrough
CT: control target
= control target key end

     0   :  { %s6551_s0 = inlined_call_operand.vmem [shape: f32[2,16,128], index: 0, kind: input, shape index: {}]   ;;  %s6552_s1 = inlined_call_operand.hbm [shape: f32[2,16,16], index: 1, kind: input, shape index: {}]   ;;  %s6553_s2 = inlined_call_operand.vmem [shape: f32[2,1,128], index: 2, kind: input, shape index: {}]   ;;  %s6554_s3 = inlined_call_operand.vmem [shape: f32[2,1,128], index: 3, kind: input, shape index: {}]   ;;  %s6555_s4 = inlined_call_operand.hbm [shape: bf16[2,128,384], index: 4, kind: input, shape index: {}]   ;;  %s6556_s5 = inlined_call_operand.hbm [shape: bf16[2,128,128], index: 5, kind: input, shape index: {}]   ;;  %s6557_s6 = inlined_call_operand.hbm [shape: bf16[2,128,512], index: 6, kind: input, shape index: {}]   ;;  %s6558_s7 = inlined_call_operand.vmem [shape: f32[2,1,512], index: 7, kind: input, shape index: {}]   ;;  %s6559_s8 = inlined_call_operand.hbm [shape: bf16[2,512,128], index: 8, kind: input, shape index: {}]   ;;  %s6560_s9 = inlined_call_operand.vmem [shape: f32[2,1,128], index: 9, kind: input, shape index: {}]   ;;  %s6561_s10 = inlined_call_operand.vmem [shape: f32[1,128], index: 10, kind: input, shape index: {}]   ;;  %s6562_s11 = inlined_call_operand.vmem [shape: f32[1,128], index: 11, kind: input, shape index: {}]   ;;  %s6563_s12 = inlined_call_operand.vmem [shape: f32[16,8], index: 12, kind: input, shape index: {}]   ;;  %s6564_s13 = inlined_call_operand.vmem [shape: f32[16,8], index: 13, kind: input, shape index: {}]   ;;  %s6565_s14 = inlined_call_operand.hbm [shape: f32[2,16,128], index: 14, kind: output, shape index: {0}]   ;;  %s6566_s15 = inlined_call_operand.hbm [shape: bf16[2,16,128], index: 15, kind: output, shape index: {1}]  }
   0x1   :  { %6582 = sst [smem:[#allocation22_spill]] %s6551_s0 }
   0x2   :  { %6583 = sst [smem:[#allocation23_spill]] %s6555_s4 }
   0x3   :  { %6584 = sst [smem:[#allocation24_spill]] %s6557_s6 }
   0x4   :  { %6585 = sst [smem:[#allocation25_spill]] %s6558_s7 }
   0x5   :  { %6586 = sst [smem:[#allocation26_spill]] %s6561_s10 }
   0x6   :  { %6587 = sst [smem:[#allocation27_spill]] %s6562_s11 }
   0x7   :  { %6588 = sst [smem:[#allocation28_spill]] %s6563_s12 }
   0x8   :  { %6589 = sst [smem:[#allocation29_spill]] %s6564_s13 }
   0x9   :  { %6590 = sst [smem:[#allocation30_spill]] %s6565_s14 }
   0xa   :  { %6591 = sst [smem:[#allocation31_spill]] %s6566_s15 }
   0xb   :  { %21 = vsyncpa [#allocation3], 0 }
   0xc   :  { %22 = vsyncpa [#allocation6], 0 }
   0xd   :  { %24 = vsyncpa [#allocation6 + $0x1], 0 }
   0xe   :  { %25 = vsyncpa [#allocation9], 0 }
   0xf   :  { %27 = vsyncpa [#allocation9 + $0x1], 0 }
  0x10   :  { %28 = vsyncpa [#allocation4], 0 }
  0x11   :  { %29 = vsyncpa [#allocation13], 0  ;;  %s5229_s18 = smov 0   ;;  %s5231_s19 = smov 0  }
  0x12   :  { %s5233_s20 = smov 0   ;;  %s5235_s21 = smov 0  }
  0x13 LB: > { %6592 = sst [smem:[#allocation19_spill]] %s5112_s20  ;;  %s5250_s22 = sadd.s32 1, %s5116_s21   ;;  %s5116_s21 = sphi %s5235_s21, %s6620_s21   ;;  %s5112_s20 = sphi %s5233_s20, %s6622_s20   ;;  %s5108_s19 = sphi %s5231_s19, %s6624_s19   ;;  %s5104_s18 = sphi %s5229_s18, %s6623_s18  }
  0x14   : > { %6593 = sst [smem:[#allocation20_spill]] %s5250_s22  ;;  %s136_s23 = sadd.s32 1, %s5112_s20 }
  0x15   : > { %s133_s24 = ssub.s32 %s5116_s21, %s5250_s22  ;;  %p143_p0 = scmp.ne.s32.totalorder %s5112_s20, %s5108_s19 }
  0x16   : > { %p134_p1 = scmp.eq.s32.totalorder %s133_s24, 0  ;;  %p144_p2 = scmp.eq.s32.totalorder %s5116_s21, 0 }
  0x17   : > { %p4407_p3 = scmp.lt.s32.totalorder %s5116_s21, 2  ;;  %s5264_s27 = sand.u32 1, %s5112_s20  }
  0x18   : > { %s5260_s25 = scalar_select %p134_p1, %s5112_s20, %s136_s23  }
  0x19   : > { %p145_p4 = por %p144_p2, %p143_p0  ;;  %s4366_s28 = smul.u32 192, %s5264_s27 }
  0x1a   : > { %6594 = sst [smem:[#allocation21_spill]] %s5260_s25  ;;  %s4367_s30 = smul.u32 3072, %s5116_s21 }
  0x1b   : > { %p5267_p5 = pnand %p4407_p3, %p145_p4  ;;  %s6596_s4 = sld [smem:[#allocation23_spill]] }
  0x1c   : > { %s473_s23 = scalar_lea.vmem [#allocation5], %s4366_s28  ;;  %s6597_s25 = sand.u32 1, %s5116_s21  }
  0x1d   : > { %s6595_s29 = scalar_select %p5267_p5, 1, 0 }
  0x1e   : > { %s480_s26 = sshll.u32 %s473_s23, 4  ;;  %s5281_s20 = scalar_lea.sflag [#allocation6], %s6597_s25  ;;  %s5277_s26 = int_to_ptr.vmem [resolvable:$true] %s480_s26 }
  0x1f   : > { %p5287_p7 = pneg %p5267_p5 }
  0x21   : > { %s5275_s24 = scalar_lea.hbm %s6596_s4, %s4367_s30  ;;  %s4871_s28 = scalar_lea.hbm %s6596_s4, 6144 }
  0x22   : > { %s4866_s22 = scalar_lea.hbm %s5275_s24, 3072  ;;  %p4872_p10 = scmp.lt.u32.totalorder %s5275_s24, %s6596_s4 }
  0x23   : > { %p4867_p6 = scmp.ne.s32.totalorder %s5275_s24, %s4866_s22  ;;  %p4873_p11 = scmp.lt.u32.totalorder %s4871_s28, %s4866_s22 }
  0x24   : > { %s6598_s15 = scalar_select %p5287_p7, 1, 0 }
  0x25   : > { %p4869_p8 = pnand %p5287_p7, %p4867_p6  ;;  %p4874_p12 = por %p4873_p11, %p4872_p10 }
  0x26   : > { %p4875_p13 = scmp.lt.u32.totalorder %s4866_s22, %s5275_s24 }
  0x27   : > { %p4870_p9 = pneg %p4869_p8 }
  0x28   : > { %p4876_p0 = por %p4875_p13, %p4874_p12 }
  0x2a   : > { %p4877_p1 = pnand %p4876_p0, %p4870_p9 }
  0x2c   : > { %4880 = shalt.err (!%p4877_p1)
}
  0x2d   : > { %s4881_s25 = scalar_lea.vmem %s5277_s26, 3072  ;;  %s5118_s30 = smov [#allocation5]  }
  0x2e   : > { %p4882_p2 = scmp.ne.s32.totalorder %s5277_s26, %s4881_s25  ;;  %s4886_s16 = sshll.u32 %s5118_s30, 4  ;;  %s4887_s16 = int_to_ptr.vmem [resolvable:$false] %s4886_s16 }
  0x2f   : > { %s4888_s17 = scalar_lea.vmem %s4887_s16, 6144  ;;  %p4889_p6 = scmp.lt.s32.totalorder %s5277_s26, %s4887_s16 }
  0x30   : > { %p4884_p3 = pnand %p4882_p2, %p5287_p7  ;;  %p4890_p8 = scmp.lt.s32.totalorder %s4888_s17, %s4881_s25 }
  0x32   : > { %p4885_p4 = pneg %p4884_p3  ;;  %p4891_p10 = por %p4890_p8, %p4889_p6 }
  0x34   : > { %p4892_p11 = pnand %p4891_p10, %p4885_p4 }
  0x36   : > { %4895 = shalt.err (!%p4892_p11)
}
  0x37   : > { %s5119_s22 = smov 192   ;;  %s5120_s28 = smov 12  }
  0x38   : > { %4396 = dma.hbm_to_vmem [thread:$0]  (!%p5267_p5), %s5275_s24, 3072, %s5277_s26, %s5281_s20, %s5119_s22, %s5119_s22, %s5120_s28  }
  0x39   : > { %s3963_s23 = sshll.u32 %s5264_s27, 8  ;;  %s4105_s30 = sshll.u32 %s5116_s21, 12 }
  0x3a   : > { %s6599_s6 = sld [smem:[#allocation24_spill]]  ;;  %s515_s4 = scalar_lea.vmem [#allocation8], %s3963_s23 }
  0x3b   : > { %s522_s14 = sshll.u32 %s515_s4, 4  ;;  %s6600_s11 = sand.u32 1, %s5116_s21   ;;  %s5322_s14 = int_to_ptr.vmem [resolvable:$true] %s522_s14 }
  0x3c   : > { %s5326_s10 = scalar_lea.sflag [#allocation9], %s6600_s11 }
  0x40   : > { %s5318_s17 = scalar_lea.hbm %s6599_s6, %s4105_s30  ;;  %s4901_s28 = scalar_lea.hbm %s6599_s6, 8192 }
  0x41   : > { %s4896_s26 = scalar_lea.hbm %s5318_s17, 4096  ;;  %p4902_p0 = scmp.lt.u32.totalorder %s5318_s17, %s6599_s6 }
  0x42   : > { %p4897_p9 = scmp.ne.s32.totalorder %s5318_s17, %s4896_s26  ;;  %p4903_p1 = scmp.lt.u32.totalorder %s4901_s28, %s4896_s26 }
  0x43   : > { %p4905_p3 = scmp.lt.u32.totalorder %s4896_s26, %s5318_s17 }
  0x44   : > { %p4899_p12 = pnand %p4897_p9, %p5287_p7  ;;  %p4904_p2 = por %p4903_p1, %p4902_p0 }
  0x46   : > { %p4900_p13 = pneg %p4899_p12  ;;  %p4906_p4 = por %p4905_p3, %p4904_p2 }
  0x48   : > { %p4907_p6 = pnand %p4906_p4, %p4900_p13 }
  0x4a   : > { %4910 = shalt.err (!%p4907_p6)
}
  0x4b   : > { %s4911_s4 = scalar_lea.vmem %s5322_s14, 4096  ;;  %s5121_s11 = smov [#allocation8]  }
  0x4c   : > { %p4912_p8 = scmp.ne.s32.totalorder %s5322_s14, %s4911_s4  ;;  %s4916_s24 = sshll.u32 %s5121_s11, 4  ;;  %s4917_s24 = int_to_ptr.vmem [resolvable:$false] %s4916_s24 }
  0x4d   : > { %s4918_s22 = scalar_lea.vmem %s4917_s24, 8192  ;;  %p4919_p9 = scmp.lt.s32.totalorder %s5322_s14, %s4917_s24 }
  0x4e   : > { %p4914_p10 = pnand %p4912_p8, %p5287_p7  ;;  %p4920_p12 = scmp.lt.s32.totalorder %s4918_s22, %s4911_s4 }
  0x50   : > { %p4915_p11 = pneg %p4914_p10  ;;  %p4921_p0 = por %p4920_p12, %p4919_p9 }
  0x52   : > { %p4922_p1 = pnand %p4921_p0, %p4915_p11 }
  0x54   : > { %4925 = shalt.err (!%p4922_p1)
}
  0x55   : > { %s5122_s26 = smov 256   ;;  %s5123_s28 = smov 16  }
  0x56   : > { %4402 = dma.hbm_to_vmem [thread:$0]  (!%p5267_p5), %s5318_s17, 4096, %s5322_s14, %s5326_s10, %s5122_s26, %s5122_s26, %s5123_s28  }
  0x57   : > { %s5355_s4 = scalar_lea.hbm %s6559_s8, %s4105_s30  ;;  %s543_s11 = scalar_lea.vmem [#allocation10], %s3963_s23 }
  0x58   : > { %s550_s24 = sshll.u32 %s543_s11, 4  ;;  %s5362_s22 = sadd.s32 4294967295, %s5116_s21   ;;  %s5359_s24 = int_to_ptr.vmem [resolvable:$true] %s550_s24 }
  0x59   : > { %p149_p13 = scmp.ne.s32.totalorder %s5108_s19, %s5104_s18  ;;  %p6575_p2 = scmp.eq.s32.totalorder %s5362_s22, 0 }
  0x5a   : > { %p3956_p3 = scmp.ge.s32.totalorder %s5116_s21, 1  ;;  %p416_p4 = scmp.lt.s32.totalorder %s5116_s21, 3 }
  0x5b   : > { %p5371_p6 = por %p6575_p2, %p149_p13  ;;  %s5124_s30 = smov [#allocation2]  }
  0x5c   : > { %p5376_p10 = pnand %p3956_p3, %p416_p4  ;;  %s431_s17 = sshll.u32 %s5124_s30, 4  ;;  %s5382_s17 = int_to_ptr.vmem [resolvable:$true] %s431_s17 }
  0x5d   : > { %s6601_s14 = scalar_select %p5371_p6, 1, 0 }
  0x5e   : > { %s6602_s23 = scalar_select %p5376_p10, 1, 0 }
  0x5f   : > { %p4389_p11 = pneg %p5376_p10  ;;  %s3960_s18 = sshll.u32 %s5264_s27, 6 }
  0x60   : > { %s4104_s28 = sshll.u32 %s5116_s21, 10  ;;  %s494_s25 = scalar_lea.vmem [#allocation7], %s3960_s18 }
  0x61   : > { %p5387_p9 = pnand %p4389_p11, %p6575_p2  ;;  %s501_s16 = sshll.u32 %s494_s25, 4  ;;  %s5418_s16 = int_to_ptr.vmem [resolvable:$true] %s501_s16 }
  0x62   : > { %s5395_s12 = scalar_lea.hbm %s6556_s5, %s4104_s28  ;;  %s4926_s0 = scalar_lea.hbm %s6552_s1, 512 }
  0x63   : > { %p4927_p12 = scmp.ne.s32.totalorder %s6552_s1, %s4926_s0  ;;  %p4928_p0 = pneg %p5387_p9 }
  0x64   : > { %p4933_p3 = scmp.lt.u32.totalorder %s4926_s0, %s6552_s1 }
  0x65   : > { %p4929_p1 = pnand %p4928_p0, %p4927_p12 }
  0x67   : > { %p4930_p13 = pneg %p4929_p1 }
  0x69   : > { %p4935_p4 = pnand %p4933_p3, %p4930_p13 }
  0x6b   : > { %4938 = shalt.err (!%p4935_p4)
}
  0x6c   : > { %s4939_s6 = scalar_lea.vmem %s5382_s17, 512  ;;  %p4947_p6 = scmp.lt.s32.totalorder %s5382_s17, %s5382_s17 }
  0x6d   : > { %p4940_p11 = scmp.ne.s32.totalorder %s5382_s17, %s4939_s6  ;;  %p4948_p10 = scmp.lt.s32.totalorder %s4939_s6, %s4939_s6 }
  0x6f   : > { %p4942_p8 = pnand %p4940_p11, %p4928_p0  ;;  %p4949_p5 = por %p4948_p10, %p4947_p6 }
  0x71   : > { %p4943_p2 = pneg %p4942_p8 }
  0x73   : > { %p4950_p7 = pnand %p4949_p5, %p4943_p2 }
  0x75   : > { %4953 = shalt.err (!%p4950_p7)
}
  0x76   : > { %s5125_s7 = smov 128   ;;  %s5126_s0 = smov 8  }
  0x77   : > { %4392 = dma.hbm_to_vmem [thread:$0]  (!%p5387_p9), %s6552_s1, 512, %s5382_s17, [#allocation3], %s5125_s7, %s5125_s7, %s5126_s0  }
  0x78   : > { %s4954_s25 = scalar_lea.hbm %s5395_s12, 1024  ;;  %p6604_p5 = scmp.ne.s32.totalorder %s6598_s15, 0 }
  0x79   : > { %p4955_p6 = scmp.ne.s32.totalorder %s5395_s12, %s4954_s25  ;;  %s4959_s27 = scalar_lea.hbm %s6556_s5, 2048 }
  0x7a   : > { %p4960_p8 = scmp.lt.u32.totalorder %s5395_s12, %s6556_s5  ;;  %p4961_p10 = scmp.lt.u32.totalorder %s4959_s27, %s4954_s25 }
  0x7b   : > { %p4957_p7 = pnand %p4955_p6, %p6604_p5  ;;  %p4963_p0 = scmp.lt.u32.totalorder %s4954_s25, %s5395_s12 }
  0x7c   : > { %p4962_p12 = por %p4961_p10, %p4960_p8 }
  0x7d   : > { %p4958_p2 = pneg %p4957_p7 }
  0x7e   : > { %p4964_p1 = por %p4963_p0, %p4962_p12 }
  0x80   : > { %p4965_p9 = pnand %p4964_p1, %p4958_p2 }
  0x82   : > { %4968 = shalt.err (!%p4965_p9)
}
  0x83   : > { %s4969_s17 = scalar_lea.vmem %s5418_s16, 1024  ;;  %s5127_s26 = smov [#allocation7]  }
  0x84   : > { %p4970_p13 = scmp.ne.s32.totalorder %s5418_s16, %s4969_s17  ;;  %s4974_s6 = sshll.u32 %s5127_s26, 4  ;;  %s4975_s6 = int_to_ptr.vmem [resolvable:$false] %s4974_s6 }
  0x85   : > { %s4976_s7 = scalar_lea.vmem %s4975_s6, 2048  ;;  %p4977_p11 = scmp.lt.s32.totalorder %s5418_s16, %s4975_s6 }
  0x86   : > { %p4972_p3 = pnand %p4970_p13, %p6604_p5  ;;  %p4978_p6 = scmp.lt.s32.totalorder %s4976_s7, %s4969_s17 }
  0x88   : > { %p4973_p4 = pneg %p4972_p3  ;;  %p4979_p7 = por %p4978_p6, %p4977_p11 }
  0x8a   : > { %p4980_p8 = pnand %p4979_p7, %p4973_p4 }
  0x8c   : > { %4983 = shalt.err (!%p4980_p8)
}
  0x8d   : > { %s5128_s0 = smov 64   ;;  %s5129_s13 = smov 4  }
  0x8e   : > { %p6605_p2 = scmp.ne.s32.totalorder %s6595_s29, 0  ;;  %s4984_s28 = scalar_lea.hbm %s5355_s4, 4096 }
  0x8f   : > { %p4985_p10 = scmp.ne.s32.totalorder %s5355_s4, %s4984_s28  ;;  %s4989_s30 = scalar_lea.hbm %s6559_s8, 8192 }
  0x90   : > { %4399 = dma.hbm_to_vmem [thread:$0]  (!%p6605_p2), %s5395_s12, 1024, %s5418_s16, %s5281_s20, %s5128_s0, %s5128_s0, %s5129_s13  }
  0x91   : > { %p4987_p12 = pnand %p4985_p10, %p6604_p5  ;;  %p4990_p1 = scmp.lt.u32.totalorder %s5355_s4, %s6559_s8 }
  0x92   : > { %p4991_p9 = scmp.lt.u32.totalorder %s4989_s30, %s4984_s28  ;;  %p4993_p3 = scmp.lt.u32.totalorder %s4984_s28, %s5355_s4 }
  0x93   : > { %p4988_p0 = pneg %p4987_p12 }
  0x94   : > { %p4992_p13 = por %p4991_p9, %p4990_p1 }
  0x96   : > { %p4994_p4 = por %p4993_p3, %p4992_p13 }
  0x98   : > { %p4995_p11 = pnand %p4994_p4, %p4988_p0 }
  0x9a   : > { %4998 = shalt.err (!%p4995_p11)
}
  0x9b   : > { %s4999_s12 = scalar_lea.vmem %s5359_s24, 4096  ;;  %s5130_s20 = smov [#allocation10]  }
  0x9c   : > { %p5000_p6 = scmp.ne.s32.totalorder %s5359_s24, %s4999_s12  ;;  %s5004_s16 = sshll.u32 %s5130_s20, 4  ;;  %s5005_s16 = int_to_ptr.vmem [resolvable:$false] %s5004_s16 }
  0x9d   : > { %s5006_s18 = scalar_lea.vmem %s5005_s16, 8192  ;;  %p5007_p10 = scmp.lt.s32.totalorder %s5359_s24, %s5005_s16 }
  0x9e   : > { %p5002_p7 = pnand %p5000_p6, %p6604_p5  ;;  %p5008_p12 = scmp.lt.s32.totalorder %s5006_s18, %s4999_s12 }
  0xa0   : > { %p5003_p8 = pneg %p5002_p7  ;;  %p5009_p1 = por %p5008_p12, %p5007_p10 }
  0xa2   : > { %p5010_p9 = pnand %p5009_p1, %p5003_p8 }
  0xa4   : > { %5013 = shalt.err (!%p5010_p9)
}
  0xa5   : > { %4405 = dma.hbm_to_vmem [thread:$0]  (!%p6605_p2), %s5355_s4, 4096, %s5359_s24, %s5326_s10, %s5128_s0, %s5128_s0, %s5129_s13  }
  0xa6   : > { %p6606_p5 = scmp.ne.s32.totalorder %s6602_s23, 0 }
  0xa7   : > { %p6607_p0 = scmp.eq.s32.totalorder (!%p6606_p5), %s5362_s22, 0 }
  0xa8   : > { %568 = sbr.rel (%p6606_p5) target bundleno = 4466 (0x1172), region = 76 }
  0xaf   : > { %5083 = dma.done.wait (%p6607_p0), [#allocation3], 512   ;;  %p6608_p13 = pmov %p6607_p0 }
  0xb0   : > { %s574_s15 = sand.u32 1, %s5362_s22   ;;  %s576_s29 = sand.u32 1, %s5108_s19  }
  0xb1   : > { %5085 = vsyncadd (%p6608_p13), [#allocation3], 4294966784  ;;  %s4368_s17 = smul.u32 192, %s576_s29  ;;  %s575_s26 = scalar_lea.sflag [#allocation6], %s574_s15 }
  0xb2   : > { %p6609_p3 = scmp.ne.s32.totalorder %s6601_s14, 0 }
  0xb3   : > { %s5478_s6 = scalar_lea.vmem [#allocation5], %s4368_s17 }
  0xb4   : > { %5087 = dma.done.wait (%p6609_p3), %s575_s26, 4096  }
  0xb5   : > { %5089 = vsyncadd (%p6609_p3), %s575_s26, 4294963200  ;;  %s3971_s10 = sshll.u32 %s576_s29, 6  ;;  %s3972_s4 = sshll.u32 %s576_s29, 8 }
  0xb6   : > { %s5484_s24 = scalar_lea.vmem [#allocation7], %s3971_s10  ;;  %s593_s23 = scalar_lea.sflag [#allocation9], %s574_s15 }
  0xb7   : > { %s5486_s7 = scalar_lea.vmem [#allocation8], %s3972_s4 }
  0xb8   : > { %5091 = dma.done.wait (%p6609_p3), %s593_s23, 8192  }
  0xb9   : > { %5093 = vsyncadd (%p6609_p3), %s593_s23, 4294959104  ;;  %p675_p2 = scmp.lt.s32.totalorder %s5362_s22, 1  ;;  %s6610_s15 = sld [smem:[#allocation25_spill]] }
  0xba   : > { %s5514_s17 = scalar_lea.vmem [#allocation10], %s3972_s4  ;;  %p6611_p4 = scmp.ne.s32.totalorder %s5362_s22, 0 }
  0xbb   : > { %s5494_s0 = scalar_select %p675_p2, %s5362_s22, 1 }
  0xbc   : > { %692 = sbr.rel (%p6611_p4) target bundleno = 197 (0xc5), region = 100  ;;  %s6612_s23 = sld [smem:[#allocation22_spill]] (!%p6611_p4) }
  0xbd   : > { %s677_s25 = scalar_lea.vmem %s6553_s2, %s5494_s0  ;;  %s680_s27 = scalar_lea.vmem %s6554_s3, %s5494_s0 }
  0xbe   : > { %s3974_s21 = sshll.u32 %s5494_s0, 2  ;;  %s687_s20 = scalar_lea.vmem %s6560_s9, %s5494_s0 }
  0xbf   : > { %s5512_s29 = scalar_lea.vmem %s6610_s15, %s3974_s21 }
  0xc2   : > { %v693_v0 = vld [vmem:[%s6612_s23] sm:$0xff] (!%p6611_p4)  ;;  %v694_v1 = vld [vmem:[%s6612_s23 + $0x8] sm:$0xff] (!%p6611_p4)  ;;  %v695_v2 = vld [vmem:[%s6612_s23 + $0x10] sm:$0xff] (!%p6611_p4) }
  0xc3   : > { %697 = vst [vmem:[#allocation11] sm:$0xff] %v693_v0  ;;  %698 = vst [vmem:[#allocation11 + $0x8] sm:$0xff] %v694_v1  ;;  %v696_v3 = vld [vmem:[%s6612_s23 + $0x18] sm:$0xff] }
  0xc4   : > { %699 = vst [vmem:[#allocation11 + $0x10] sm:$0xff] %v695_v2  ;;  %700 = vst [vmem:[#allocation11 + $0x18] sm:$0xff] %v696_v3 }
  0xc5 PF: > { %v4622_v8 = vld [vmem:[%s5478_s6 + $0x4] ss:$12 sps:$4 sm:$0xff]   ;;  %v4624_v9 = vld [vmem:[%s5478_s6] ss:$12 sps:$4 sm:$0xff]   ;;  %v4625_v10 = vld [vmem:[%s5478_s6 + $0x1c] ss:$12 sps:$4 sm:$0xff]  }
  0xc6   : > { %v4627_v11 = vld [vmem:[%s5478_s6 + $0x8] ss:$12 sps:$4 sm:$0xff]   ;;  %938 = vmatprep.subr.bf16.mxu0 %v4622_v8  ;;  %v4628_v28 = vld [vmem:[%s5478_s6 + $0x18] ss:$12 sps:$4 sm:$0xff]   ;;  %v4631_v30 = vld [vmem:[%s5478_s6 + $0x20] ss:$12 sps:$4 sm:$0xff]  }
  0xc7   : > { %939 = vmatpush1.bf16.msra.mxu0 %v4624_v9  ;;  %4230 = vmatprep.subr.bf16.mxu1 %v4627_v11  ;;  %v4629_v29 = vld [vmem:[%s5478_s6 + $0x34] ss:$12 sps:$4 sm:$0xff]   ;;  %v4632_v31 = vld [vmem:[%s5478_s6 + $0x30] ss:$12 sps:$4 sm:$0xff]   ;;  %v4633_v32 = vld [vmem:[%s5478_s6 + $0x4c] ss:$12 sps:$4 sm:$0xff]  }
  0xc8   : > { %940 = vmatprep.subr.bf16.mxu0 %v4625_v10  ;;  %4231 = vmatpush3.bf16.msra.mxu1 %v4627_v11  ;;  %v4635_v33 = vld [vmem:[%s5478_s6 + $0x38] ss:$12 sps:$4 sm:$0xff]   ;;  %v4636_v34 = vld [vmem:[%s5478_s6 + $0x48] ss:$12 sps:$4 sm:$0xff]   ;;  %v4639_v36 = vld [vmem:[%s5478_s6 + $0x50] ss:$12 sps:$4 sm:$0xff]  }
  0xc9   : > { %4232 = vmatprep.subr.bf16.mxu1 %v4631_v30  ;;  %v4637_v35 = vld [vmem:[%s5478_s6 + $0x64] ss:$12 sps:$4 sm:$0xff]   ;;  %v4640_v37 = vld [vmem:[%s5478_s6 + $0x60] ss:$12 sps:$4 sm:$0xff]   ;;  %v4641_v38 = vld [vmem:[%s5478_s6 + $0x7c] ss:$12 sps:$4 sm:$0xff]  }
  0xca   : > { %v4643_v39 = vld [vmem:[%s5478_s6 + $0x68] ss:$12 sps:$4 sm:$0xff]   ;;  %v4644_v40 = vld [vmem:[%s5478_s6 + $0x78] ss:$12 sps:$4 sm:$0xff]   ;;  %v4647_v42 = vld [vmem:[%s5478_s6 + $0x80] ss:$12 sps:$4 sm:$0xff]  }
  0xcb   : > { %v703_v5 = vld [vmem:[#allocation11 + $0x10] sm:$0xff]  ;;  %v704_v7 = vld [vmem:[#allocation11 + $0x18] sm:$0xff]  ;;  %941 = vmatpush1.bf16.msra.mxu0 %v4628_v28  ;;  %v5131_v43 = vmov 0   ;;  %v3976_v63 = vld [vmem:[%s677_s25] ss:$0 sm:$0xff]  ;;  %s5133_s25 = smov 4  }
  0xcc   : > { %v701_v4 = vld [vmem:[#allocation11] sm:$0xff]  ;;  %v702_v6 = vld [vmem:[#allocation11 + $0x8] sm:$0xff]  ;;  %713 = vadd.xlane.f32.xlu1 %v703_v5  ;;  %942 = vmatprep.subr.bf16.mxu0 %v4629_v29  ;;  %v4648_v44 = vld [vmem:[%s5478_s6 + $0x90] ss:$12 sps:$4 sm:$0xff]   ;;  %vm5135_vm0 = vmmov 0   ;;  %s5136_s18 = smov 92  }
  0xcd   : > { %709 = vadd.xlane.f32.xlu0 %v701_v4  ;;  %4233 = vmatpush3.bf16.msra.mxu1 %v4631_v30  ;;  %v4645_v41 = vld [vmem:[%s5478_s6 + $0x94] ss:$12 sps:$4 sm:$0xff]   ;;  %v4649_v45 = vld [vmem:[%s5478_s6 + $0xac] ss:$12 sps:$4 sm:$0xff]   ;;  %v4653_v48 = vld [vmem:[%s5478_s6 + $0xb0] ss:$12 sps:$4 sm:$0xff]  }
  0xce   : > { %4234 = vmatprep.subr.bf16.mxu1 %v4635_v33  ;;  %970 = vmatprep.mubr.bf16.mxu0 %v5131_v43  ;;  %v4651_v46 = vld [vmem:[%s5478_s6 + $0x98] ss:$12 sps:$4 sm:$0xff]   ;;  %v4652_v47 = vld [vmem:[%s5478_s6 + $0xa8] ss:$12 sps:$4 sm:$0xff]   ;;  %s5137_s15 = smov 100   ;;  %vm1076_vm1 = vcmask 31744  }
  0xcf   : > { %943 = vmatpush1.bf16.msra.mxu0 %v4632_v31  ;;  %s6613_s13 = sld [smem:[#allocation29_spill]]  ;;  %s6614_s30 = sld [smem:[#allocation28_spill]]  ;;  %vm1093_vm2 = vcmask 64512   ;;  %vm1150_vm3 = vcmask 261120   ;;  %vm1245_vm4 = vcmask 130048   ;;  %vm2698_vm5 = vcmask 523264  }
  0xd0   : > { %715 = vadd.xlane.f32.xlu1 %v704_v7  ;;  %944 = vmatprep.subr.bf16.mxu0 %v4633_v32  ;;  %s5138_s12 = smov 32   ;;  %s5139_s16 = smov 96   ;;  %vm2703_vm6 = vcmask 785408  }
  0xd1   : > { %711 = vadd.xlane.f32.xlu0 %v702_v6  ;;  %4235 = vmatpush3.bf16.msra.mxu1 %v4635_v33  ;;  %s5143_s26 = smov 28   ;;  %s5144_s10 = smov 36  }
  0xd2   : > { %4236 = vmatprep.subr.bf16.mxu1 %v4639_v36  ;;  %p4091_p11 = scmp.ne.s32.totalorder %s5362_s22, 1 }
  0xd3   : > { %945 = vmatpush1.bf16.msra.mxu0 %v4636_v34 }
  0xd4   : > { %946 = vmatprep.subr.bf16.mxu0 %v4637_v35 }
  0xd5   : > { %4237 = vmatpush3.bf16.msra.mxu1 %v4639_v36 }
  0xd6   : > { %4238 = vmatprep.subr.bf16.mxu1 %v4643_v39 }
  0xd7   : > { %947 = vmatpush1.bf16.msra.mxu0 %v4640_v37 }
  0xd8   : > { %948 = vmatprep.subr.bf16.mxu0 %v4641_v38 }
  0xd9   : > { %4239 = vmatpush3.bf16.msra.mxu1 %v4643_v39 }
  0xda   : > { %4240 = vmatprep.subr.bf16.mxu1 %v4647_v42 }
  0xdb   : > { %949 = vmatpush1.bf16.msra.mxu0 %v4644_v40  ;;  %v5685_v40 = vld [vmem:[%s6613_s13] sm:$0xff] }
  0xdc   : > { %950 = vmatprep.subr.bf16.mxu0 %v4645_v41 }
  0xdd   : > { %4241 = vmatpush3.bf16.msra.mxu1 %v4647_v42 }
  0xde   : > { %4242 = vmatprep.subr.bf16.mxu1 %v4651_v46 }
  0xdf   : > { %951 = vmatpush1.bf16.msra.mxu0 %v4648_v44 }
  0xe0   : > { %952 = vmatprep.subr.bf16.mxu0 %v4649_v45  ;;  %v5691_v45 = vld [vmem:[%s6614_s30] sm:$0xff] }
  0xe1   : > { %4243 = vmatpush3.bf16.msra.mxu1 %v4651_v46 }
  0xe2   : > { %4244 = vmatprep.subr.bf16.mxu1 %v4653_v48 }
  0xe3   : > { %953 = vmatpush1.bf16.msra.mxu0 %v4652_v47  ;;  %v5697_v47 = vld [vmem:[%s6614_s30 + $0x8] sm:$0xff] }
  0xe5   : > { %4245 = vmatpush3.bf16.msra.mxu1 %v4653_v48  ;;  %v5702_v48 = vld [vmem:[%s6613_s13 + $0x8] sm:$0xff] }
 0x159   : > { %v714_v13 = vpop.xlane.xlu1 %713 }
 0x15a   : > { %v710_v12 = vpop.xlane.xlu0 %709  ;;  %v720_v15 = vmul.f32 0.0078125, %v714_v13 }
 0x15b   : > { %v718_v14 = vmul.f32 0.0078125, %v710_v12 }
 0x15c   : > { %v5536_v17 = vsub.f32 %v703_v5, %v720_v15 }
 0x15d   : > { %v5534_v16 = vsub.f32 %v701_v4, %v718_v14  ;;  %v716_v19 = vpop.xlane.xlu1 %715  ;;  %v3977_v4 = vld [vmem:[%s680_s27] ss:$0 sm:$0xff]  ;;  %s5134_s27 = smov 124  }
 0x15e   : > { %v712_v18 = vpop.xlane.xlu0 %711  ;;  %v721_v22 = vmul.f32 0.0078125, %v716_v19  ;;  %v728_v23 = vmul.f32 %v5536_v17, %v5536_v17 }
 0x15f   : > { %v719_v20 = vmul.f32 0.0078125, %v712_v18  ;;  %v726_v21 = vmul.f32 %v5534_v16, %v5534_v16 }
 0x160   : > { %v5544_v25 = vsub.f32 %v704_v7, %v721_v22 }
 0x161   : > { %730 = vadd.xlane.f32.xlu0 %v726_v21  ;;  %v5542_v24 = vsub.f32 %v702_v6, %v719_v20 }
 0x162   : > { %v729_v27 = vmul.f32 %v5544_v25, %v5544_v25 }
 0x163   : > { %v727_v26 = vmul.f32 %v5542_v24, %v5542_v24 }
 0x165   : > { %734 = vadd.xlane.f32.xlu0 %v728_v23  ;;  %732 = vadd.xlane.f32.xlu1 %v727_v26 }
 0x169   : > { %736 = vadd.xlane.f32.xlu1 %v729_v27 }
 0x1ee   : > { %v731_v49 = vpop.xlane.xlu0 %730 }
 0x1ef   : > { %v738_v50 = vmul.f32 0.0078125, %v731_v49 }
 0x1f1   : > { %v742_v51 = vadd.f32 1e-05, %v738_v50 }
 0x1f2   : > { %v733_v52 = vpop.xlane.xlu1 %732  ;;  %v735_v53 = vpop.xlane.xlu0 %734 }
 0x1f3   : > { %4742 = vrsqrt.f32 %v742_v51  ;;  %v739_v54 = vmul.f32 0.0078125, %v733_v52  ;;  %v740_v55 = vmul.f32 0.0078125, %v735_v53 }
 0x1f5   : > { %v743_v56 = vadd.f32 1e-05, %v739_v54  ;;  %v744_v57 = vadd.f32 1e-05, %v740_v55 }
 0x1f6   : > { %v737_v58 = vpop.xlane.xlu1 %736 }
 0x1f7   : > { %4744 = vrsqrt.f32 %v743_v56  ;;  %v741_v59 = vmul.f32 0.0078125, %v737_v58 }
 0x1f8   : > { %4746 = vrsqrt.f32 %v744_v57 }
 0x1f9   : > { %v745_v60 = vadd.f32 1e-05, %v741_v59 }
 0x1fb   : > { %4748 = vrsqrt.f32 %v745_v60 }
 0x1fd   : > { %v4743_v61 = vpop.eup %4742 }
 0x1fe   : > { %v750_v62 = vmul.f32 %v4743_v61, %v5534_v16 }
 0x200   : > { %v761_v3 = vmul.f32 %v3976_v63, %v750_v62 }
 0x201   : > { %v4745_v0 = vpop.eup %4744 }
 0x202   : > { %v4747_v1 = vpop.eup %4746  ;;  %v751_v2 = vmul.f32 %v4745_v0, %v5542_v24  ;;  %v772_v8 = vadd.f32 %v3977_v4, %v761_v3 }
 0x203   : > { %v752_v5 = vmul.f32 %v4747_v1, %v5536_v17  ;;  %v5132_v17 = vmov 0.0  }
 0x204   : > { %v762_v6 = vmul.f32 %v3976_v63, %v751_v2  ;;  %4262 = vmatprep.subr.bf16.mxu1 %v5132_v17  ;;  %4250 = vmatprep.subr.bf16.mxu0 %v5132_v17 }
 0x205   : > { %v4749_v7 = vpop.eup %4748  ;;  %v763_v11 = vmul.f32 %v3976_v63, %v752_v5 }
 0x206   : > { %v773_v9 = vadd.f32 %v3977_v4, %v762_v6  ;;  %v753_v10 = vmul.f32 %v4749_v7, %v5544_v25 }
 0x207   : > { %v774_v14 = vadd.f32 %v3977_v4, %v763_v11 }
 0x208   : > { %v5585_v12 = vpack.c.bf16 %v773_v9, %v772_v8  ;;  %v764_v13 = vmul.f32 %v3976_v63, %v753_v10 }
 0x20a   : > { %971 = vmatmul.mubr.bf16.vlgmr.msra.gmra.mrb[0].mxu0 %v5585_v12  ;;  %4246 = vmatprep.mubr.bf16.mxu1 %v5585_v12  ;;  %v775_v15 = vadd.f32 %v3977_v4, %v764_v13 }
 0x20b   : > { %980 = vmatprep.mubr.bf16.mxu0 %v5131_v43 }
 0x20c   : > { %v5590_v16 = vpack.c.bf16 %v775_v15, %v774_v14 }
 0x20e   : > { %4247 = vmatmul.mubr.bf16.vlgmr.msra.gmra.mrb[0].mxu1 %v5590_v16 }
 0x20f   : > { %4264 = vmatprep.mubr.msk.bf16.mxu1 %vm5135_vm0, %v5132_v17 }
 0x212   : > { %981 = vmatmul.mubr.bf16.gmra.mrb[4].mxu0 %v5590_v16 }
 0x213   : > { %4252 = vmatprep.mubr.msk.bf16.mxu0 %vm5135_vm0, %v5132_v17 }
 0x2dd   : > { %v972_v18 = vpop.f32.mrb[0].mxu0 }
 0x2de   : > { %v5596_v19 = vpop.f32.mrb[1].mxu0  ;;  %v5604_v22 = vmul.f32 0.17677669, %v972_v18 }
 0x2df   : > { %1114 = vrot.lane.b32.xlu1 %v5596_v19, %s5133_s25  ;;  %1102 = vrot.lane.b32.xlu0 %v5596_v19, %s5134_s27  ;;  %v976_v20 = vpop.f32.mrb[2].mxu0  ;;  %v1130_v49 = vmul.f32 %v5691_v45, %v5596_v19 }
 0x2e0   : > { %v5602_v21 = vpop.f32.mrb[3].mxu0  ;;  %v5627_v34 = vmul.f32 0.17677669, %v976_v20  ;;  %v1081_v0 = vmul.f32 %v5604_v22, %v5691_v45 }
 0x2e1   : > { %v4248_v23 = vpop.f32.mrb[0].mxu1  ;;  %v5608_v24 = vpack.i.bf16 %v5602_v21, %v5596_v19  ;;  %v1131_v54 = vmul.f32 %v5697_v47, %v5602_v21 }
 0x2e2   : > { %v1025_v25 = vpop.f32.mrb[1].mxu1  ;;  %v1082_v6 = vmul.f32 %v5627_v34, %v5697_v47 }
 0x2e3   : > { %1052 = vrot.lane.b32.xlu0 %v5604_v22, %s5134_s27  ;;  %1104 = vrot.lane.b32.xlu1 %v5602_v21, %s5134_s27  ;;  %v4249_v26 = vpop.f32.mrb[2].mxu1 }
 0x2e4   : > { %v5614_v27 = vpack.c.bf16 %v4249_v26, %v4248_v23  ;;  %v1028_v28 = vpop.f32.mrb[3].mxu1 }
 0x2e5   : > { %v5616_v29 = vpack.c.bf16 %v1028_v28, %v1025_v25  ;;  %v982_v30 = vpop.f32.mrb[4].mxu0 }
 0x2e6   : > { %v5618_v31 = vpop.f32.mrb[5].mxu0  ;;  %v5646_v36 = vmul.f32 0.17677669, %v982_v30 }
 0x2e7   : > { %1064 = vrot.lane.b32.xlu0 %v5604_v22, %s5133_s25  ;;  %1116 = vrot.lane.b32.xlu1 %v5602_v21, %s5133_s25  ;;  %v986_v32 = vpop.f32.mrb[6].mxu0  ;;  %v1132_v20 = vmul.f32 %v5691_v45, %v5618_v31 }
 0x2e8   : > { %4263 = vmatpush3.bf16.msra.mxu1 %v5616_v29  ;;  %v5625_v33 = vpop.f32.mrb[7].mxu0  ;;  %v5656_v37 = vmul.f32 0.17677669, %v986_v32 }
 0x2e9   : > { %v5633_v35 = vpack.i.bf16 %v5625_v33, %v5618_v31  ;;  %4274 = vmatprep.subr.bf16.mxu1 %v5132_v17  ;;  %v1133_v30 = vmul.f32 %v5697_v47, %v5625_v33 }
 0x2eb   : > { %1054 = vrot.lane.b32.xlu1 %v5627_v34, %s5134_s27  ;;  %1106 = vrot.lane.b32.xlu0 %v5618_v31, %s5134_s27 }
 0x2ef   : > { %1066 = vrot.lane.b32.xlu1 %v5627_v34, %s5133_s25  ;;  %1118 = vrot.lane.b32.xlu0 %v5618_v31, %s5133_s25 }
 0x2f3   : > { %1056 = vrot.lane.b32.xlu0 %v5646_v36, %s5134_s27  ;;  %1108 = vrot.lane.b32.xlu1 %v5625_v33, %s5134_s27 }
 0x2f7   : > { %1068 = vrot.lane.b32.xlu0 %v5646_v36, %s5133_s25  ;;  %1120 = vrot.lane.b32.xlu1 %v5625_v33, %s5133_s25 }
 0x2fb   : > { %1478 = vrot.lane.b32.xlu0 %v5596_v19, %s5136_s18  ;;  %1058 = vrot.lane.b32.xlu1 %v5656_v37, %s5134_s27  ;;  %s5140_s27 = smov 60  }
 0x2ff   : > { %1490 = vrot.lane.b32.xlu0 %v5596_v19, %s5137_s15  ;;  %1070 = vrot.lane.b32.xlu1 %v5656_v37, %s5133_s25 }
 0x303   : > { %1482 = vrot.lane.b32.xlu0 %v5618_v31, %s5136_s18  ;;  %1480 = vrot.lane.b32.xlu1 %v5602_v21, %s5136_s18 }
 0x307   : > { %1494 = vrot.lane.b32.xlu0 %v5618_v31, %s5137_s15  ;;  %1492 = vrot.lane.b32.xlu1 %v5602_v21, %s5137_s15 }
 0x30b   : > { %1382 = vrot.lane.b32.xlu0 %v5604_v22, %s5136_s18  ;;  %1484 = vrot.lane.b32.xlu1 %v5625_v33, %s5136_s18 }
 0x30f   : > { %1386 = vrot.lane.b32.xlu0 %v5646_v36, %s5136_s18  ;;  %1496 = vrot.lane.b32.xlu1 %v5625_v33, %s5137_s15 }
 0x313   : > { %1384 = vrot.lane.b32.xlu1 %v5627_v34, %s5136_s18 }
 0x317   : > { %1394 = vrot.lane.b32.xlu1 %v5604_v22, %s5137_s15 }
 0x31b   : > { %1396 = vrot.lane.b32.xlu1 %v5627_v34, %s5137_s15 }
 0x31f   : > { %1388 = vrot.lane.b32.xlu1 %v5656_v37, %s5136_s18  ;;  %s5141_s18 = smov 68  }
 0x351   : > { %v1115_v38 = vpop.permute.xlu1 %1114  ;;  %v1103_v39 = vpop.permute.xlu0 %1102 }
 0x352   : > { %v1126_v41 = vsel %vm1076_vm1, %v1103_v39, %v1115_v38 }
 0x353   : > { %v1134_v46 = vmul.f32 %v1126_v41, %v5685_v40 }
 0x355   : > { %v1105_v42 = vpop.permute.xlu1 %1104  ;;  %v1053_v44 = vpop.permute.xlu0 %1052  ;;  %v1138_v53 = vadd.f32 %v1134_v46, %v1130_v49 }
 0x357   : > { %v1142_v61 = vsel %vm1093_vm2, %v1138_v53, %v5596_v19 }
 0x359   : > { %v1117_v50 = vpop.permute.xlu1 %1116  ;;  %v1065_v51 = vpop.permute.xlu0 %1064 }
 0x35a   : > { %v1127_v52 = vsel %vm1076_vm1, %v1105_v42, %v1117_v50  ;;  %v1077_v56 = vsel %vm1076_vm1, %v1053_v44, %v1065_v51  ;;  %v1083_v50 = vmul.f32 %v5646_v36, %v5691_v45 }
 0x35b   : > { %v1135_v55 = vmul.f32 %v1127_v52, %v5702_v48  ;;  %v1085_v60 = vmul.f32 %v1077_v56, %v5685_v40 }
 0x35d   : > { %v1139_v57 = vadd.f32 %v1135_v55, %v1131_v54  ;;  %v1055_v58 = vpop.permute.xlu1 %1054  ;;  %v1107_v59 = vpop.permute.xlu0 %1106  ;;  %v1089_v5 = vadd.f32 %v1085_v60, %v1081_v0  ;;  %v1084_v55 = vmul.f32 %v5656_v37, %v5697_v47  ;;  %v5764_v0 = vld [vmem:[#allocation2 + $0x8] sm:$0xff] }
 0x35f   : > { %v1143_v62 = vsel %vm1093_vm2, %v1139_v57, %v5602_v21  ;;  %v1094_v13 = vsel %vm1093_vm2, %v1089_v5, %v5604_v22 }
 0x360   : > { %v1148_v63 = vpack.c.bf16 %v1143_v62, %v1142_v61  ;;  %v5762_v62 = vld [vmem:[#allocation2] sm:$0xff] }
 0x361   : > { %v1067_v1 = vpop.permute.xlu1 %1066  ;;  %v1119_v2 = vpop.permute.xlu0 %1118 }
 0x362   : > { %v1078_v3 = vsel %vm1076_vm1, %v1055_v58, %v1067_v1  ;;  %v1155_v4 = vsel %vm1150_vm3, %v1148_v63, 0  ;;  %v1128_v8 = vsel %vm1076_vm1, %v1107_v59, %v1119_v2 }
 0x363   : > { %v1086_v7 = vmul.f32 %v1078_v3, %v5702_v48  ;;  %4251 = vmatpush3.bf16.xpose.msra.mxu0 %v1155_v4  ;;  %v1136_v15 = vmul.f32 %v1128_v8, %v5685_v40 }
 0x364   : > { %4256 = vmatprep.subr.bf16.mxu0 %v5132_v17 }
 0x365   : > { %v1090_v9 = vadd.f32 %v1086_v7, %v1082_v6  ;;  %v1109_v10 = vpop.permute.xlu1 %1108  ;;  %v1057_v11 = vpop.permute.xlu0 %1056  ;;  %v1140_v28 = vadd.f32 %v1136_v15, %v1132_v20 }
 0x367   : > { %v1095_v14 = vsel %vm1093_vm2, %v1090_v9, %v5627_v34  ;;  %v1144_v44 = vsel %vm1093_vm2, %v1140_v28, %v5618_v31 }
 0x368   : > { %v1146_v18 = vpack.c.bf16 %v1095_v14, %v1094_v13  ;;  %v5778_v14 = vld [vmem:[#allocation2 + $0x18] sm:$0xff] }
 0x369   : > { %v1121_v23 = vpop.permute.xlu1 %1120  ;;  %v1069_v25 = vpop.permute.xlu0 %1068 }
 0x36a   : > { %v1129_v26 = vsel %vm1076_vm1, %v1109_v10, %v1121_v23  ;;  %4253 = vmatmul.mubr.msk.bf16.vlgmr.msra.gmra.mrb[8].mxu0 %vm1150_vm3, %v1146_v18  ;;  %v1079_v38 = vsel %vm1076_vm1, %v1057_v11, %v1069_v25  ;;  %v5776_v11 = vld [vmem:[#allocation2 + $0x10] sm:$0xff] }
 0x36b   : > { %v1137_v32 = vmul.f32 %v1129_v26, %v5702_v48  ;;  %4258 = vmatprep.mubr.msk.bf16.mxu0 %vm5135_vm0, %v5132_v17  ;;  %v1087_v42 = vmul.f32 %v1079_v38, %v5685_v40 }
 0x36d   : > { %v1141_v39 = vadd.f32 %v1137_v32, %v1133_v30  ;;  %v1059_v41 = vpop.permute.xlu1 %1058  ;;  %v1091_v54 = vadd.f32 %v1087_v42, %v1083_v50 }
 0x36f   : > { %v1145_v46 = vsel %vm1093_vm2, %v1141_v39, %v5625_v33  ;;  %v1096_v58 = vsel %vm1093_vm2, %v1091_v54, %v5646_v36 }
 0x370   : > { %v1149_v49 = vpack.c.bf16 %v1145_v46, %v1144_v44  ;;  %v1479_v44 = vpop.permute.xlu0 %1478 }
 0x371   : > { %v1071_v51 = vpop.permute.xlu1 %1070 }
 0x372   : > { %v1080_v52 = vsel %vm1076_vm1, %v1059_v41, %v1071_v51  ;;  %v1202_v53 = vsel %vm1150_vm3, %v1149_v49, 0 }
 0x373   : > { %v1088_v56 = vmul.f32 %v1080_v52, %v5702_v48  ;;  %4257 = vmatpush3.bf16.xpose.msra.mxu0 %v1202_v53 }
 0x374   : > { %4268 = vmatprep.subr.bf16.mxu0 %v5132_v17  ;;  %v1491_v51 = vpop.permute.xlu0 %1490 }
 0x375   : > { %v1092_v57 = vadd.f32 %v1088_v56, %v1084_v55  ;;  %v1481_v61 = vpop.permute.xlu1 %1480  ;;  %v1502_v53 = vsel %vm1076_vm1, %v1479_v44, %v1491_v51 }
 0x376   : > { %v1510_v55 = vmul.f32 %v1502_v53, %v5685_v40 }
 0x377   : > { %v1097_v59 = vsel %vm1093_vm2, %v1092_v57, %v5656_v37 }
 0x378   : > { %v1147_v60 = vpack.c.bf16 %v1097_v59, %v1096_v58  ;;  %v1483_v52 = vpop.permute.xlu0 %1482 }
 0x379   : > { %v1493_v1 = vpop.permute.xlu1 %1492 }
 0x37a   : > { %4259 = vmatmul.mubr.msk.bf16.vlgmr.msra.gmra.mrb[12].mxu0 %vm1150_vm3, %v1147_v60  ;;  %v1503_v38 = vsel %vm1076_vm1, %v1481_v61, %v1493_v1 }
 0x37b   : > { %4269 = vmatpush3.bf16.msra.mxu0 %v5614_v27  ;;  %4270 = vmatprep.mubr.msk.bf16.mxu0 %vm5135_vm0, %v5132_v17  ;;  %v1511_v39 = vmul.f32 %v1503_v38, %v5702_v48 }
 0x37c   : > { %4280 = vmatprep.subr.bf16.mxu0 %v5132_v17  ;;  %v1495_v54 = vpop.permute.xlu0 %1494 }
 0x37d   : > { %v1485_v9 = vpop.permute.xlu1 %1484  ;;  %v1504_v56 = vsel %vm1076_vm1, %v1483_v52, %v1495_v54 }
 0x37e   : > { %v1512_v57 = vmul.f32 %v1504_v56, %v5685_v40 }
 0x380   : > { %v1383_v58 = vpop.permute.xlu0 %1382 }
 0x381   : > { %v1497_v10 = vpop.permute.xlu1 %1496 }
 0x382   : > { %v1505_v41 = vsel %vm1076_vm1, %v1485_v9, %v1497_v10 }
 0x383   : > { %v1513_v46 = vmul.f32 %v1505_v41, %v5702_v48 }
 0x385   : > { %v1385_v23 = vpop.permute.xlu1 %1384 }
 0x389   : > { %v1395_v32 = vpop.permute.xlu1 %1394 }
 0x38a   : > { %v1406_v59 = vsel %vm1076_vm1, %v1383_v58, %v1395_v32 }
 0x38b   : > { %v1422_v60 = vmul.f32 %v1406_v59, %v5685_v40 }
 0x38d   : > { %v1397_v42 = vpop.permute.xlu1 %1396 }
 0x38e   : > { %v1407_v49 = vsel %vm1076_vm1, %v1385_v23, %v1397_v42 }
 0x38f   : > { %v1423_v50 = vmul.f32 %v1407_v49, %v5702_v48 }
 0x391   : > { %v1389_v61 = vpop.permute.xlu1 %1388 }
 0x43d   : > { %v1191_v63 = vpop.f32.mrb[8].mxu0 }
 0x43e   : > { %v5767_v2 = vadd.f32 %v1191_v63, %v5762_v62  ;;  %v4254_v3 = vpop.f32.mrb[9].mxu0 }
 0x43f   : > { %v1194_v4 = vpop.f32.mrb[10].mxu0 }
 0x440   : > { %v5770_v5 = vadd.f32 %v1194_v4, %v5764_v0  ;;  %v4255_v6 = vpop.f32.mrb[11].mxu0  ;;  %v1246_v7 = vsel %vm1245_vm4, %v5767_v2, -inf  ;;  %v1387_v4 = vpop.permute.xlu0 %1386 }
 0x441   : > { %1247 = vmax.xlane.f32.xlu0 %v1246_v7 }
 0x442   : > { %v1249_v8 = vsel %vm1245_vm4, %v5770_v5, -inf }
 0x443   : > { %1250 = vmax.xlane.f32.xlu1 %v1249_v8 }
 0x44d   : > { %v1238_v13 = vpop.f32.mrb[12].mxu0 }
 0x44e   : > { %v5781_v15 = vadd.f32 %v1238_v13, %v5776_v11  ;;  %v4260_v18 = vpop.f32.mrb[13].mxu0 }
 0x44f   : > { %v1241_v20 = vpop.f32.mrb[14].mxu0 }
 0x450   : > { %v5784_v25 = vadd.f32 %v1241_v20, %v5778_v14  ;;  %v4261_v26 = vpop.f32.mrb[15].mxu0  ;;  %v1252_v28 = vsel %vm1245_vm4, %v5781_v15, -inf }
 0x451   : > { %1253 = vmax.xlane.f32.xlu0 %v1252_v28 }
 0x452   : > { %v1255_v30 = vsel %vm1245_vm4, %v5784_v25, -inf }
 0x454   : > { %1400 = vrot.lane.b32.xlu1 %v5656_v37, %s5137_s15 }
 0x455   : > { %1256 = vmax.xlane.f32.xlu0 %v1255_v30 }
 0x458   : > { %1414 = vrot.lane.b32.xlu1 %v5697_v47, %s5138_s12 }
 0x45c   : > { %1520 = vrot.lane.b32.xlu1 %v1511_v39, %s5138_s12 }
 0x460   : > { %1524 = vrot.lane.b32.xlu1 %v1513_v46, %s5138_s12 }
 0x464   : > { %1432 = vrot.lane.b32.xlu1 %v1423_v50, %s5138_s12 }
 0x46b   : > { %1398 = vrot.lane.b32.xlu0 %v5646_v36, %s5137_s15  ;;  %s5142_s15 = smov 64  }
 0x46f   : > { %1412 = vrot.lane.b32.xlu0 %v5691_v45, %s5138_s12 }
 0x473   : > { %1518 = vrot.lane.b32.xlu0 %v1510_v55, %s5138_s12 }
 0x477   : > { %1522 = vrot.lane.b32.xlu0 %v1512_v57, %s5138_s12 }
 0x47b   : > { %1430 = vrot.lane.b32.xlu0 %v1422_v60, %s5138_s12 }
 0x4ce   : > { %v1248_v7 = vpop.xlane.xlu0 %1247 }
 0x4cf   : > { %v1258_v53 = vsub.f32 %v5767_v2, %v1248_v7 }
 0x4d0   : > { %v1251_v63 = vpop.xlane.xlu1 %1250 }
 0x4d1   : > { %v1262_v54 = vmul.f32 1.442695, %v1258_v53  ;;  %v1259_v59 = vsub.f32 %v5770_v5, %v1251_v63 }
 0x4d3   : > { %4750 = vpow2.f32 %v1262_v54  ;;  %v1264_v60 = vmul.f32 1.442695, %v1259_v59 }
 0x4d4   : > { %v1401_v1 = vpop.permute.xlu1 %1400 }
 0x4d5   : > { %v1409_v3 = vsel %vm1076_vm1, %v1389_v61, %v1401_v1 }
 0x4d6   : > { %v1425_v6 = vmul.f32 %v1409_v3, %v5702_v48 }
 0x4d8   : > { %1436 = vrot.lane.b32.xlu1 %v1425_v6, %s5138_s12  ;;  %v5821_v10 = vpop.permute.xlu1 %1414 }
 0x4d9   : > { %v1507_v28 = vmul.f32 %v5821_v10, %v5602_v21  ;;  %v1509_v42 = vmul.f32 %v5821_v10, %v5625_v33 }
 0x4dc   : > { %4478 = vrot.lane.b32.xlu1 %v5608_v24, %s5139_s16  ;;  %v1521_v23 = vpop.permute.xlu1 %1520 }
 0x4dd   : > { %v1531_v38 = vadd.f32 %v1521_v23, %v1507_v28  ;;  %v5844_v61 = vpop.eup %4750  ;;  %v5873_v23 = vpack.i.bf16 %v5656_v37, %v5646_v36 }
 0x4de   : > { %v1254_v8 = vpop.xlane.xlu0 %1253  ;;  %v1270_v1 = vsel %vm1245_vm4, %v5844_v61, 0.0 }
 0x4df   : > { %v1260_v55 = vsub.f32 %v5781_v15, %v1254_v8  ;;  %v1419_v8 = vmul.f32 %v5821_v10, %v5627_v34 }
 0x4e0   : > { %v1525_v41 = vpop.permute.xlu1 %1524 }
 0x4e1   : > { %v1533_v50 = vadd.f32 %v1525_v41, %v1509_v42  ;;  %v1266_v56 = vmul.f32 1.442695, %v1260_v55 }
 0x4e2   : > { %v1257_v9 = vpop.xlane.xlu0 %1256 }
 0x4e3   : > { %v1261_v57 = vsub.f32 %v5784_v25, %v1257_v9  ;;  %4752 = vpow2.f32 %v1266_v56 }
 0x4e4   : > { %v1433_v7 = vpop.permute.xlu1 %1432 }
 0x4e5   : > { %v1268_v58 = vmul.f32 1.442695, %v1261_v57 }
 0x4e6   : > { %v1399_v13 = vpop.permute.xlu0 %1398 }
 0x4e7   : > { %v1408_v18 = vsel %vm1076_vm1, %v1387_v4, %v1399_v13  ;;  %4754 = vpow2.f32 %v1268_v58  ;;  %v1443_v13 = vadd.f32 %v1433_v7, %v1419_v8 }
 0x4e8   : > { %v1424_v20 = vmul.f32 %v1408_v18, %v5685_v40  ;;  %4756 = vpow2.f32 %v1264_v60 }
 0x4ea   : > { %1434 = vrot.lane.b32.xlu0 %v1424_v20, %s5138_s12  ;;  %v5826_v26 = vpop.permute.xlu0 %1412  ;;  %v5866_v20 = vpack.i.bf16 %v5627_v34, %v5604_v22 }
 0x4eb   : > { %v1506_v30 = vmul.f32 %v5826_v26, %v5596_v19  ;;  %v1508_v46 = vmul.f32 %v5826_v26, %v5618_v31  ;;  %v1418_v6 = vmul.f32 %v5826_v26, %v5604_v22 }
 0x4ed   : > { %v5848_v2 = vpop.eup %4752 }
 0x4ee   : > { %v1519_v32 = vpop.permute.xlu0 %1518  ;;  %v1276_v15 = vsel %vm1245_vm4, %v5848_v2, 0.0 }
 0x4ef   : > { %v1530_v39 = vadd.f32 %v1519_v32, %v1506_v30  ;;  %v1421_v30 = vmul.f32 %v5821_v10, %v5656_v37  ;;  %v1420_v32 = vmul.f32 %v5826_v26, %v5646_v36 }
 0x4f1   : > { %v4472_v44 = vpack.i.bf16 %v1531_v38, %v1530_v39  ;;  %v5852_v3 = vpop.eup %4754 }
 0x4f2   : > { %v1523_v49 = vpop.permute.xlu0 %1522  ;;  %v1279_v5 = vsel %vm1245_vm4, %v5852_v3, 0.0  ;;  %v5856_v25 = vpop.eup %4756 }
 0x4f3   : > { %v1532_v51 = vadd.f32 %v1523_v49, %v1508_v46  ;;  %4473 = vrot.lane.b32.xlu0 %v4472_v44, %s5139_s16  ;;  %v1273_v63 = vsel %vm1245_vm4, %v5856_v25, 0.0 }
 0x4f5   : > { %v4482_v52 = vpack.i.bf16 %v1533_v50, %v1532_v51 }
 0x4f6   : > { %v1431_v4 = vpop.permute.xlu0 %1430 }
 0x4f7   : > { %4483 = vrot.lane.b32.xlu1 %v4482_v52, %s5139_s16  ;;  %v1442_v9 = vadd.f32 %v1431_v4, %v1418_v6 }
 0x4f9   : > { %v4492_v18 = vpack.i.bf16 %v1443_v13, %v1442_v9 }
 0x4fb   : > { %4488 = vrot.lane.b32.xlu1 %v5633_v35, %s5139_s16 }
 0x512   : > { %1271 = vadd.xlane.f32.xlu0 %v1270_v1 }
 0x516   : > { %1277 = vadd.xlane.f32.xlu0 %v1276_v15 }
 0x51a   : > { %1280 = vadd.xlane.f32.xlu0 %v1279_v5 }
 0x51f   : > { %1274 = vadd.xlane.f32.xlu1 %v1273_v63 }
 0x530   : > { %4498 = vrot.lane.b32.xlu1 %v5866_v20, %s5139_s16  ;;  %4493 = vrot.lane.b32.xlu0 %v4492_v18, %s5139_s16 }
 0x534   : > { %4508 = vrot.lane.b32.xlu1 %v5873_v23, %s5139_s16 }
 0x538   : > { %1902 = vrot.lane.b32.xlu1 %v5602_v21, %s5140_s27 }
 0x53c   : > { %1914 = vrot.lane.b32.xlu1 %v5602_v21, %s5141_s18 }
 0x540   : > { %1906 = vrot.lane.b32.xlu1 %v5625_v33, %s5140_s27 }
 0x544   : > { %1918 = vrot.lane.b32.xlu1 %v5625_v33, %s5141_s18 }
 0x548   : > { %1808 = vrot.lane.b32.xlu1 %v5627_v34, %s5140_s27 }
 0x54a   : > { %v1437_v28 = vpop.permute.xlu1 %1436 }
 0x54b   : > { %v1445_v39 = vadd.f32 %v1437_v28, %v1421_v30 }
 0x54c   : > { %1818 = vrot.lane.b32.xlu1 %v5604_v22, %s5141_s18 }
 0x54e   : > { %v4479_v26 = vpop.permute.xlu1 %4478 }
 0x54f   : > { %v4481_v5 = vunpack.i.h.bf16 %v4479_v26  ;;  %v4480_v63 = vunpack.i.l.bf16 %v4479_v26 }
 0x550   : > { %1820 = vrot.lane.b32.xlu1 %v5627_v34, %s5141_s18 }
 0x554   : > { %1812 = vrot.lane.b32.xlu1 %v5656_v37, %s5140_s27 }
 0x55c   : > { %v1435_v38 = vpop.permute.xlu0 %1434 }
 0x55d   : > { %v1444_v41 = vadd.f32 %v1435_v38, %v1420_v32 }
 0x55f   : > { %v4502_v42 = vpack.i.bf16 %v1445_v39, %v1444_v41 }
 0x561   : > { %4503 = vrot.lane.b32.xlu0 %v4502_v42, %s5139_s16 }
 0x565   : > { %1900 = vrot.lane.b32.xlu0 %v5596_v19, %s5140_s27  ;;  %v4474_v10 = vpop.permute.xlu0 %4473 }
 0x566   : > { %v4476_v60 = vunpack.i.h.bf16 %v4474_v10  ;;  %v4475_v1 = vunpack.i.l.bf16 %v4474_v10 }
 0x568   : > { %v1562_v13 = vsel %vm1093_vm2, %v4475_v1, %v4480_v63  ;;  %v1563_v18 = vsel %vm1093_vm2, %v4476_v60, %v4481_v5 }
 0x569   : > { %1912 = vrot.lane.b32.xlu0 %v5596_v19, %s5141_s18  ;;  %v4484_v46 = vpop.permute.xlu1 %4483 }
 0x56a   : > { %v4486_v55 = vunpack.i.h.bf16 %v4484_v46  ;;  %v4485_v56 = vunpack.i.l.bf16 %v4484_v46 }
 0x56d   : > { %1904 = vrot.lane.b32.xlu0 %v5618_v31, %s5140_s27  ;;  %v4489_v51 = vpop.permute.xlu1 %4488 }
 0x56e   : > { %v4491_v52 = vunpack.i.h.bf16 %v4489_v51  ;;  %v4490_v53 = vunpack.i.l.bf16 %v4489_v51 }
 0x570   : > { %v1564_v58 = vsel %vm1093_vm2, %v4485_v56, %v4490_v53  ;;  %v1565_v59 = vsel %vm1093_vm2, %v4486_v55, %v4491_v52 }
 0x571   : > { %1916 = vrot.lane.b32.xlu0 %v5618_v31, %s5141_s18  ;;  %v1569_v7 = vpack.c.bf16 %v1565_v59, %v1564_v58 }
 0x573   : > { %v1621_v30 = vsel %vm1150_vm3, %v1569_v7, 0 }
 0x575   : > { %1806 = vrot.lane.b32.xlu0 %v5604_v22, %s5140_s27 }
 0x579   : > { %1810 = vrot.lane.b32.xlu0 %v5646_v36, %s5140_s27 }
 0x59f   : > { %v1272_v44 = vpop.xlane.xlu0 %1271 }
 0x5a3   : > { %v1278_v49 = vpop.xlane.xlu0 %1277 }
 0x5a4   : > { %4758 = vrcp.f32 %v1278_v49 }
 0x5a7   : > { %v1281_v50 = vpop.xlane.xlu0 %1280 }
 0x5a8   : > { %4760 = vrcp.f32 %v1281_v50 }
 0x5a9   : > { %4762 = vrcp.f32 %v1272_v44 }
 0x5ac   : > { %v1275_v54 = vpop.xlane.xlu1 %1274 }
 0x5ad   : > { %4764 = vrcp.f32 %v1275_v54 }
 0x5ae   : > { %v4759_v57 = vpop.eup %4758 }
 0x5af   : > { %v1288_v4 = vmul.f32 %v4759_v57, %v5848_v2  ;;  %v1568_v2 = vpack.c.bf16 %v1563_v18, %v1562_v13 }
 0x5b0   : > { %v4499_v39 = vpop.permute.xlu1 %4498 }
 0x5b1   : > { %v4501_v42 = vunpack.i.h.bf16 %v4499_v39  ;;  %v4500_v10 = vunpack.i.l.bf16 %v4499_v39  ;;  %v1574_v26 = vsel %vm1150_vm3, %v1568_v2, 0 }
 0x5b2   : > { %v4761_v15 = vpop.eup %4760 }
 0x5b3   : > { %v1289_v6 = vmul.f32 %v4761_v15, %v5852_v3  ;;  %v4763_v8 = vpop.eup %4762  ;;  %v4494_v3 = vpop.permute.xlu0 %4493 }
 0x5b4   : > { %v1286_v32 = vmul.f32 %v4763_v8, %v5844_v61  ;;  %v4496_v44 = vunpack.i.h.bf16 %v4494_v3  ;;  %v4495_v61 = vunpack.i.l.bf16 %v4494_v3  ;;  %v4509_v50 = vpop.permute.xlu1 %4508 }
 0x5b5   : > { %v1291_v9 = vpack.c.bf16 %v1289_v6, %v1288_v4  ;;  %v4511_v52 = vunpack.i.h.bf16 %v4509_v50  ;;  %v4510_v53 = vunpack.i.l.bf16 %v4509_v50 }
 0x5b6   : > { %v1475_v46 = vsel %vm1093_vm2, %v4496_v44, %v4501_v42 }
 0x5b7   : > { %v4765_v28 = vpop.eup %4764  ;;  %4271 = vmatmul.mubr.msk.bf16.vlgmr.msra.gmra.mrb[16].mxu0 %vm1245_vm4, %v1291_v9 }
 0x5b8   : > { %v1287_v38 = vmul.f32 %v4765_v28, %v5856_v25  ;;  %4281 = vmatpush3.bf16.xpose.msra.mxu0 %v1621_v30  ;;  %4282 = vmatprep.mubr.msk.bf16.mxu0 %vm5135_vm0, %v5132_v17  ;;  %v1474_v25 = vsel %vm1093_vm2, %v4495_v61, %v4500_v10  ;;  %v1903_v6 = vpop.permute.xlu1 %1902 }
 0x5b9   : > { %4292 = vmatprep.subr.bf16.mxu0 %v5132_v17  ;;  %v1566_v49 = vpack.c.bf16 %v1475_v46, %v1474_v25 }
 0x5ba   : > { %v1290_v41 = vpack.c.bf16 %v1287_v38, %v1286_v32 }
 0x5bc   : > { %4265 = vmatmul.mubr.msk.bf16.vlgmr.msra.gmra.mrb[4].mxu1 %vm1245_vm4, %v1290_v41  ;;  %v1915_v9 = vpop.permute.xlu1 %1914 }
 0x5bd   : > { %4275 = vmatpush3.bf16.xpose.msra.mxu1 %v1574_v26  ;;  %4276 = vmatprep.mubr.msk.bf16.mxu1 %vm5135_vm0, %v5132_v17  ;;  %v1925_v50 = vsel %vm1076_vm1, %v1903_v6, %v1915_v9 }
 0x5be   : > { %4286 = vmatprep.subr.bf16.mxu1 %v5132_v17 }
 0x5c0   : > { %v1907_v2 = vpop.permute.xlu1 %1906 }
 0x5c4   : > { %4277 = vmatmul.mubr.msk.bf16.vlgmr.msra.gmra.mrb[8].mxu1 %vm1150_vm3, %v1566_v49  ;;  %v1919_v3 = vpop.permute.xlu1 %1918 }
 0x5c5   : > { %4288 = vmatprep.mubr.msk.bf16.mxu1 %vm5135_vm0, %v5132_v17 }
 0x5c8   : > { %v1809_v41 = vpop.permute.xlu1 %1808 }
 0x5cc   : > { %v1819_v49 = vpop.permute.xlu1 %1818 }
 0x5d3   : > { %v4504_v51 = vpop.permute.xlu0 %4503 }
 0x5d4   : > { %v4506_v54 = vunpack.i.h.bf16 %v4504_v51  ;;  %v4505_v55 = vunpack.i.l.bf16 %v4504_v51 }
 0x5d6   : > { %v1477_v56 = vsel %vm1093_vm2, %v4506_v54, %v4511_v52  ;;  %v1476_v57 = vsel %vm1093_vm2, %v4505_v55, %v4510_v53  ;;  %v1933_v52 = vmul.f32 %v1925_v50, %v5702_v48  ;;  %v1927_v53 = vsel %vm1076_vm1, %v1907_v2, %v1919_v3  ;;  %v1821_v54 = vpop.permute.xlu1 %1820 }
 0x5d7   : > { %v1567_v58 = vpack.c.bf16 %v1477_v56, %v1476_v57  ;;  %v1935_v55 = vmul.f32 %v1927_v53, %v5702_v48  ;;  %v1831_v56 = vsel %vm1076_vm1, %v1809_v41, %v1821_v54  ;;  %v1901_v57 = vpop.permute.xlu0 %1900 }
 0x5d9   : > { %4283 = vmatmul.mubr.msk.bf16.vlgmr.msra.gmra.mrb[20].mxu0 %vm1150_vm3, %v1567_v58 }
 0x5da   : > { %4294 = vmatprep.mubr.msk.bf16.mxu0 %vm5135_vm0, %v5132_v17 }
 0x5db   : > { %v1913_v58 = vpop.permute.xlu0 %1912 }
 0x68a   : > { %v5930_v59 = vpop.f32.mrb[16].mxu0 }
 0x68b   : > { %v4272_v60 = vpop.f32.mrb[17].mxu0 }
 0x68c   : > { %v5932_v1 = vpop.f32.mrb[18].mxu0  ;;  %v1905_v60 = vpop.permute.xlu0 %1904 }
 0x68d   : > { %v4273_v15 = vpop.f32.mrb[19].mxu0 }
 0x68f   : > { %v5934_v5 = vpop.f32.mrb[4].mxu1 }
 0x690   : > { %v4266_v63 = vpop.f32.mrb[5].mxu1  ;;  %v1917_v15 = vpop.permute.xlu0 %1916 }
 0x691   : > { %v5936_v4 = vpop.f32.mrb[6].mxu1  ;;  %v1924_v63 = vsel %vm1076_vm1, %v1901_v57, %v1913_v58 }
 0x692   : > { %v4267_v7 = vpop.f32.mrb[7].mxu1  ;;  %v1932_v6 = vmul.f32 %v1924_v63, %v5685_v40 }
 0x693   : > { %v1926_v7 = vsel %vm1076_vm1, %v1905_v60, %v1917_v15 }
 0x694   : > { %v1934_v9 = vmul.f32 %v1926_v7, %v5685_v40 }
 0x697   : > { %v1610_v8 = vpop.f32.mrb[8].mxu1 }
 0x698   : > { %v5939_v13 = vadd.f32 %v1610_v8, %v5762_v62  ;;  %v4278_v18 = vpop.f32.mrb[9].mxu1  ;;  %v1807_v8 = vpop.permute.xlu0 %1806 }
 0x699   : > { %v1613_v28 = vpop.f32.mrb[10].mxu1  ;;  %v1830_v18 = vsel %vm1076_vm1, %v1807_v8, %v1819_v49 }
 0x69a   : > { %v5942_v30 = vadd.f32 %v1613_v28, %v5764_v0  ;;  %v4279_v32 = vpop.f32.mrb[11].mxu1  ;;  %v1664_v38 = vsel %vm1245_vm4, %v5939_v13, -inf  ;;  %v1844_v28 = vmul.f32 %v1830_v18, %v5685_v40 }
 0x69b   : > { %1665 = vmax.xlane.f32.xlu0 %v1664_v38  ;;  %v1813_v32 = vpop.permute.xlu1 %1812 }
 0x69c   : > { %v1667_v39 = vsel %vm1245_vm4, %v5942_v30, -inf  ;;  %v1811_v3 = vpop.permute.xlu0 %1810 }
 0x69d   : > { %1668 = vmax.xlane.f32.xlu1 %v1667_v39 }
 0x6ac   : > { %v1657_v42 = vpop.f32.mrb[20].mxu0 }
 0x6ad   : > { %v5949_v10 = vadd.f32 %v1657_v42, %v5776_v11  ;;  %v4284_v26 = vpop.f32.mrb[21].mxu0 }
 0x6ae   : > { %v1660_v44 = vpop.f32.mrb[22].mxu0  ;;  %1824 = vrot.lane.b32.xlu1 %v5656_v37, %s5141_s18 }
 0x6af   : > { %v5954_v61 = vadd.f32 %v1660_v44, %v5778_v14  ;;  %v4285_v25 = vpop.f32.mrb[23].mxu0  ;;  %v1670_v46 = vsel %vm1245_vm4, %v5949_v10, -inf }
 0x6b0   : > { %1671 = vmax.xlane.f32.xlu0 %v1670_v46 }
 0x6b1   : > { %v1673_v51 = vsel %vm1245_vm4, %v5954_v61, -inf }
 0x6b2   : > { %1836 = vrot.lane.b32.xlu1 %v5697_v47, %s5142_s15  ;;  %v1845_v47 = vmul.f32 %v1831_v56, %v5702_v48 }
 0x6b4   : > { %1674 = vmax.xlane.f32.xlu0 %v1673_v51 }
 0x6b6   : > { %1942 = vrot.lane.b32.xlu1 %v1933_v52, %s5142_s15 }
 0x6ba   : > { %1946 = vrot.lane.b32.xlu1 %v1935_v55, %s5142_s15 }
 0x6be   : > { %1854 = vrot.lane.b32.xlu1 %v1845_v47, %s5142_s15 }
 0x6ca   : > { %1822 = vrot.lane.b32.xlu0 %v5646_v36, %s5141_s18 }
 0x6ce   : > { %1834 = vrot.lane.b32.xlu0 %v5691_v45, %s5142_s15 }
 0x6d2   : > { %1940 = vrot.lane.b32.xlu0 %v1932_v6, %s5142_s15 }
 0x6d6   : > { %1944 = vrot.lane.b32.xlu0 %v1934_v9, %s5142_s15 }
 0x6da   : > { %1852 = vrot.lane.b32.xlu0 %v1844_v28, %s5142_s15 }
 0x728   : > { %v1666_v41 = vpop.xlane.xlu0 %1665 }
 0x72a   : > { %v1669_v38 = vpop.xlane.xlu1 %1668 }
 0x72e   : > { %v1825_v45 = vpop.permute.xlu1 %1824 }
 0x72f   : > { %v1833_v39 = vsel %vm1076_vm1, %v1813_v32, %v1825_v45  ;;  %v1676_v45 = vsub.f32 %v5939_v13, %v1666_v41 }
 0x730   : > { %v1847_v2 = vmul.f32 %v1833_v39, %v5702_v48 }
 0x731   : > { %v1680_v39 = vmul.f32 1.442695, %v1676_v45 }
 0x732   : > { %1858 = vrot.lane.b32.xlu1 %v1847_v2, %s5142_s15  ;;  %v5989_v26 = vpop.permute.xlu1 %1836 }
 0x733   : > { %v1929_v51 = vmul.f32 %v5989_v26, %v5602_v21  ;;  %v1841_v6 = vmul.f32 %v5989_v26, %v5627_v34  ;;  %4766 = vpow2.f32 %v1680_v39 }
 0x736   : > { %1759 = vrot.lane.b32.xlu1 %v5614_v27, %s5139_s16  ;;  %v1943_v49 = vpop.permute.xlu1 %1942 }
 0x737   : > { %v1953_v55 = vadd.f32 %v1943_v49, %v1929_v51 }
 0x73a   : > { %v1947_v53 = vpop.permute.xlu1 %1946 }
 0x73d   : > { %v1672_v42 = vpop.xlane.xlu0 %1671  ;;  %v6020_v51 = vpop.eup %4766 }
 0x73e   : > { %v1855_v63 = vpop.permute.xlu1 %1854  ;;  %v1678_v2 = vsub.f32 %v5949_v10, %v1672_v42 }
 0x73f   : > { %v1865_v18 = vadd.f32 %v1855_v63, %v1841_v6 }
 0x741   : > { %v1675_v44 = vpop.xlane.xlu0 %1674 }
 0x745   : > { %v1823_v25 = vpop.permute.xlu0 %1822 }
 0x746   : > { %v1832_v46 = vsel %vm1076_vm1, %v1811_v3, %v1823_v25  ;;  %v1684_v3 = vmul.f32 1.442695, %v1678_v2  ;;  %v1679_v25 = vsub.f32 %v5954_v61, %v1675_v44 }
 0x747   : > { %v1846_v50 = vmul.f32 %v1832_v46, %v5685_v40  ;;  %v1931_v40 = vmul.f32 %v5989_v26, %v5625_v33  ;;  %v1677_v46 = vsub.f32 %v5942_v30, %v1669_v38 }
 0x748   : > { %4768 = vpow2.f32 %v1684_v3  ;;  %v1686_v49 = vmul.f32 1.442695, %v1679_v25 }
 0x749   : > { %1856 = vrot.lane.b32.xlu0 %v1846_v50, %s5142_s15  ;;  %v5994_v48 = vpop.permute.xlu0 %1834  ;;  %v1955_v60 = vadd.f32 %v1947_v53, %v1931_v40  ;;  %v1682_v50 = vmul.f32 1.442695, %v1677_v46  ;;  %v1843_v53 = vmul.f32 %v5989_v26, %v5656_v37 }
 0x74a   : > { %v1928_v52 = vmul.f32 %v5994_v48, %v5596_v19  ;;  %v1930_v47 = vmul.f32 %v5994_v48, %v5618_v31  ;;  %v1840_v8 = vmul.f32 %v5994_v48, %v5604_v22  ;;  %4770 = vpow2.f32 %v1686_v49 }
 0x74b   : > { %4772 = vpow2.f32 %v1682_v50 }
 0x74d   : > { %1711 = vrot.lane.b32.xlu0 %v5616_v29, %s5139_s16  ;;  %v1941_v54 = vpop.permute.xlu0 %1940 }
 0x74e   : > { %v1952_v56 = vadd.f32 %v1941_v54, %v1928_v52  ;;  %v1688_v52 = vsel %vm1245_vm4, %v6020_v51, 0.0  ;;  %v1842_v54 = vmul.f32 %v5994_v48, %v5646_v36 }
 0x750   : > { %v4512_v57 = vpack.i.bf16 %v1953_v55, %v1952_v56 }
 0x751   : > { %v1945_v58 = vpop.permute.xlu0 %1944 }
 0x752   : > { %v1954_v15 = vadd.f32 %v1945_v58, %v1930_v47  ;;  %4513 = vrot.lane.b32.xlu1 %v4512_v57, %s5142_s15  ;;  %v6024_v13 = vpop.eup %4768 }
 0x753   : > { %v1694_v10 = vsel %vm1245_vm4, %v6024_v13, 0.0 }
 0x754   : > { %v4522_v7 = vpack.i.bf16 %v1955_v60, %v1954_v15  ;;  %v6028_v41 = vpop.eup %4770 }
 0x755   : > { %v1853_v9 = vpop.permute.xlu0 %1852  ;;  %v6030_v30 = vpop.eup %4772  ;;  %v1697_v61 = vsel %vm1245_vm4, %v6028_v41, 0.0 }
 0x756   : > { %v1864_v28 = vadd.f32 %v1853_v9, %v1840_v8  ;;  %4518 = vrot.lane.b32.xlu1 %v5608_v24, %s5142_s15  ;;  %4523 = vrot.lane.b32.xlu0 %v4522_v7, %s5142_s15  ;;  %v1691_v38 = vsel %vm1245_vm4, %v6030_v30, 0.0 }
 0x758   : > { %v4532_v32 = vpack.i.bf16 %v1865_v18, %v1864_v28 }
 0x75a   : > { %4528 = vrot.lane.b32.xlu1 %v5633_v35, %s5142_s15 }
 0x775   : > { %1689 = vadd.xlane.f32.xlu0 %v1688_v52 }
 0x779   : > { %1695 = vadd.xlane.f32.xlu0 %v1694_v10 }
 0x77d   : > { %1698 = vadd.xlane.f32.xlu0 %v1697_v61 }
 0x77e   : > { %1692 = vadd.xlane.f32.xlu1 %v1691_v38 }
 0x78f   : > { %4538 = vrot.lane.b32.xlu1 %v5866_v20, %s5142_s15 }
 0x793   : > { %4548 = vrot.lane.b32.xlu1 %v5873_v23, %s5142_s15  ;;  %4533 = vrot.lane.b32.xlu0 %v4532_v32, %s5142_s15 }
 0x797   : > { %2322 = vrot.lane.b32.xlu1 %v5602_v21, %s5143_s26 }
 0x79b   : > { %2334 = vrot.lane.b32.xlu1 %v5602_v21, %s5144_s10 }
 0x79f   : > { %2326 = vrot.lane.b32.xlu1 %v5625_v33, %s5143_s26 }
 0x7a3   : > { %2338 = vrot.lane.b32.xlu1 %v5625_v33, %s5144_s10 }
 0x7a4   : > { %v1859_v42 = vpop.permute.xlu1 %1858 }
 0x7a5   : > { %v1867_v56 = vadd.f32 %v1859_v42, %v1843_v53 }
 0x7a7   : > { %2228 = vrot.lane.b32.xlu1 %v5627_v34, %s5143_s26 }
 0x7a8   : > { %v1760_v44 = vpop.permute.xlu1 %1759 }
 0x7a9   : > { %4293 = vmatpush3.bf16.msra.mxu0 %v1760_v44 }
 0x7aa   : > { %4304 = vmatprep.subr.bf16.mxu0 %v5132_v17 }
 0x7ab   : > { %2238 = vrot.lane.b32.xlu1 %v5604_v22, %s5144_s10 }
 0x7af   : > { %2240 = vrot.lane.b32.xlu1 %v5627_v34, %s5144_s10 }
 0x7b3   : > { %2232 = vrot.lane.b32.xlu1 %v5656_v37, %s5143_s26 }
 0x7bb   : > { %v1857_v55 = vpop.permute.xlu0 %1856 }
 0x7bc   : > { %v1866_v40 = vadd.f32 %v1857_v55, %v1842_v54 }
 0x7be   : > { %v4542_v57 = vpack.i.bf16 %v1867_v56, %v1866_v40 }
 0x7bf   : > { %v1712_v47 = vpop.permute.xlu0 %1711 }
 0x7c0   : > { %4287 = vmatpush3.bf16.msra.mxu1 %v1712_v47  ;;  %4543 = vrot.lane.b32.xlu0 %v4542_v57, %s5142_s15 }
 0x7c1   : > { %4298 = vmatprep.subr.bf16.mxu1 %v5132_v17 }
 0x7c4   : > { %2320 = vrot.lane.b32.xlu0 %v5596_v19, %s5143_s26  ;;  %v4514_v26 = vpop.permute.xlu1 %4513 }
 0x7c5   : > { %v4516_v39 = vunpack.i.h.bf16 %v4514_v26  ;;  %v4515_v2 = vunpack.i.l.bf16 %v4514_v26 }
 0x7c8   : > { %2332 = vrot.lane.b32.xlu0 %v5596_v19, %s5144_s10  ;;  %v4524_v48 = vpop.permute.xlu0 %4523  ;;  %v4519_v58 = vpop.permute.xlu1 %4518 }
 0x7c9   : > { %v4526_v18 = vunpack.i.h.bf16 %v4524_v48  ;;  %v4525_v28 = vunpack.i.l.bf16 %v4524_v48  ;;  %v4521_v32 = vunpack.i.h.bf16 %v4519_v58  ;;  %v4520_v45 = vunpack.i.l.bf16 %v4519_v58 }
 0x7cb   : > { %v1984_v50 = vsel %vm1093_vm2, %v4515_v2, %v4520_v45  ;;  %v1985_v52 = vsel %vm1093_vm2, %v4516_v39, %v4521_v32 }
 0x7cc   : > { %2324 = vrot.lane.b32.xlu0 %v5618_v31, %s5143_s26  ;;  %v4529_v63 = vpop.permute.xlu1 %4528  ;;  %v1990_v40 = vpack.c.bf16 %v1985_v52, %v1984_v50 }
 0x7cd   : > { %v4531_v8 = vunpack.i.h.bf16 %v4529_v63  ;;  %v4530_v9 = vunpack.i.l.bf16 %v4529_v63 }
 0x7cf   : > { %v1987_v3 = vsel %vm1093_vm2, %v4526_v18, %v4531_v8  ;;  %v1986_v25 = vsel %vm1093_vm2, %v4525_v28, %v4530_v9 }
 0x7d0   : > { %2336 = vrot.lane.b32.xlu0 %v5618_v31, %s5144_s10  ;;  %v1991_v61 = vpack.c.bf16 %v1987_v3, %v1986_v25 }
 0x7d2   : > { %v2043_v47 = vsel %vm1150_vm3, %v1991_v61, 0 }
 0x7d4   : > { %2226 = vrot.lane.b32.xlu0 %v5604_v22, %s5143_s26 }
 0x7d8   : > { %2230 = vrot.lane.b32.xlu0 %v5646_v36, %s5143_s26 }
 0x802   : > { %v1690_v60 = vpop.xlane.xlu0 %1689 }
 0x806   : > { %v1696_v15 = vpop.xlane.xlu0 %1695 }
 0x807   : > { %4774 = vrcp.f32 %v1696_v15 }
 0x808   : > { %4776 = vrcp.f32 %v1690_v60 }
 0x80a   : > { %v1699_v6 = vpop.xlane.xlu0 %1698 }
 0x80b   : > { %4778 = vrcp.f32 %v1699_v6  ;;  %v1693_v7 = vpop.xlane.xlu1 %1692 }
 0x80c   : > { %4780 = vrcp.f32 %v1693_v7 }
 0x80e   : > { %v4534_v55 = vpop.permute.xlu0 %4533 }
 0x80f   : > { %v4539_v56 = vpop.permute.xlu1 %4538  ;;  %v4536_v48 = vunpack.i.h.bf16 %v4534_v55  ;;  %v4535_v58 = vunpack.i.l.bf16 %v4534_v55 }
 0x810   : > { %v4541_v60 = vunpack.i.h.bf16 %v4539_v56  ;;  %v4540_v15 = vunpack.i.l.bf16 %v4539_v56 }
 0x811   : > { %v4775_v46 = vpop.eup %4774 }
 0x812   : > { %v4777_v49 = vpop.eup %4776  ;;  %v1706_v42 = vmul.f32 %v4775_v46, %v6024_v13  ;;  %v1897_v13 = vsel %vm1093_vm2, %v4536_v48, %v4541_v60 }
 0x813   : > { %v1704_v53 = vmul.f32 %v4777_v49, %v6020_v51  ;;  %v1996_v51 = vsel %vm1150_vm3, %v1990_v40, 0  ;;  %v4549_v63 = vpop.permute.xlu1 %4548 }
 0x814   : > { %v4551_v7 = vunpack.i.h.bf16 %v4549_v63  ;;  %v4550_v8 = vunpack.i.l.bf16 %v4549_v63 }
 0x815   : > { %v4779_v10 = vpop.eup %4778 }
 0x816   : > { %v4781_v38 = vpop.eup %4780  ;;  %v1707_v44 = vmul.f32 %v4779_v10, %v6028_v41  ;;  %v1896_v41 = vsel %vm1093_vm2, %v4535_v58, %v4540_v15 }
 0x817   : > { %v1705_v54 = vmul.f32 %v4781_v38, %v6030_v30  ;;  %v1988_v30 = vpack.c.bf16 %v1897_v13, %v1896_v41  ;;  %v2323_v10 = vpop.permute.xlu1 %2322 }
 0x818   : > { %v1709_v57 = vpack.c.bf16 %v1707_v44, %v1706_v42 }
 0x819   : > { %v1708_v26 = vpack.c.bf16 %v1705_v54, %v1704_v53 }
 0x81a   : > { %4295 = vmatmul.mubr.msk.bf16.vlgmr.msra.gmra.mrb[24].mxu0 %vm1245_vm4, %v1709_v57 }
 0x81b   : > { %4305 = vmatpush3.bf16.xpose.msra.mxu0 %v2043_v47  ;;  %4289 = vmatmul.mubr.msk.bf16.vlgmr.msra.gmra.mrb[12].mxu1 %vm1245_vm4, %v1708_v26  ;;  %v2335_v44 = vpop.permute.xlu1 %2334 }
 0x81c   : > { %4299 = vmatpush3.bf16.xpose.msra.mxu1 %v1996_v51  ;;  %4300 = vmatprep.mubr.msk.bf16.mxu1 %vm5135_vm0, %v5132_v17  ;;  %v2345_v63 = vsel %vm1076_vm1, %v2323_v10, %v2335_v44 }
 0x81d   : > { %4306 = vmatprep.mubr.msk.bf16.mxu0 %vm5135_vm0, %v5132_v17  ;;  %4316 = vmatprep.subr.bf16.mxu0 %v5132_v17 }
 0x81e   : > { %4310 = vmatprep.subr.bf16.mxu1 %v5132_v17 }
 0x81f   : > { %v2327_v26 = vpop.permute.xlu1 %2326 }
 0x823   : > { %4301 = vmatmul.mubr.msk.bf16.vlgmr.msra.gmra.mrb[16].mxu1 %vm1150_vm3, %v1988_v30  ;;  %v2339_v48 = vpop.permute.xlu1 %2338 }
 0x824   : > { %4312 = vmatprep.mubr.msk.bf16.mxu1 %vm5135_vm0, %v5132_v17 }
 0x827   : > { %v2229_v58 = vpop.permute.xlu1 %2228 }
 0x82b   : > { %v2239_v30 = vpop.permute.xlu1 %2238 }
 0x832   : > { %v4544_v6 = vpop.permute.xlu0 %4543 }
 0x833   : > { %v4546_v9 = vunpack.i.h.bf16 %v4544_v6  ;;  %v4545_v18 = vunpack.i.l.bf16 %v4544_v6 }
 0x835   : > { %v1898_v28 = vsel %vm1093_vm2, %v4545_v18, %v4550_v8  ;;  %v1899_v32 = vsel %vm1093_vm2, %v4546_v9, %v4551_v7  ;;  %v2347_v8 = vsel %vm1076_vm1, %v2327_v26, %v2339_v48  ;;  %v2241_v9 = vpop.permute.xlu1 %2240 }
 0x836   : > { %v1989_v45 = vpack.c.bf16 %v1899_v32, %v1898_v28  ;;  %v2251_v28 = vsel %vm1076_vm1, %v2229_v58, %v2241_v9  ;;  %v2321_v32 = vpop.permute.xlu0 %2320 }
 0x838   : > { %4307 = vmatmul.mubr.msk.bf16.vlgmr.msra.gmra.mrb[28].mxu0 %vm1150_vm3, %v1989_v45 }
 0x839   : > { %4318 = vmatprep.mubr.msk.bf16.mxu0 %vm5135_vm0, %v5132_v17  ;;  %v2233_v26 = vpop.permute.xlu1 %2232 }
 0x8ed   : > { %v6096_v39 = vpop.f32.mrb[24].mxu0 }
 0x8ee   : > { %v6098_v2 = vpop.f32.mrb[12].mxu1  ;;  %v4296_v3 = vpop.f32.mrb[25].mxu0 }
 0x8ef   : > { %v4290_v25 = vpop.f32.mrb[13].mxu1  ;;  %v6100_v46 = vpop.f32.mrb[26].mxu0 }
 0x8f0   : > { %v4597_v49 = vpack.i.bf16 %v6100_v46, %v6096_v39  ;;  %v6104_v50 = vpop.f32.mrb[14].mxu1  ;;  %v4297_v52 = vpop.f32.mrb[27].mxu0  ;;  %v4656_v46 = vld [vmem:[%s5486_s7 + $0x4] ss:$16 sps:$4 sm:$0xff]  }
 0x8f1   : > { %v4592_v61 = vpack.i.bf16 %v6104_v50, %v6098_v2  ;;  %v4291_v38 = vpop.f32.mrb[15].mxu1  ;;  %v2333_v3 = vpop.permute.xlu0 %2332 }
 0x8f2   : > { %v2344_v10 = vsel %vm1076_vm1, %v2321_v32, %v2333_v3  ;;  %v4848_v38 = vld [vmem:[%s6614_s30] sm:$0xff] }
 0x8f5   : > { %v2325_v25 = vpop.permute.xlu0 %2324 }
 0x8f6   : > { %v2032_v42 = vpop.f32.mrb[16].mxu1 }
 0x8f7   : > { %v6109_v53 = vadd.f32 %v2032_v42, %v5762_v62  ;;  %v4302_v54 = vpop.f32.mrb[17].mxu1  ;;  %v4849_v42 = vld [vmem:[%s6613_s13] sm:$0xff] }
 0x8f8   : > { %v2035_v55 = vpop.f32.mrb[18].mxu1  ;;  %v2352_v44 = vmul.f32 %v4849_v42, %v2344_v10 }
 0x8f9   : > { %v6112_v56 = vadd.f32 %v2035_v55, %v5764_v0  ;;  %v4303_v40 = vpop.f32.mrb[19].mxu1  ;;  %v2086_v57 = vsel %vm1245_vm4, %v6109_v53, -inf  ;;  %v2337_v52 = vpop.permute.xlu0 %2336 }
 0x8fa   : > { %2087 = vmax.xlane.f32.xlu0 %v2086_v57  ;;  %v2346_v54 = vsel %vm1076_vm1, %v2325_v25, %v2337_v52 }
 0x8fb   : > { %v2089_v47 = vsel %vm1245_vm4, %v6112_v56, -inf  ;;  %v2354_v40 = vmul.f32 %v4849_v42, %v2346_v54 }
 0x8fc   : > { %2090 = vmax.xlane.f32.xlu1 %v2089_v47 }
 0x8fd   : > { %v2227_v55 = vpop.permute.xlu0 %2226 }
 0x8fe   : > { %v2250_v57 = vsel %vm1076_vm1, %v2227_v55, %v2239_v30 }
 0x8ff   : > { %v2264_v47 = vmul.f32 %v4849_v42, %v2250_v57 }
 0x90b   : > { %v2079_v60 = vpop.f32.mrb[28].mxu0 }
 0x90c   : > { %v6119_v62 = vadd.f32 %v2079_v60, %v5776_v11  ;;  %v4308_v15 = vpop.f32.mrb[29].mxu0  ;;  %v4846_v11 = vld [vmem:[%s6614_s30 + $0x8] sm:$0xff] }
 0x90d   : > { %v2082_v51 = vpop.f32.mrb[30].mxu0  ;;  %2244 = vrot.lane.b32.xlu1 %v5656_v37, %s5144_s10 }
 0x90e   : > { %v6124_v0 = vadd.f32 %v2082_v51, %v5778_v14  ;;  %v4309_v13 = vpop.f32.mrb[31].mxu0  ;;  %v2092_v41 = vsel %vm1245_vm4, %v6119_v62, -inf  ;;  %v4847_v14 = vld [vmem:[%s6613_s13 + $0x8] sm:$0xff]  ;;  %v2231_v51 = vpop.permute.xlu0 %2230 }
 0x90f   : > { %2093 = vmax.xlane.f32.xlu0 %v2092_v41  ;;  %v2353_v7 = vmul.f32 %v4847_v14, %v2345_v63  ;;  %v2355_v18 = vmul.f32 %v4847_v14, %v2347_v8  ;;  %v2265_v45 = vmul.f32 %v4847_v14, %v2251_v28 }
 0x910   : > { %v2095_v6 = vsel %vm1245_vm4, %v6124_v0, -inf }
 0x911   : > { %2256 = vrot.lane.b32.xlu1 %v4846_v11, %s5139_s16 }
 0x913   : > { %2096 = vmax.xlane.f32.xlu0 %v2095_v6 }
 0x915   : > { %2362 = vrot.lane.b32.xlu1 %v2353_v7, %s5139_s16 }
 0x919   : > { %2366 = vrot.lane.b32.xlu1 %v2355_v18, %s5139_s16 }
 0x91d   : > { %2274 = vrot.lane.b32.xlu1 %v2265_v45, %s5139_s16 }
 0x929   : > { %2242 = vrot.lane.b32.xlu0 %v5646_v36, %s5144_s10 }
 0x92d   : > { %2254 = vrot.lane.b32.xlu0 %v4848_v38, %s5139_s16 }
 0x931   : > { %2360 = vrot.lane.b32.xlu0 %v2352_v44, %s5139_s16 }
 0x935   : > { %2364 = vrot.lane.b32.xlu0 %v2354_v40, %s5139_s16 }
 0x939   : > { %2272 = vrot.lane.b32.xlu0 %v2264_v47, %s5139_s16 }
 0x987   : > { %v2088_v13 = vpop.xlane.xlu0 %2087 }
 0x989   : > { %v2091_v48 = vpop.xlane.xlu1 %2090 }
 0x98d   : > { %v2245_v58 = vpop.permute.xlu1 %2244 }
 0x98e   : > { %v2253_v60 = vsel %vm1076_vm1, %v2233_v26, %v2245_v58 }
 0x98f   : > { %v2267_v15 = vmul.f32 %v4847_v14, %v2253_v60  ;;  %v2099_v60 = vsub.f32 %v6112_v56, %v2091_v48 }
 0x991   : > { %2278 = vrot.lane.b32.xlu1 %v2267_v15, %s5139_s16  ;;  %v6162_v30 = vpop.permute.xlu1 %2256 }
 0x992   : > { %v2349_v14 = vmul.f32 %v6162_v30, %v5602_v21  ;;  %v2351_v25 = vmul.f32 %v6162_v30, %v5625_v33  ;;  %v2098_v33 = vsub.f32 %v6109_v53, %v2088_v13 }
 0x994   : > { %v2102_v26 = vmul.f32 1.442695, %v2098_v33 }
 0x995   : > { %2179 = vrot.lane.b32.xlu1 %v5614_v27, %s5142_s15  ;;  %v2363_v7 = vpop.permute.xlu1 %2362 }
 0x996   : > { %v2373_v45 = vadd.f32 %v2363_v7, %v2349_v14  ;;  %4782 = vpow2.f32 %v2102_v26 }
 0x999   : > { %v2367_v28 = vpop.permute.xlu1 %2366 }
 0x99c   : > { %v2094_v41 = vpop.xlane.xlu0 %2093 }
 0x99d   : > { %v2275_v21 = vpop.permute.xlu1 %2274 }
 0x9a0   : > { %v2097_v63 = vpop.xlane.xlu0 %2096 }
 0x9a4   : > { %v2243_v11 = vpop.permute.xlu0 %2242 }
 0x9a5   : > { %v2252_v6 = vsel %vm1076_vm1, %v2231_v51, %v2243_v11  ;;  %v4783_v51 = vpop.eup %4782 }
 0x9a6   : > { %v2266_v8 = vmul.f32 %v4849_v42, %v2252_v6  ;;  %v2375_v42 = vadd.f32 %v2367_v28, %v2351_v25  ;;  %v2110_v11 = vsel %vm1245_vm4, %v4783_v51, 0.0 }
 0x9a8   : > { %2276 = vrot.lane.b32.xlu0 %v2266_v8, %s5139_s16  ;;  %v2255_v9 = vpop.permute.xlu0 %2254 }
 0x9a9   : > { %v2348_v18 = vmul.f32 %v2255_v9, %v5596_v19  ;;  %v2350_v10 = vmul.f32 %v2255_v9, %v5618_v31  ;;  %v2261_v19 = vmul.f32 %v6162_v30, %v5627_v34  ;;  %v2260_v55 = vmul.f32 %v2255_v9, %v5604_v22 }
 0x9aa   : > { %v2100_v34 = vsub.f32 %v6119_v62, %v2094_v41  ;;  %v2101_v22 = vsub.f32 %v6124_v0, %v2097_v63  ;;  %v2263_v63 = vmul.f32 %v6162_v30, %v5656_v37  ;;  %v2262_v6 = vmul.f32 %v2255_v9, %v5646_v36 }
 0x9ab   : > { %v2285_v57 = vadd.f32 %v2275_v21, %v2261_v19 }
 0x9ac   : > { %2132 = vrot.lane.b32.xlu0 %v5616_v29, %s5142_s15  ;;  %v2361_v32 = vpop.permute.xlu0 %2360  ;;  %v2106_v58 = vmul.f32 1.442695, %v2100_v34  ;;  %v2108_v15 = vmul.f32 1.442695, %v2101_v22 }
 0x9ad   : > { %v2372_v3 = vadd.f32 %v2361_v32, %v2348_v18 }
 0x9ae   : > { %4784 = vpow2.f32 %v2106_v58 }
 0x9af   : > { %v4552_v52 = vpack.i.bf16 %v2373_v45, %v2372_v3  ;;  %4786 = vpow2.f32 %v2108_v15 }
 0x9b0   : > { %v2365_v38 = vpop.permute.xlu0 %2364 }
 0x9b1   : > { %v2374_v44 = vadd.f32 %v2365_v38, %v2350_v10  ;;  %4553 = vrot.lane.b32.xlu1 %v4552_v52, %s5138_s12 }
 0x9b3   : > { %v4562_v54 = vpack.i.bf16 %v2375_v42, %v2374_v44 }
 0x9b4   : > { %v2273_v40 = vpop.permute.xlu0 %2272 }
 0x9b5   : > { %v2284_v47 = vadd.f32 %v2273_v40, %v2260_v55  ;;  %4558 = vrot.lane.b32.xlu1 %v5608_v24, %s5138_s12  ;;  %4563 = vrot.lane.b32.xlu0 %v4562_v54, %s5138_s12  ;;  %v2104_v24 = vmul.f32 1.442695, %v2099_v60 }
 0x9b7   : > { %v4572_v31 = vpack.i.bf16 %v2285_v57, %v2284_v47  ;;  %4788 = vpow2.f32 %v2104_v24 }
 0x9b9   : > { %4568 = vrot.lane.b32.xlu1 %v5633_v35, %s5138_s12  ;;  %v4785_v35 = vpop.eup %4784 }
 0x9ba   : > { %v2116_v53 = vsel %vm1245_vm4, %v4785_v35, 0.0  ;;  %v4787_v13 = vpop.eup %4786 }
 0x9bb   : > { %v2119_v41 = vsel %vm1245_vm4, %v4787_v13, 0.0 }
 0x9c1   : > { %v4789_v62 = vpop.eup %4788 }
 0x9c2   : > { %v2113_v56 = vsel %vm1245_vm4, %v4789_v62, 0.0 }
 0x9d4   : > { %2111 = vadd.xlane.f32.xlu0 %v2110_v11 }
 0x9d8   : > { %2117 = vadd.xlane.f32.xlu0 %v2116_v53 }
 0x9dc   : > { %2120 = vadd.xlane.f32.xlu0 %v2119_v41 }
 0x9dd   : > { %2114 = vadd.xlane.f32.xlu1 %v2113_v56 }
 0x9ee   : > { %4578 = vrot.lane.b32.xlu1 %v5866_v20, %s5138_s12 }
 0x9f2   : > { %4588 = vrot.lane.b32.xlu1 %v5873_v23, %s5138_s12  ;;  %4573 = vrot.lane.b32.xlu0 %v4572_v31, %s5138_s12 }
 0xa03   : > { %v2279_v0 = vpop.permute.xlu1 %2278 }
 0xa04   : > { %v2287_v8 = vadd.f32 %v2279_v0, %v2263_v63 }
 0xa07   : > { %v2180_v48 = vpop.permute.xlu1 %2179 }
 0xa08   : > { %4317 = vmatpush3.bf16.msra.mxu0 %v2180_v48 }
 0xa09   : > { %4328 = vmatprep.subr.bf16.mxu0 %v5132_v17 }
 0xa1a   : > { %v2277_v7 = vpop.permute.xlu0 %2276 }
 0xa1b   : > { %v2286_v14 = vadd.f32 %v2277_v7, %v2262_v6 }
 0xa1d   : > { %v4582_v18 = vpack.i.bf16 %v2287_v8, %v2286_v14 }
 0xa1e   : > { %v2133_v20 = vpop.permute.xlu0 %2132 }
 0xa1f   : > { %4311 = vmatpush3.bf16.msra.mxu1 %v2133_v20  ;;  %4583 = vrot.lane.b32.xlu0 %v4582_v18, %s5138_s12 }
 0xa20   : > { %4322 = vmatprep.subr.bf16.mxu1 %v5132_v17 }
 0xa23   : > { %v4554_v23 = vpop.permute.xlu1 %4553 }
 0xa24   : > { %v4556_v44 = vunpack.i.h.bf16 %v4554_v23  ;;  %v4555_v21 = vunpack.i.l.bf16 %v4554_v23 }
 0xa27   : > { %v4564_v28 = vpop.permute.xlu0 %4563  ;;  %v4559_v32 = vpop.permute.xlu1 %4558 }
 0xa28   : > { %v4566_v52 = vunpack.i.h.bf16 %v4564_v28  ;;  %v4565_v10 = vunpack.i.l.bf16 %v4564_v28  ;;  %v4561_v38 = vunpack.i.h.bf16 %v4559_v32  ;;  %v4560_v42 = vunpack.i.l.bf16 %v4559_v32 }
 0xa2a   : > { %v2404_v57 = vsel %vm1093_vm2, %v4555_v21, %v4560_v42  ;;  %v2405_v47 = vsel %vm1093_vm2, %v4556_v44, %v4561_v38  ;;  %v4850_v21 = vld [vmem:[#allocation2] sm:$0xff] }
 0xa2b   : > { %v4569_v25 = vpop.permute.xlu1 %4568  ;;  %v2410_v11 = vpack.c.bf16 %v2405_v47, %v2404_v57 }
 0xa2c   : > { %v4571_v30 = vunpack.i.h.bf16 %v4569_v25  ;;  %v4570_v9 = vunpack.i.l.bf16 %v4569_v25 }
 0xa2e   : > { %v2407_v19 = vsel %vm1093_vm2, %v4566_v52, %v4571_v30  ;;  %v2406_v54 = vsel %vm1093_vm2, %v4565_v10, %v4570_v9 }
 0xa2f   : > { %v2411_v33 = vpack.c.bf16 %v2407_v19, %v2406_v54 }
 0xa31   : > { %v2463_v41 = vsel %vm1150_vm3, %v2411_v33, 0 }
 0xa61   : > { %v2112_v45 = vpop.xlane.xlu0 %2111 }
 0xa65   : > { %v2118_v3 = vpop.xlane.xlu0 %2117 }
 0xa66   : > { %4790 = vrcp.f32 %v2118_v3 }
 0xa67   : > { %4792 = vrcp.f32 %v2112_v45 }
 0xa69   : > { %v2121_v37 = vpop.xlane.xlu0 %2120 }
 0xa6a   : > { %4794 = vrcp.f32 %v2121_v37  ;;  %v2115_v36 = vpop.xlane.xlu1 %2114 }
 0xa6b   : > { %4796 = vrcp.f32 %v2115_v36 }
 0xa6d   : > { %v4574_v15 = vpop.permute.xlu0 %4573 }
 0xa6e   : > { %v4579_v24 = vpop.permute.xlu1 %4578  ;;  %v4576_v0 = vunpack.i.h.bf16 %v4574_v15  ;;  %v4575_v48 = vunpack.i.l.bf16 %v4574_v15 }
 0xa6f   : > { %v4581_v63 = vunpack.i.h.bf16 %v4579_v24  ;;  %v4580_v6 = vunpack.i.l.bf16 %v4579_v24 }
 0xa70   : > { %v4791_v55 = vpop.eup %4790 }
 0xa71   : > { %v4793_v40 = vpop.eup %4792  ;;  %v2128_v34 = vmul.f32 %v4791_v55, %v4785_v35  ;;  %v2416_v35 = vsel %vm1150_vm3, %v2410_v11, 0  ;;  %v4851_v55 = vld [vmem:[#allocation2 + $0x8] sm:$0xff] }
 0xa72   : > { %v2126_v22 = vmul.f32 %v4793_v40, %v4783_v51  ;;  %v2317_v51 = vsel %vm1093_vm2, %v4576_v0, %v4581_v63  ;;  %v4589_v7 = vpop.permute.xlu1 %4588 }
 0xa73   : > { %v4591_v14 = vunpack.i.h.bf16 %v4589_v7  ;;  %v4590_v18 = vunpack.i.l.bf16 %v4589_v7 }
 0xa74   : > { %v4795_v31 = vpop.eup %4794 }
 0xa75   : > { %v4797_v26 = vpop.eup %4796  ;;  %v2129_v58 = vmul.f32 %v4795_v31, %v4787_v13  ;;  %v2316_v13 = vsel %vm1093_vm2, %v4575_v48, %v4580_v6 }
 0xa76   : > { %v2127_v60 = vmul.f32 %v4797_v26, %v4789_v62  ;;  %v2408_v62 = vpack.c.bf16 %v2317_v51, %v2316_v13  ;;  %v4852_v26 = vld [vmem:[#allocation2 + $0x10] sm:$0xff] }
 0xa77   : > { %v2131_v53 = vpack.c.bf16 %v2129_v58, %v2128_v34 }
 0xa78   : > { %v2130_v56 = vpack.c.bf16 %v2127_v60, %v2126_v22  ;;  %v4853_v60 = vld [vmem:[#allocation2 + $0x18] sm:$0xff] }
 0xa79   : > { %4319 = vmatmul.mubr.msk.bf16.vlgmr.msra.gmra.mrb[32].mxu0 %vm1245_vm4, %v2131_v53 }
 0xa7a   : > { %4329 = vmatpush3.bf16.xpose.msra.mxu0 %v2463_v41  ;;  %4313 = vmatmul.mubr.msk.bf16.vlgmr.msra.gmra.mrb[20].mxu1 %vm1245_vm4, %v2130_v56 }
 0xa7b   : > { %4323 = vmatpush3.bf16.xpose.msra.mxu1 %v2416_v35  ;;  %4324 = vmatprep.mubr.msk.bf16.mxu1 %vm5135_vm0, %v5132_v17 }
 0xa7c   : > { %4330 = vmatprep.mubr.msk.bf16.mxu0 %vm5135_vm0, %v5132_v17  ;;  %4334 = vmatprep.subr.bf16.mxu1 %v5132_v17 }
 0xa7d   : > { %4340 = vmatprep.subr.bf16.mxu0 %v5132_v17 }
 0xa82   : > { %4325 = vmatmul.mubr.msk.bf16.vlgmr.msra.gmra.mrb[24].mxu1 %vm1150_vm3, %v2408_v62 }
 0xa83   : > { %4336 = vmatprep.mubr.msk.bf16.mxu1 %vm5135_vm0, %v5132_v17 }
 0xa91   : > { %v4584_v8 = vpop.permute.xlu0 %4583 }
 0xa92   : > { %v4586_v20 = vunpack.i.h.bf16 %v4584_v8  ;;  %v4585_v23 = vunpack.i.l.bf16 %v4584_v8 }
 0xa94   : > { %v2318_v28 = vsel %vm1093_vm2, %v4585_v23, %v4590_v18  ;;  %v2319_v32 = vsel %vm1093_vm2, %v4586_v20, %v4591_v14 }
 0xa95   : > { %v2409_v45 = vpack.c.bf16 %v2319_v32, %v2318_v28 }
 0xa97   : > { %4331 = vmatmul.mubr.msk.bf16.vlgmr.msra.gmra.mrb[36].mxu0 %vm1150_vm3, %v2409_v45 }
 0xa98   : > { %4342 = vmatprep.mubr.msk.bf16.mxu0 %vm5135_vm0, %v5132_v17 }
 0xb4c   : > { %v6226_v3 = vpop.f32.mrb[32].mxu0 }
 0xb4d   : > { %v6228_v25 = vpop.f32.mrb[20].mxu1  ;;  %v4320_v37 = vpop.f32.mrb[33].mxu0 }
 0xb4e   : > { %v4314_v36 = vpop.f32.mrb[21].mxu1  ;;  %v6230_v30 = vpop.f32.mrb[34].mxu0 }
 0xb4f   : > { %v4607_v9 = vpack.i.bf16 %v6230_v30, %v6226_v3  ;;  %v2175_v52 = vpop.f32.mrb[22].mxu1  ;;  %v4321_v10 = vpop.f32.mrb[35].mxu0 }
 0xb50   : > { %v4602_v38 = vpack.i.bf16 %v2175_v52, %v6228_v25  ;;  %v4315_v42 = vpop.f32.mrb[23].mxu1 }
 0xb51   : > { %v4654_v42 = vld [vmem:[%s5486_s7] ss:$16 sps:$4 sm:$0xff]  }
 0xb55   : > { %v2452_v44 = vpop.f32.mrb[24].mxu1 }
 0xb56   : > { %v2453_v19 = vadd.f32 %v4850_v21, %v2452_v44  ;;  %v4326_v17 = vpop.f32.mrb[25].mxu1  ;;  %v4659_v21 = vld [vmem:[%s5486_s7 + $0x24] ss:$16 sps:$4 sm:$0xff]  }
 0xb57   : > { %v2455_v54 = vpop.f32.mrb[26].mxu1  ;;  %v4662_v17 = vld [vmem:[%s5486_s7 + $0x44] ss:$16 sps:$4 sm:$0xff]  }
 0xb58   : > { %v2456_v40 = vadd.f32 %v4851_v55, %v2455_v54  ;;  %v4327_v57 = vpop.f32.mrb[27].mxu1  ;;  %v2506_v47 = vsel %vm1245_vm4, %v2453_v19, -inf  ;;  %v4660_v54 = vld [vmem:[%s5486_s7 + $0x40] ss:$16 sps:$4 sm:$0xff]   ;;  %v4665_v55 = vld [vmem:[%s5486_s7 + $0x64] ss:$16 sps:$4 sm:$0xff]  }
 0xb59   : > { %2507 = vmax.xlane.f32.xlu0 %v2506_v47  ;;  %v4668_v57 = vld [vmem:[%s5486_s7 + $0x84] ss:$16 sps:$4 sm:$0xff]   ;;  %v4666_v47 = vld [vmem:[%s5486_s7 + $0x80] ss:$16 sps:$4 sm:$0xff]  }
 0xb5a   : > { %v2509_v31 = vsel %vm1245_vm4, %v2456_v40, -inf }
 0xb5b   : > { %2510 = vmax.xlane.f32.xlu1 %v2509_v31  ;;  %v4671_v31 = vld [vmem:[%s5486_s7 + $0xa4] ss:$16 sps:$4 sm:$0xff]  }
 0xb6a   : > { %v2499_v33 = vpop.f32.mrb[36].mxu0 }
 0xb6b   : > { %v2500_v34 = vadd.f32 %v4852_v26, %v2499_v33  ;;  %v4332_v58 = vpop.f32.mrb[37].mxu0  ;;  %v4669_v33 = vld [vmem:[%s5486_s7 + $0xa0] ss:$16 sps:$4 sm:$0xff]   ;;  %v4674_v26 = vld [vmem:[%s5486_s7 + $0xc4] ss:$16 sps:$4 sm:$0xff]  }
 0xb6c   : > { %v2502_v22 = vpop.f32.mrb[38].mxu0  ;;  %v4677_v58 = vld [vmem:[%s5486_s7 + $0xe4] ss:$16 sps:$4 sm:$0xff]  }
 0xb6d   : > { %v2503_v15 = vadd.f32 %v4853_v60, %v2502_v22  ;;  %v4333_v24 = vpop.f32.mrb[39].mxu0  ;;  %v2512_v11 = vsel %vm1245_vm4, %v2500_v34, -inf  ;;  %v4675_v22 = vld [vmem:[%s5486_s7 + $0xe0] ss:$16 sps:$4 sm:$0xff]  }
 0xb6e   : > { %2513 = vmax.xlane.f32.xlu0 %v2512_v11  ;;  %v4678_v60 = vld [vmem:[%s5514_s17 + $0x40] sm:$0xff]   ;;  %v4680_v24 = vld [vmem:[%s5514_s17 + $0x48] sm:$0xff]  }
 0xb6f   : > { %v2515_v53 = vsel %vm1245_vm4, %v2503_v15, -inf  ;;  %v4681_v11 = vld [vmem:[%s5514_s17 + $0x8] sm:$0xff]  }
 0xb72   : > { %2516 = vmax.xlane.f32.xlu0 %v2515_v53  ;;  %v4682_v53 = vld [vmem:[%s5514_s17 + $0x50] sm:$0xff]  }
 0xbe6   : > { %v2508_v41 = vpop.xlane.xlu0 %2507 }
 0xbe7   : > { %v2518_v56 = vsub.f32 %v2453_v19, %v2508_v41  ;;  %v4657_v19 = vld [vmem:[%s5486_s7 + $0x20] ss:$16 sps:$4 sm:$0xff]  }
 0xbe8   : > { %v2511_v0 = vpop.xlane.xlu1 %2510  ;;  %v4683_v41 = vld [vmem:[%s5514_s17 + $0x10] sm:$0xff]  }
 0xbe9   : > { %v2522_v48 = vmul.f32 1.442695, %v2518_v56  ;;  %v2519_v63 = vsub.f32 %v2456_v40, %v2511_v0  ;;  %v4663_v40 = vld [vmem:[%s5486_s7 + $0x60] ss:$16 sps:$4 sm:$0xff]   ;;  %v4684_v56 = vld [vmem:[%s5514_s17 + $0x58] sm:$0xff]  }
 0xbea   : > { %v4685_v0 = vld [vmem:[%s5514_s17 + $0x18] sm:$0xff]  }
 0xbeb   : > { %4798 = vpow2.f32 %v2522_v48  ;;  %v2524_v6 = vmul.f32 1.442695, %v2519_v63  ;;  %v4686_v48 = vld [vmem:[%s5514_s17 + $0x60] sm:$0xff]  }
 0xbec   : > { %v4687_v63 = vld [vmem:[%s5514_s17 + $0x20] sm:$0xff]  }
 0xbed   : > { %4800 = vpow2.f32 %v2524_v6  ;;  %v4688_v6 = vld [vmem:[%s5514_s17 + $0x68] sm:$0xff]  }
 0xbf5   : > { %v4799_v35 = vpop.eup %4798 }
 0xbf6   : > { %v2530_v51 = vsel %vm1245_vm4, %v4799_v35, 0.0 }
 0xbf7   : > { %v4801_v13 = vpop.eup %4800  ;;  %2531 = vadd.xlane.f32.xlu0 %v2530_v51  ;;  %v4690_v51 = vld [vmem:[%s5514_s17 + $0x70] sm:$0xff]  }
 0xbf8   : > { %v2533_v62 = vsel %vm1245_vm4, %v4801_v13, 0.0 }
 0xbf9   : > { %2534 = vadd.xlane.f32.xlu1 %v2533_v62  ;;  %v4692_v62 = vld [vmem:[%s5514_s17 + $0x78] sm:$0xff]  }
 0xbfb   : > { %v2514_v7 = vpop.xlane.xlu0 %2513 }
 0xbfc   : > { %v2520_v8 = vsub.f32 %v2500_v34, %v2514_v7  ;;  %v4672_v34 = vld [vmem:[%s5486_s7 + $0xc0] ss:$16 sps:$4 sm:$0xff]   ;;  %v4693_v7 = vld [vmem:[%s5514_s17 + $0x38] sm:$0xff]  }
 0xbfe   : > { %v2526_v14 = vmul.f32 1.442695, %v2520_v8  ;;  %v4694_v8 = vld [vmem:[%s5484_s24] sm:$0xff]  }
 0xbff   : > { %v2517_v18 = vpop.xlane.xlu0 %2516 }
 0xc00   : > { %4802 = vpow2.f32 %v2526_v14  ;;  %v2521_v20 = vsub.f32 %v2503_v15, %v2517_v18  ;;  %v4679_v15 = vld [vmem:[%s5514_s17] sm:$0xff]   ;;  %v4695_v14 = vld [vmem:[%s5484_s24 + $0x8] sm:$0xff]   ;;  %v4696_v18 = vld [vmem:[%s5484_s24 + $0x10] sm:$0xff]  }
 0xc02   : > { %v2528_v23 = vmul.f32 1.442695, %v2521_v20  ;;  %v4697_v20 = vld [vmem:[%s5484_s24 + $0x18] sm:$0xff]  }
 0xc04   : > { %4804 = vpow2.f32 %v2528_v23  ;;  %v4698_v23 = vld [vmem:[%s5484_s24 + $0x20] sm:$0xff]  }
 0xc0a   : > { %v4803_v28 = vpop.eup %4802 }
 0xc0b   : > { %v2536_v32 = vsel %vm1245_vm4, %v4803_v28, 0.0 }
 0xc0c   : > { %2537 = vadd.xlane.f32.xlu0 %v2536_v32  ;;  %v4700_v32 = vld [vmem:[%s5484_s24 + $0x30] sm:$0xff]  }
 0xc0e   : > { %v4805_v45 = vpop.eup %4804 }
 0xc0f   : > { %v2539_v3 = vsel %vm1245_vm4, %v4805_v45, 0.0 }
 0xc10   : > { %2540 = vadd.xlane.f32.xlu1 %v2539_v3 }
 0xc21   : > { %2599 = vrot.lane.b32.xlu1 %v5614_v27, %s5138_s12 }
 0xc22   : > { %2552 = vrot.lane.b32.xlu0 %v5616_v29, %s5138_s12 }
 0xc25   : > { %4593 = vrot.lane.b32.xlu1 %v4592_v61, %s5138_s12 }
 0xc26   : > { %4603 = vrot.lane.b32.xlu0 %v4602_v38, %s5142_s15 }
 0xc29   : > { %4598 = vrot.lane.b32.xlu1 %v4597_v49, %s5138_s12 }
 0xc2d   : > { %4608 = vrot.lane.b32.xlu1 %v4607_v9, %s5142_s15 }
 0xc84   : > { %v2532_v27 = vpop.xlane.xlu0 %2531 }
 0xc86   : > { %v2535_v25 = vpop.xlane.xlu1 %2534 }
 0xc87   : > { %4806 = vrcp.f32 %v2535_v25 }
 0xc88   : > { %4808 = vrcp.f32 %v2532_v27 }
 0xc91   : > { %v4807_v29 = vpop.eup %4806 }
 0xc92   : > { %v4809_v36 = vpop.eup %4808  ;;  %v2547_v30 = vmul.f32 %v4807_v29, %v4801_v13  ;;  %v4691_v13 = vld [vmem:[%s5514_s17 + $0x30] sm:$0xff]  }
 0xc93   : > { %v2546_v2 = vmul.f32 %v4809_v36, %v4799_v35  ;;  %v4689_v35 = vld [vmem:[%s5514_s17 + $0x28] sm:$0xff]  }
 0xc94   : > { %v4704_v36 = vld [vmem:[%s5486_s7 + $0xc] ss:$16 sps:$4 sm:$0xff]  }
 0xc95   : > { %v2550_v39 = vpack.c.bf16 %v2547_v30, %v2546_v2 }
 0xc99   : > { %v2538_v37 = vpop.xlane.xlu0 %2537 }
 0xc9a   : > { %4810 = vrcp.f32 %v2538_v37  ;;  %v4701_v37 = vld [vmem:[%s5484_s24 + $0x38] sm:$0xff]  }
 0xc9d   : > { %v2553_v50 = vpop.permute.xlu0 %2552  ;;  %v2541_v61 = vpop.xlane.xlu1 %2540 }
 0xc9e   : > { %4812 = vrcp.f32 %v2541_v61  ;;  %4335 = vmatpush3.bf16.msra.mxu1 %v2553_v50 }
 0xc9f   : > { %4346 = vmatprep.subr.bf16.mxu1 %v4694_v8 }
 0xca1   : > { %4337 = vmatmul.mubr.msk.bf16.vlgmr.msra.gmra.mrb[28].mxu1 %vm1245_vm4, %v2550_v39  ;;  %v2600_v49 = vpop.permute.xlu1 %2599 }
 0xca2   : > { %4341 = vmatpush3.bf16.msra.mxu0 %v2600_v49  ;;  %4347 = vmatpush3.bf16.msra.mxu1 %v4694_v8 }
 0xca3   : > { %3037 = vmatprep.subr.bf16.mxu0 %v4656_v46  ;;  %4348 = vmatprep.subr.bf16.mxu1 %v4695_v14  ;;  %v2857_v46 = vlaneseq }
 0xca4   : > { %v4811_v9 = vpop.eup %4810 }
 0xca5   : > { %v2548_v10 = vmul.f32 %v4811_v9, %v4803_v28  ;;  %v4699_v28 = vld [vmem:[%s5484_s24 + $0x28] sm:$0xff]   ;;  %v6306_v49 = vshrl.u32 %v2857_v46, 7 }
 0xca6   : > { %4349 = vmatpush3.bf16.msra.mxu1 %v4695_v14 }
 0xca7   : > { %4350 = vmatprep.subr.bf16.mxu1 %v4696_v18  ;;  %v2859_v9 = vsub.s32 0, %v6306_v49 }
 0xca8   : > { %v4813_v52 = vpop.eup %4812 }
 0xca9   : > { %v2549_v38 = vmul.f32 %v4813_v52, %v4805_v45  ;;  %v6310_v52 = vld [vmem:[%s5512_s29] sm:$0xf]  ;;  %s6615_s29 = sld [smem:[#allocation26_spill]] (!%p4091_p11) }
 0xcaa   : > { %4351 = vmatpush3.bf16.msra.mxu1 %v4696_v18 }
 0xcab   : > { %v2551_v44 = vpack.c.bf16 %v2549_v38, %v2548_v10  ;;  %4352 = vmatprep.subr.bf16.mxu1 %v4697_v20  ;;  %v2863_v10 = vsub.s32 1, %v6306_v49  ;;  %v2860_v38 = vrot.slane %v6310_v52, %v2859_v9 }
 0xcad   : > { %4343 = vmatmul.mubr.msk.bf16.vlgmr.msra.gmra.mrb[40].mxu0 %vm1245_vm4, %v2551_v44 }
 0xcae   : > { %3038 = vmatpush1.bf16.msra.mxu0 %v4654_v42  ;;  %3069 = vmatprep.mubr.bf16.mxu0 %v5131_v43  ;;  %v2864_v42 = vrot.slane %v6310_v52, %v2863_v10 }
 0xcaf   : > { %3039 = vmatprep.subr.bf16.mxu0 %v4659_v21  ;;  %4353 = vmatpush3.bf16.msra.mxu1 %v4697_v20 }
 0xcb0   : > { %4354 = vmatprep.subr.bf16.mxu1 %v4698_v23 }
 0xcb2   : > { %3040 = vmatpush1.bf16.msra.mxu0 %v4657_v19 }
 0xcb3   : > { %3041 = vmatprep.subr.bf16.mxu0 %v4662_v17  ;;  %4355 = vmatpush3.bf16.msra.mxu1 %v4698_v23 }
 0xcb4   : > { %4356 = vmatprep.subr.bf16.mxu1 %v4699_v28 }
 0xcb6   : > { %3042 = vmatpush1.bf16.msra.mxu0 %v4660_v54 }
 0xcb7   : > { %3043 = vmatprep.subr.bf16.mxu0 %v4665_v55  ;;  %4357 = vmatpush3.bf16.msra.mxu1 %v4699_v28 }
 0xcb8   : > { %4358 = vmatprep.subr.bf16.mxu1 %v4700_v32 }
 0xcba   : > { %3044 = vmatpush1.bf16.msra.mxu0 %v4663_v40 }
 0xcbb   : > { %3045 = vmatprep.subr.bf16.mxu0 %v4668_v57  ;;  %4359 = vmatpush3.bf16.msra.mxu1 %v4700_v32 }
 0xcbc   : > { %4360 = vmatprep.subr.bf16.mxu1 %v4701_v37 }
 0xcbe   : > { %3046 = vmatpush1.bf16.msra.mxu0 %v4666_v47 }
 0xcbf   : > { %3047 = vmatprep.subr.bf16.mxu0 %v4671_v31  ;;  %4361 = vmatpush3.bf16.msra.mxu1 %v4701_v37 }
 0xcc0   : > { %3090 = vmatprep.subr.bf16.mxu1 %v4704_v36 }
 0xcc2   : > { %3048 = vmatpush1.bf16.msra.mxu0 %v4669_v33 }
 0xcc3   : > { %3049 = vmatprep.subr.bf16.mxu0 %v4674_v26 }
 0xcc6   : > { %3050 = vmatpush1.bf16.msra.mxu0 %v4672_v34 }
 0xcc7   : > { %3051 = vmatprep.subr.bf16.mxu0 %v4677_v58 }
 0xcca   : > { %3052 = vmatpush1.bf16.msra.mxu0 %v4675_v22 }
 0xccb   : > { %4174 = vmatprep.subr.bf16.mxu0 %v4678_v60 }
 0xccd   : > { %3070 = vmatmul.mubr.bf16.vlgmr.msra.gmra.mrb[44].mxu0 %v5585_v12 }
 0xcce   : > { %3079 = vmatprep.mubr.bf16.mxu0 %v5131_v43  ;;  %4175 = vmatpush3.bf16.msra.mxu0 %v4679_v15 }
 0xccf   : > { %4176 = vmatprep.subr.bf16.mxu0 %v4680_v24 }
 0xcd2   : > { %4177 = vmatpush3.bf16.msra.mxu0 %v4681_v11 }
 0xcd3   : > { %4178 = vmatprep.subr.bf16.mxu0 %v4682_v53 }
 0xcd5   : > { %3080 = vmatmul.mubr.bf16.gmra.mrb[48].mxu0 %v5590_v16 }
 0xcd6   : > { %4179 = vmatpush3.bf16.msra.mxu0 %v4683_v41 }
 0xcd7   : > { %4180 = vmatprep.subr.bf16.mxu0 %v4684_v56 }
 0xcda   : > { %4181 = vmatpush3.bf16.msra.mxu0 %v4685_v0 }
 0xcdb   : > { %4182 = vmatprep.subr.bf16.mxu0 %v4686_v48 }
 0xcde   : > { %4183 = vmatpush3.bf16.msra.mxu0 %v4687_v63 }
 0xcdf   : > { %4184 = vmatprep.subr.bf16.mxu0 %v4688_v6 }
 0xce2   : > { %4185 = vmatpush3.bf16.msra.mxu0 %v4689_v35 }
 0xce3   : > { %4186 = vmatprep.subr.bf16.mxu0 %v4690_v51 }
 0xce6   : > { %4187 = vmatpush3.bf16.msra.mxu0 %v4691_v13 }
 0xce7   : > { %4188 = vmatprep.subr.bf16.mxu0 %v4692_v62 }
 0xcea   : > { %4189 = vmatpush3.bf16.msra.mxu0 %v4693_v7 }
 0xd74   : > { %v2592_v45 = vpop.f32.mrb[28].mxu1 }
 0xd75   : > { %v4338_v3 = vpop.f32.mrb[29].mxu1 }
 0xd76   : > { %v2595_v25 = vpop.f32.mrb[30].mxu1 }
 0xd77   : > { %v4612_v27 = vpack.i.bf16 %v2595_v25, %v2592_v45  ;;  %v4339_v29 = vpop.f32.mrb[31].mxu1 }
 0xd79   : > { %4613 = vrot.lane.b32.xlu0 %v4612_v27, %s5139_s16 }
 0xd80   : > { %v2639_v30 = vpop.f32.mrb[40].mxu0 }
 0xd81   : > { %v4344_v2 = vpop.f32.mrb[41].mxu0 }
 0xd82   : > { %v2642_v50 = vpop.f32.mrb[42].mxu0 }
 0xd83   : > { %v4617_v61 = vpack.i.bf16 %v2642_v50, %v2639_v30  ;;  %v4345_v39 = vpop.f32.mrb[43].mxu0 }
 0xd85   : > { %4618 = vrot.lane.b32.xlu1 %v4617_v61, %s5139_s16  ;;  %s6616_s16 = sld [smem:[#allocation27_spill]] (!%p4091_p11) }
 0xda0   : > { %v3071_v44 = vpop.f32.mrb[44].mxu0 }
 0xda1   : > { %v6315_v21 = vadd.f32 %v3071_v44, %v2860_v38  ;;  %v3073_v19 = vpop.f32.mrb[45].mxu0 }
 0xda2   : > { %v6317_v17 = vadd.f32 %v3073_v19, %v2864_v42  ;;  %v3075_v54 = vpop.f32.mrb[46].mxu0 }
 0xda3   : > { %v3143_v55 = vmul.f32 0.044715, %v6315_v21  ;;  %v6320_v40 = vadd.f32 %v3075_v54, %v2860_v38  ;;  %v3077_v57 = vpop.f32.mrb[47].mxu0 }
 0xda4   : > { %v3144_v47 = vmul.f32 0.044715, %v6317_v17  ;;  %v6323_v31 = vadd.f32 %v3077_v57, %v2864_v42 }
 0xda5   : > { %v3159_v33 = vmul.f32 %v3143_v55, %v6315_v21  ;;  %v3147_v26 = vmul.f32 0.044715, %v6320_v40 }
 0xda6   : > { %v3160_v34 = vmul.f32 %v3144_v47, %v6317_v17  ;;  %v3148_v58 = vmul.f32 0.044715, %v6323_v31 }
 0xda7   : > { %v3175_v22 = vmul.f32 %v3159_v33, %v6315_v21  ;;  %v3163_v60 = vmul.f32 %v3147_v26, %v6320_v40  ;;  %v3207_v26 = vmul.f32 0.5, %v6315_v21 }
 0xda8   : > { %v3176_v15 = vmul.f32 %v3160_v34, %v6317_v17  ;;  %v3164_v24 = vmul.f32 %v3148_v58, %v6323_v31  ;;  %v3081_v11 = vpop.f32.mrb[48].mxu0  ;;  %v3211_v34 = vmul.f32 0.5, %v6320_v40 }
 0xda9   : > { %v3191_v53 = vadd.f32 %v3175_v22, %v6315_v21  ;;  %v3179_v41 = vmul.f32 %v3163_v60, %v6320_v40  ;;  %v6335_v56 = vadd.f32 %v3081_v11, %v2860_v38  ;;  %v3083_v0 = vpop.f32.mrb[49].mxu0  ;;  %v3208_v22 = vmul.f32 0.5, %v6317_v17 }
 0xdaa   : > { %v3180_v48 = vmul.f32 %v3164_v24, %v6323_v31  ;;  %v6338_v63 = vadd.f32 %v3083_v0, %v2864_v42  ;;  %v3085_v6 = vpop.f32.mrb[50].mxu0  ;;  %v3192_v35 = vadd.f32 %v3176_v15, %v6317_v17  ;;  %v3212_v60 = vmul.f32 0.5, %v6323_v31 }
 0xdab   : > { %v3223_v51 = vmul.f32 0.7978846, %v3191_v53  ;;  %v3195_v13 = vadd.f32 %v3179_v41, %v6320_v40  ;;  %v3151_v62 = vmul.f32 0.044715, %v6335_v56  ;;  %v3086_v7 = vadd.f32 %v3085_v6, %v2860_v38  ;;  %v3087_v8 = vpop.f32.mrb[51].mxu0 }
 0xdac   : > { %v3152_v14 = vmul.f32 0.044715, %v6338_v63  ;;  %v3088_v18 = vadd.f32 %v3087_v8, %v2864_v42  ;;  %v3196_v20 = vadd.f32 %v3180_v48, %v6323_v31  ;;  %v3224_v23 = vmul.f32 0.7978846, %v3192_v35 }
 0xdad   : > { %4814 = vtanh.f32 %v3223_v51  ;;  %v3227_v28 = vmul.f32 0.7978846, %v3195_v13  ;;  %v3167_v32 = vmul.f32 %v3151_v62, %v6335_v56  ;;  %v3155_v45 = vmul.f32 0.044715, %v3086_v7 }
 0xdae   : > { %v3168_v3 = vmul.f32 %v3152_v14, %v6338_v63  ;;  %v3156_v25 = vmul.f32 0.044715, %v3088_v18  ;;  %v3228_v27 = vmul.f32 0.7978846, %v3196_v20  ;;  %4816 = vtanh.f32 %v3224_v23 }
 0xdaf   : > { %4818 = vtanh.f32 %v3227_v28  ;;  %v3183_v29 = vmul.f32 %v3167_v32, %v6335_v56  ;;  %v3171_v37 = vmul.f32 %v3155_v45, %v3086_v7  ;;  %v3215_v40 = vmul.f32 0.5, %v6335_v56 }
 0xdb0   : > { %v3184_v36 = vmul.f32 %v3168_v3, %v6338_v63  ;;  %v3172_v30 = vmul.f32 %v3156_v25, %v3088_v18  ;;  %4820 = vtanh.f32 %v3228_v27  ;;  %v3219_v17 = vmul.f32 0.5, %v3086_v7  ;;  %v4594_v27 = vpop.permute.xlu1 %4593 }
 0xdb1   : > { %v3187_v2 = vmul.f32 %v3171_v37, %v3086_v7  ;;  %v3199_v50 = vadd.f32 %v3183_v29, %v6335_v56  ;;  %v3216_v31 = vmul.f32 0.5, %v6338_v63  ;;  %v3220_v14 = vmul.f32 0.5, %v3088_v18 }
 0xdb2   : > { %v3188_v61 = vmul.f32 %v3172_v30, %v3088_v18  ;;  %v3200_v39 = vadd.f32 %v3184_v36, %v6338_v63  ;;  %v4596_v29 = vunpack.i.h.bf16 %v4594_v27  ;;  %v4595_v37 = vunpack.i.l.bf16 %v4594_v27  ;;  %v4604_v36 = vpop.permute.xlu0 %4603  ;;  %v4741_v27 = vld [vmem:[%s5514_s17 + $0xb8] sm:$0xff]  }
 0xdb3   : > { %v3203_v46 = vadd.f32 %v3187_v2, %v3086_v7  ;;  %v3231_v9 = vmul.f32 0.7978846, %v3199_v50  ;;  %v4606_v7 = vunpack.i.h.bf16 %v4604_v36 }
 0xdb4   : > { %v3204_v10 = vadd.f32 %v3188_v61, %v3088_v18  ;;  %v3232_v38 = vmul.f32 0.7978846, %v3200_v39  ;;  %v2695_v56 = vsel %vm1150_vm3, %v5936_v4, %v4596_v29  ;;  %v2694_v63 = vsel %vm1150_vm3, %v5934_v5, %v4595_v37  ;;  %v4599_v2 = vpop.permute.xlu1 %4598 }
 0xdb5   : > { %v3235_v42 = vmul.f32 0.7978846, %v3203_v46  ;;  %4822 = vtanh.f32 %v3231_v9  ;;  %v4605_v18 = vunpack.i.l.bf16 %v4604_v36  ;;  %v2700_v46 = vsel %vm2698_vm5, %v2695_v56, %v4606_v7 }
 0xdb6   : > { %v3236_v44 = vmul.f32 0.7978846, %v3204_v10  ;;  %4824 = vtanh.f32 %v3232_v38  ;;  %v4601_v38 = vunpack.i.h.bf16 %v4599_v2 }
 0xdb7   : > { %v4815_v19 = vpop.eup %4814  ;;  %4826 = vtanh.f32 %v3235_v42  ;;  %v2699_v39 = vsel %vm2698_vm5, %v2694_v63, %v4605_v18  ;;  %v4600_v42 = vunpack.i.l.bf16 %v4599_v2 }
 0xdb8   : > { %v4817_v54 = vpop.eup %4816  ;;  %v3255_v55 = vadd.f32 1.0, %v4815_v19  ;;  %4828 = vtanh.f32 %v3236_v44  ;;  %v4609_v5 = vpop.permute.xlu1 %4608 }
 0xdb9   : > { %v4819_v57 = vpop.eup %4818  ;;  %v3256_v47 = vadd.f32 1.0, %v4817_v54  ;;  %v4611_v44 = vunpack.i.h.bf16 %v4609_v5  ;;  %v4610_v19 = vunpack.i.l.bf16 %v4609_v5  ;;  %v2867_v5 = vsub.s32 2, %v6306_v49 }
 0xdba   : > { %v4821_v33 = vpop.eup %4820  ;;  %v3259_v58 = vadd.f32 1.0, %v4819_v57  ;;  %v3271_v24 = vmul.f32 %v3255_v55, %v3207_v26  ;;  %v2697_v55 = vsel %vm1150_vm3, %v5932_v1, %v4601_v38  ;;  %v2696_v57 = vsel %vm1150_vm3, %v5930_v59, %v4600_v42  ;;  %v4705_v59 = vld [vmem:[%s5486_s7 + $0x28] ss:$16 sps:$4 sm:$0xff]  }
 0xdbb   : > { %v3260_v15 = vadd.f32 1.0, %v4821_v33  ;;  %v3272_v53 = vmul.f32 %v3256_v47, %v3208_v22  ;;  %v2701_v26 = vsel %vm2698_vm5, %v2696_v57, %v4610_v19  ;;  %v2871_v38 = vsub.s32 3, %v6306_v49 }
 0xdbc   : > { %v3275_v11 = vmul.f32 %v3259_v58, %v3211_v34  ;;  %v2702_v34 = vsel %vm2698_vm5, %v2697_v55, %v4611_v44  ;;  %v2868_v42 = vrot.slane %v6310_v52, %v2867_v5 }
 0xdbd   : > { %v3276_v41 = vmul.f32 %v3260_v15, %v3212_v60  ;;  %v4702_v60 = vld [vmem:[%s5486_s7 + $0x8] ss:$16 sps:$4 sm:$0xff]   ;;  %v4707_v15 = vld [vmem:[%s5486_s7 + $0x2c] ss:$16 sps:$4 sm:$0xff]   ;;  %v2872_v44 = vrot.slane %v6310_v52, %v2871_v38 }
 0xdbe   : > { %v3287_v0 = vpack.c.bf16 %v3275_v11, %v3271_v24  ;;  %v4710_v24 = vld [vmem:[%s5486_s7 + $0x4c] ss:$16 sps:$4 sm:$0xff]   ;;  %v4708_v11 = vld [vmem:[%s5486_s7 + $0x48] ss:$16 sps:$4 sm:$0xff]  }
 0xdbf   : > { %v4823_v48 = vpop.eup %4822  ;;  %v3288_v6 = vpack.c.bf16 %v3276_v41, %v3272_v53  ;;  %v4713_v53 = vld [vmem:[%s5486_s7 + $0x6c] ss:$16 sps:$4 sm:$0xff]   ;;  %v4711_v41 = vld [vmem:[%s5486_s7 + $0x68] ss:$16 sps:$4 sm:$0xff]  }
 0xdc0   : > { %v4825_v35 = vpop.eup %4824  ;;  %v3263_v51 = vadd.f32 1.0, %v4823_v48  ;;  %v4714_v48 = vld [vmem:[%s5486_s7 + $0x88] ss:$16 sps:$4 sm:$0xff]  }
 0xdc1   : > { %v4827_v13 = vpop.eup %4826  ;;  %3590 = vmatprep.mubr.bf16.mxu0 %v3288_v6  ;;  %v3264_v21 = vadd.f32 1.0, %v4825_v35  ;;  %v4719_v6 = vld [vmem:[%s5486_s7 + $0xac] ss:$16 sps:$4 sm:$0xff]   ;;  %v4717_v35 = vld [vmem:[%s5486_s7 + $0xa8] ss:$16 sps:$4 sm:$0xff]  }
 0xdc2   : > { %v4829_v62 = vpop.eup %4828  ;;  %3591 = vmatmul.mubr.bf16.vlgmr.msra.gmra.mrb[52].mxu0 %v3287_v0  ;;  %v3267_v8 = vadd.f32 1.0, %v4827_v13  ;;  %v3279_v23 = vmul.f32 %v3263_v51, %v3215_v40  ;;  %v4716_v0 = vld [vmem:[%s5486_s7 + $0x8c] ss:$16 sps:$4 sm:$0xff]   ;;  %v4720_v13 = vld [vmem:[%s5486_s7 + $0xc8] ss:$16 sps:$4 sm:$0xff]   ;;  %v4726_v40 = vld [vmem:[%s5514_s17 + $0xc0] sm:$0xff]  }
 0xdc3   : > { %v3268_v20 = vadd.f32 1.0, %v4829_v62  ;;  %v3280_v32 = vmul.f32 %v3264_v21, %v3216_v31  ;;  %v4722_v51 = vld [vmem:[%s5486_s7 + $0xcc] ss:$16 sps:$4 sm:$0xff]   ;;  %v4723_v62 = vld [vmem:[%s5486_s7 + $0xe8] ss:$16 sps:$4 sm:$0xff]  }
 0xdc4   : > { %v3283_v28 = vmul.f32 %v3267_v8, %v3219_v17  ;;  %v4725_v21 = vld [vmem:[%s5486_s7 + $0xec] ss:$16 sps:$4 sm:$0xff]   ;;  %v4727_v17 = vld [vmem:[%s5514_s17 + $0x80] sm:$0xff]  }
 0xdc5   : > { %v3284_v45 = vmul.f32 %v3268_v20, %v3220_v14  ;;  %v4728_v8 = vld [vmem:[%s5514_s17 + $0xc8] sm:$0xff]   ;;  %v4730_v14 = vld [vmem:[%s5514_s17 + $0xd0] sm:$0xff]   ;;  %v4734_v20 = vld [vmem:[%s5514_s17 + $0xe0] sm:$0xff]  }
 0xdc6   : > { %v3291_v3 = vpack.c.bf16 %v3283_v28, %v3279_v23  ;;  %v4729_v31 = vld [vmem:[%s5514_s17 + $0x88] sm:$0xff]   ;;  %v4735_v23 = vld [vmem:[%s5514_s17 + $0xa0] sm:$0xff]  }
 0xdc7   : > { %v3292_v25 = vpack.c.bf16 %v3284_v45, %v3280_v32  ;;  %v4736_v28 = vld [vmem:[%s5514_s17 + $0xe8] sm:$0xff]   ;;  %v4738_v45 = vld [vmem:[%s5514_s17 + $0xf0] sm:$0xff]  }
 0xdc8   : > { %v4737_v32 = vld [vmem:[%s5514_s17 + $0xa8] sm:$0xff]  }
 0xdc9   : > { %3598 = vmatprep.mubr.bf16.mxu0 %v3292_v25  ;;  %v4740_v25 = vld [vmem:[%s5514_s17 + $0xf8] sm:$0xff]  }
 0xdca   : > { %3599 = vmatmul.mubr.bf16.gmra.mrb[56].mxu0 %v3291_v3  ;;  %v4739_v3 = vld [vmem:[%s5514_s17 + $0xb0] sm:$0xff]  }
 0xdeb   : > { %v4614_v30 = vpop.permute.xlu0 %4613 }
 0xdec   : > { %v4616_v50 = vunpack.i.h.bf16 %v4614_v30  ;;  %v4615_v61 = vunpack.i.l.bf16 %v4614_v30 }
 0xdee   : > { %v2704_v9 = vsel %vm2703_vm6, %v2699_v39, %v4615_v61  ;;  %v2705_v10 = vsel %vm2703_vm6, %v2700_v46, %v4616_v50 }
 0xdef   : > { %v2708_v4 = vpack.c.bf16 %v2705_v10, %v2704_v9 }
 0xdf1   : > { %4362 = vmatprep.mubr.bf16.mxu1 %v2708_v4 }
 0xdf7   : > { %v4619_v54 = vpop.permute.xlu1 %4618 }
 0xdf8   : > { %v4621_v47 = vunpack.i.h.bf16 %v4619_v54  ;;  %v4620_v33 = vunpack.i.l.bf16 %v4619_v54 }
 0xdfa   : > { %v2706_v58 = vsel %vm2703_vm6, %v2701_v26, %v4620_v33  ;;  %v2707_v22 = vsel %vm2703_vm6, %v2702_v34, %v4621_v47 }
 0xdfb   : > { %v2709_v1 = vpack.c.bf16 %v2707_v22, %v2706_v58 }
 0xdfd   : > { %4363 = vmatmul.mubr.bf16.vlgmr.msra.gmra.mrb[32].mxu1 %v2709_v1 }
 0xdfe   : > { %3091 = vmatpush1.bf16.msra.mxu1 %v4702_v60  ;;  %3122 = vmatprep.mubr.bf16.mxu1 %v5131_v43 }
 0xdff   : > { %3092 = vmatprep.subr.bf16.mxu1 %v4707_v15 }
 0xe02   : > { %3093 = vmatpush1.bf16.msra.mxu1 %v4705_v59 }
 0xe03   : > { %3094 = vmatprep.subr.bf16.mxu1 %v4710_v24 }
 0xe06   : > { %3095 = vmatpush1.bf16.msra.mxu1 %v4708_v11 }
 0xe07   : > { %3096 = vmatprep.subr.bf16.mxu1 %v4713_v53 }
 0xe0a   : > { %3097 = vmatpush1.bf16.msra.mxu1 %v4711_v41 }
 0xe0b   : > { %3098 = vmatprep.subr.bf16.mxu1 %v4716_v0 }
 0xe0e   : > { %3099 = vmatpush1.bf16.msra.mxu1 %v4714_v48 }
 0xe0f   : > { %3100 = vmatprep.subr.bf16.mxu1 %v4719_v6 }
 0xe12   : > { %3101 = vmatpush1.bf16.msra.mxu1 %v4717_v35 }
 0xe13   : > { %3102 = vmatprep.subr.bf16.mxu1 %v4722_v51 }
 0xe16   : > { %3103 = vmatpush1.bf16.msra.mxu1 %v4720_v13 }
 0xe17   : > { %3104 = vmatprep.subr.bf16.mxu1 %v4725_v21 }
 0xe1a   : > { %3105 = vmatpush1.bf16.msra.mxu1 %v4723_v62 }
 0xe1b   : > { %4202 = vmatprep.subr.bf16.mxu1 %v4726_v40 }
 0xe1d   : > { %3123 = vmatmul.mubr.bf16.vlgmr.msra.gmra.mrb[36].mxu1 %v5585_v12  ;;  %v4731_v12 = vld [vmem:[%s5514_s17 + $0x90] sm:$0xff]  }
 0xe1e   : > { %3132 = vmatprep.mubr.bf16.mxu1 %v5131_v43  ;;  %4203 = vmatpush3.bf16.msra.mxu1 %v4727_v17  ;;  %v4732_v43 = vld [vmem:[%s5514_s17 + $0xd8] sm:$0xff]  }
 0xe1f   : > { %4204 = vmatprep.subr.bf16.mxu1 %v4728_v8 }
 0xe22   : > { %4205 = vmatpush3.bf16.msra.mxu1 %v4729_v31 }
 0xe23   : > { %4206 = vmatprep.subr.bf16.mxu1 %v4730_v14 }
 0xe25   : > { %3133 = vmatmul.mubr.bf16.gmra.mrb[40].mxu1 %v5590_v16  ;;  %v4733_v16 = vld [vmem:[%s5514_s17 + $0x98] sm:$0xff]  }
 0xe26   : > { %4207 = vmatpush3.bf16.msra.mxu1 %v4731_v12 }
 0xe27   : > { %4208 = vmatprep.subr.bf16.mxu1 %v4732_v43 }
 0xe2a   : > { %4209 = vmatpush3.bf16.msra.mxu1 %v4733_v16 }
 0xe2b   : > { %4210 = vmatprep.subr.bf16.mxu1 %v4734_v20 }
 0xe2e   : > { %4211 = vmatpush3.bf16.msra.mxu1 %v4735_v23 }
 0xe2f   : > { %4212 = vmatprep.subr.bf16.mxu1 %v4736_v28 }
 0xe32   : > { %4213 = vmatpush3.bf16.msra.mxu1 %v4737_v32 }
 0xe33   : > { %4214 = vmatprep.subr.bf16.mxu1 %v4738_v45 }
 0xe36   : > { %4215 = vmatpush3.bf16.msra.mxu1 %v4739_v3 }
 0xe37   : > { %4216 = vmatprep.subr.bf16.mxu1 %v4740_v25 }
 0xe3a   : > { %4217 = vmatpush3.bf16.msra.mxu1 %v4741_v27 }
 0xe95   : > { %v4190_v29 = vpop.f32.mrb[52].mxu0 }
 0xe96   : > { %v4191_v37 = vpop.f32.mrb[53].mxu0 }
 0xe97   : > { %v6408_v36 = vadd.f32 %v4191_v37, %v4190_v29  ;;  %v4193_v56 = vpop.f32.mrb[54].mxu0 }
 0xe98   : > { %v4194_v63 = vpop.f32.mrb[55].mxu0 }
 0xe99   : > { %v6410_v7 = vadd.f32 %v4194_v63, %v4193_v56 }
 0xe9d   : > { %v4196_v18 = vpop.f32.mrb[56].mxu0 }
 0xe9e   : > { %v4197_v30 = vpop.f32.mrb[57].mxu0 }
 0xe9f   : > { %v6412_v2 = vadd.f32 %v4197_v30, %v4196_v18  ;;  %v4199_v50 = vpop.f32.mrb[58].mxu0 }
 0xea0   : > { %v4200_v61 = vpop.f32.mrb[59].mxu0 }
 0xea1   : > { %v6414_v39 = vadd.f32 %v4200_v61, %v4199_v50 }
 0xed0   : > { %v6416_v46 = vpop.f32.mrb[32].mxu1 }
 0xed1   : > { %v6418_v9 = vpop.f32.mrb[33].mxu1 }
 0xed2   : > { %v6420_v10 = vpop.f32.mrb[34].mxu1 }
 0xed3   : > { %v6422_v4 = vpop.f32.mrb[35].mxu1 }
 0xef0   : > { %v3124_v19 = vpop.f32.mrb[36].mxu1 }
 0xef1   : > { %v6428_v54 = vadd.f32 %v3124_v19, %v2868_v42  ;;  %v3126_v55 = vpop.f32.mrb[37].mxu1 }
 0xef2   : > { %v6430_v57 = vadd.f32 %v3126_v55, %v2872_v44  ;;  %v3128_v47 = vpop.f32.mrb[38].mxu1 }
 0xef3   : > { %v3145_v33 = vmul.f32 0.044715, %v6428_v54  ;;  %v6433_v26 = vadd.f32 %v3128_v47, %v2868_v42  ;;  %v3130_v34 = vpop.f32.mrb[39].mxu1 }
 0xef4   : > { %v3146_v58 = vmul.f32 0.044715, %v6430_v57  ;;  %v6436_v22 = vadd.f32 %v3130_v34, %v2872_v44 }
 0xef5   : > { %v3161_v49 = vmul.f32 %v3145_v33, %v6428_v54  ;;  %v3149_v52 = vmul.f32 0.044715, %v6433_v26 }
 0xef6   : > { %v3162_v60 = vmul.f32 %v3146_v58, %v6430_v57  ;;  %v3150_v1 = vmul.f32 0.044715, %v6436_v22 }
 0xef7   : > { %v3177_v15 = vmul.f32 %v3161_v49, %v6428_v54  ;;  %v3165_v59 = vmul.f32 %v3149_v52, %v6433_v26  ;;  %v3209_v49 = vmul.f32 0.5, %v6428_v54  ;;  %v3213_v52 = vmul.f32 0.5, %v6433_v26 }
 0xef8   : > { %v3178_v24 = vmul.f32 %v3162_v60, %v6430_v57  ;;  %v3166_v11 = vmul.f32 %v3150_v1, %v6436_v22  ;;  %v3134_v53 = vpop.f32.mrb[40].mxu1  ;;  %v3210_v1 = vmul.f32 0.5, %v6430_v57 }
 0xef9   : > { %v3193_v41 = vadd.f32 %v3177_v15, %v6428_v54  ;;  %v3181_v0 = vmul.f32 %v3165_v59, %v6433_v26  ;;  %v6448_v48 = vadd.f32 %v3134_v53, %v2868_v42  ;;  %v3136_v6 = vpop.f32.mrb[41].mxu1  ;;  %v3214_v15 = vmul.f32 0.5, %v6436_v22 }
 0xefa   : > { %v3182_v35 = vmul.f32 %v3166_v11, %v6436_v22  ;;  %v6451_v51 = vadd.f32 %v3136_v6, %v2872_v44  ;;  %v3138_v13 = vpop.f32.mrb[42].mxu1  ;;  %v3194_v21 = vadd.f32 %v3178_v24, %v6430_v57 }
 0xefb   : > { %v3225_v62 = vmul.f32 0.7978846, %v3193_v41  ;;  %v3197_v40 = vadd.f32 %v3181_v0, %v6433_v26  ;;  %v3153_v17 = vmul.f32 0.044715, %v6448_v48  ;;  %v3139_v8 = vadd.f32 %v3138_v13, %v2868_v42  ;;  %v3140_v31 = vpop.f32.mrb[43].mxu1 }
 0xefc   : > { %v3154_v14 = vmul.f32 0.044715, %v6451_v51  ;;  %v3141_v12 = vadd.f32 %v3140_v31, %v2872_v44  ;;  %v3198_v43 = vadd.f32 %v3182_v35, %v6436_v22  ;;  %v3226_v16 = vmul.f32 0.7978846, %v3194_v21 }
 0xefd   : > { %4830 = vtanh.f32 %v3225_v62  ;;  %v3229_v20 = vmul.f32 0.7978846, %v3197_v40  ;;  %v3169_v23 = vmul.f32 %v3153_v17, %v6448_v48  ;;  %v3157_v28 = vmul.f32 0.044715, %v3139_v8 }
 0xefe   : > { %v3170_v32 = vmul.f32 %v3154_v14, %v6451_v51  ;;  %v3158_v45 = vmul.f32 0.044715, %v3141_v12  ;;  %v3230_v3 = vmul.f32 0.7978846, %v3198_v43  ;;  %4832 = vtanh.f32 %v3226_v16 }
 0xeff   : > { %4834 = vtanh.f32 %v3229_v20  ;;  %v3185_v25 = vmul.f32 %v3169_v23, %v6448_v48  ;;  %v3173_v27 = vmul.f32 %v3157_v28, %v3139_v8  ;;  %v3217_v57 = vmul.f32 0.5, %v6448_v48 }
 0xf00   : > { %v3186_v29 = vmul.f32 %v3170_v32, %v6451_v51  ;;  %v3174_v37 = vmul.f32 %v3158_v45, %v3141_v12  ;;  %4836 = vtanh.f32 %v3230_v3  ;;  %v3221_v26 = vmul.f32 0.5, %v3139_v8  ;;  %v4058_v45 = vld [vmem:[%s687_s20] ss:$0 sm:$0xff] }
 0xf01   : > { %v3189_v56 = vmul.f32 %v3173_v27, %v3139_v8  ;;  %v3201_v63 = vadd.f32 %v3185_v25, %v6448_v48  ;;  %v3218_v17 = vmul.f32 0.5, %v6451_v51  ;;  %v3222_v31 = vmul.f32 0.5, %v3141_v12 }
 0xf02   : > { %v3190_v18 = vmul.f32 %v3174_v37, %v3141_v12  ;;  %v3202_v30 = vadd.f32 %v3186_v29, %v6451_v51  ;;  %v3593_v3 = vadd.f32 %v6408_v36, %v4058_v45  ;;  %v3596_v27 = vadd.f32 %v6410_v7, %v4058_v45  ;;  %v4854_v29 = vld [vmem:[#allocation11] sm:$0xff] }
 0xf03   : > { %v3205_v50 = vadd.f32 %v3189_v56, %v3139_v8  ;;  %v3233_v61 = vmul.f32 0.7978846, %v3201_v63  ;;  %v3656_v37 = vadd.f32 %v4854_v29, %v6418_v9  ;;  %v3601_v36 = vadd.f32 %v6412_v2, %v4058_v45  ;;  %v4856_v9 = vld [vmem:[#allocation11 + $0x10] sm:$0xff] }
 0xf04   : > { %v3206_v5 = vadd.f32 %v3190_v18, %v3141_v12  ;;  %v3234_v38 = vmul.f32 0.7978846, %v3202_v30  ;;  %v4855_v18 = vld [vmem:[#allocation11 + $0x8] sm:$0xff] }
 0xf05   : > { %v3237_v42 = vmul.f32 0.7978846, %v3205_v50  ;;  %4838 = vtanh.f32 %v3233_v61  ;;  %v3657_v30 = vadd.f32 %v4855_v18, %v6422_v4  ;;  %v4857_v4 = vld [vmem:[#allocation11 + $0x18] sm:$0xff] }
 0xf06   : > { %v3238_v44 = vmul.f32 0.7978846, %v3206_v5  ;;  %4840 = vtanh.f32 %v3234_v38 }
 0xf07   : > { %v4831_v19 = vpop.eup %4830  ;;  %4842 = vtanh.f32 %v3237_v42 }
 0xf08   : > { %v4833_v55 = vpop.eup %4832  ;;  %v3257_v47 = vadd.f32 1.0, %v4831_v19  ;;  %4844 = vtanh.f32 %v3238_v44 }
 0xf09   : > { %v4835_v33 = vpop.eup %4834  ;;  %v3258_v34 = vadd.f32 1.0, %v4833_v55  ;;  %v3604_v55 = vadd.f32 %v6414_v39, %v4058_v45 }
 0xf0a   : > { %v4837_v58 = vpop.eup %4836  ;;  %v3261_v60 = vadd.f32 1.0, %v4835_v33  ;;  %v3273_v24 = vmul.f32 %v3257_v47, %v3209_v49  ;;  %v3658_v47 = vadd.f32 %v4856_v9, %v6416_v46 }
 0xf0b   : > { %v3262_v59 = vadd.f32 1.0, %v4837_v58  ;;  %v3274_v53 = vmul.f32 %v3258_v34, %v3210_v1  ;;  %v3659_v58 = vadd.f32 %v4857_v4, %v6420_v10 }
 0xf0c   : > { %v3277_v11 = vmul.f32 %v3261_v60, %v3213_v52 }
 0xf0d   : > { %v3278_v41 = vmul.f32 %v3262_v59, %v3214_v15 }
 0xf0e   : > { %v3289_v0 = vpack.c.bf16 %v3277_v11, %v3273_v24 }
 0xf0f   : > { %v4839_v6 = vpop.eup %4838  ;;  %v3290_v35 = vpack.c.bf16 %v3278_v41, %v3274_v53 }
 0xf10   : > { %v4841_v13 = vpop.eup %4840  ;;  %v3265_v21 = vadd.f32 1.0, %v4839_v6 }
 0xf11   : > { %v4843_v62 = vpop.eup %4842  ;;  %3639 = vmatprep.mubr.bf16.mxu1 %v3290_v35  ;;  %v3266_v54 = vadd.f32 1.0, %v4841_v13 }
 0xf12   : > { %v4845_v40 = vpop.eup %4844  ;;  %3640 = vmatmul.mubr.bf16.vlgmr.msra.gmra.mrb[44].mxu1 %v3289_v0  ;;  %v3269_v22 = vadd.f32 1.0, %v4843_v62  ;;  %v3281_v43 = vmul.f32 %v3265_v21, %v3217_v57 }
 0xf13   : > { %v3270_v14 = vadd.f32 1.0, %v4845_v40  ;;  %v3282_v20 = vmul.f32 %v3266_v54, %v3218_v17 }
 0xf14   : > { %v3285_v16 = vmul.f32 %v3269_v22, %v3221_v26 }
 0xf15   : > { %v3286_v23 = vmul.f32 %v3270_v14, %v3222_v31 }
 0xf16   : > { %v3293_v28 = vpack.c.bf16 %v3285_v16, %v3281_v43 }
 0xf17   : > { %v3294_v32 = vpack.c.bf16 %v3286_v23, %v3282_v20 }
 0xf19   : > { %3647 = vmatprep.mubr.bf16.mxu1 %v3294_v32  ;;  %v4092_v32 = vld [vmem:[%s6615_s29] ss:$0 sm:$0xff] (!%p4091_p11) }
 0xf1a   : > { %3648 = vmatmul.mubr.bf16.gmra.mrb[48].mxu1 %v3293_v28 }
 0xfe5   : > { %v4218_v48 = vpop.f32.mrb[44].mxu1 }
 0xfe6   : > { %v4219_v8 = vpop.f32.mrb[45].mxu1 }
 0xfe7   : > { %v4220_v51 = vadd.f32 %v4219_v8, %v4218_v48  ;;  %v4221_v12 = vpop.f32.mrb[46].mxu1 }
 0xfe8   : > { %v4222_v25 = vpop.f32.mrb[47].mxu1 }
 0xfe9   : > { %v3642_v56 = vadd.f32 %v4220_v51, %v3593_v3  ;;  %v4223_v63 = vadd.f32 %v4222_v25, %v4221_v12  ;;  %v4093_v51 = vld [vmem:[%s6616_s16] ss:$0 sm:$0xff] (!%p4091_p11) }
 0xfeb   : > { %v3660_v50 = vadd.f32 %v3656_v37, %v3642_v56  ;;  %v3645_v61 = vadd.f32 %v4223_v63, %v3596_v27 }
 0xfed   : > { %3664 = vst [vmem:[#allocation11] sm:$0xff] %v3660_v50  ;;  %v3661_v5 = vadd.f32 %v3657_v30, %v3645_v61  ;;  %v4224_v38 = vpop.f32.mrb[48].mxu1  ;;  %3672 = vadd.xlane.f32.xlu0 (!%p4091_p11), %v3660_v50 }
 0xfee   : > { %v4225_v42 = vpop.f32.mrb[49].mxu1 }
 0xfef   : > { %3665 = vst [vmem:[#allocation11 + $0x8] sm:$0xff] %v3661_v5  ;;  %v4226_v44 = vadd.f32 %v4225_v42, %v4224_v38  ;;  %v4227_v19 = vpop.f32.mrb[50].mxu1 }
 0xff0   : > { %v4228_v7 = vpop.f32.mrb[51].mxu1 }
 0xff1   : > { %v3650_v33 = vadd.f32 %v4226_v44, %v3601_v36  ;;  %v4229_v34 = vadd.f32 %v4228_v7, %v4227_v19  ;;  %3671 = sbr.rel (%p4091_p11) target bundleno = 4403 (0x1133), region = 104  ;;  %3674 = vadd.xlane.f32.xlu0 (!%p4091_p11), %v3661_v5 }
 0xff3   : > { %v3662_v49 = vadd.f32 %v3658_v47, %v3650_v33  ;;  %v3653_v52 = vadd.f32 %v4229_v34, %v3604_v55 }
 0xff5   : > { %3666 = vst [vmem:[#allocation11 + $0x10] sm:$0xff] %v3662_v49  ;;  %v3663_v60 = vadd.f32 %v3659_v58, %v3653_v52  ;;  %3676 = vadd.xlane.f32.xlu1 (!%p4091_p11), %v3662_v49 }
 0xff7   : > { %3667 = vst [vmem:[#allocation11 + $0x18] sm:$0xff] %v3663_v60 }
 0xff9   : > { %3678 = vadd.xlane.f32.xlu1 %v3663_v60 }
0x107a   : > { %v3673_v2 = vpop.xlane.xlu0 %3672 }
0x107b   : > { %v3680_v46 = vmul.f32 0.0078125, %v3673_v2 }
0x107d   : > { %v3684_v15 = vsub.f32 %v3660_v50, %v3680_v46 }
0x107e   : > { %v3675_v24 = vpop.xlane.xlu0 %3674 }
0x107f   : > { %v3681_v11 = vmul.f32 0.0078125, %v3675_v24  ;;  %v3688_v53 = vmul.f32 %v3684_v15, %v3684_v15 }
0x1081   : > { %v3685_v0 = vsub.f32 %v3661_v5, %v3681_v11  ;;  %3692 = vadd.xlane.f32.xlu0 %v3688_v53 }
0x1082   : > { %v3677_v39 = vpop.xlane.xlu1 %3676 }
0x1083   : > { %v3682_v1 = vmul.f32 0.0078125, %v3677_v39  ;;  %v3689_v13 = vmul.f32 %v3685_v0, %v3685_v0 }
0x1085   : > { %v3686_v59 = vsub.f32 %v3662_v49, %v3682_v1  ;;  %3694 = vadd.xlane.f32.xlu1 %v3689_v13 }
0x1086   : > { %v3679_v10 = vpop.xlane.xlu1 %3678 }
0x1087   : > { %v3683_v41 = vmul.f32 0.0078125, %v3679_v10  ;;  %v3690_v35 = vmul.f32 %v3686_v59, %v3686_v59 }
0x1089   : > { %v3687_v6 = vsub.f32 %v3663_v60, %v3683_v41  ;;  %3696 = vadd.xlane.f32.xlu0 %v3690_v35 }
0x108b   : > { %v3691_v21 = vmul.f32 %v3687_v6, %v3687_v6 }
0x108d   : > { %3698 = vadd.xlane.f32.xlu1 %v3691_v21 }
0x110e   : > { %v3693_v62 = vpop.xlane.xlu0 %3692 }
0x110f   : > { %v3700_v54 = vmul.f32 0.0078125, %v3693_v62 }
0x1111   : > { %v3704_v40 = vadd.f32 1e-05, %v3700_v54 }
0x1112   : > { %v3695_v57 = vpop.xlane.xlu1 %3694 }
0x1113   : > { %4858 = vrsqrt.f32 %v3704_v40  ;;  %v3701_v22 = vmul.f32 0.0078125, %v3695_v57 }
0x1115   : > { %v3705_v31 = vadd.f32 1e-05, %v3701_v22 }
0x1116   : > { %v3697_v26 = vpop.xlane.xlu0 %3696 }
0x1117   : > { %v3702_v17 = vmul.f32 0.0078125, %v3697_v26  ;;  %4860 = vrsqrt.f32 %v3705_v31 }
0x1119   : > { %v3706_v14 = vadd.f32 1e-05, %v3702_v17 }
0x111a   : > { %v3699_v43 = vpop.xlane.xlu1 %3698 }
0x111b   : > { %v3703_v16 = vmul.f32 0.0078125, %v3699_v43  ;;  %4862 = vrsqrt.f32 %v3706_v14 }
0x111d   : > { %v3707_v20 = vadd.f32 1e-05, %v3703_v16  ;;  %v4859_v23 = vpop.eup %4858 }
0x111e   : > { %v3712_v28 = vmul.f32 %v4859_v23, %v3684_v15 }
0x111f   : > { %4864 = vrsqrt.f32 %v3707_v20 }
0x1120   : > { %v3723_v8 = vmul.f32 %v4092_v32, %v3712_v28 }
0x1121   : > { %v4861_v45 = vpop.eup %4860 }
0x1122   : > { %v3713_v3 = vmul.f32 %v4861_v45, %v3685_v0  ;;  %v3734_v29 = vadd.f32 %v4093_v51, %v3723_v8 }
0x1124   : > { %v3724_v25 = vmul.f32 %v4092_v32, %v3713_v3 }
0x1125   : > { %v4863_v48 = vpop.eup %4862 }
0x1126   : > { %v3714_v12 = vmul.f32 %v4863_v48, %v3686_v59  ;;  %v3735_v37 = vadd.f32 %v4093_v51, %v3724_v25 }
0x1128   : > { %v3725_v56 = vmul.f32 %v4092_v32, %v3714_v12  ;;  %v4114_v18 = vpack.c.bf16 %v3735_v37, %v3734_v29 }
0x1129   : > { %v4865_v27 = vpop.eup %4864 }
0x112a   : > { %v3715_v63 = vmul.f32 %v4865_v27, %v3687_v6  ;;  %4115 = vst [vmem:[#allocation12] sm:$0xff] %v4114_v18   ;;  %v3736_v50 = vadd.f32 %v4093_v51, %v3725_v56 }
0x112c   : > { %v3726_v30 = vmul.f32 %v4092_v32, %v3715_v63 }
0x112e   : > { %v3737_v61 = vadd.f32 %v4093_v51, %v3726_v30 }
0x1130   : > { %v4119_v5 = vpack.c.bf16 %v3737_v61, %v3736_v50 }
0x1132   : > { %4121 = vst [vmem:[#allocation12 + $0x8] sm:$0xff] %v4119_v5  }
0x1133 PF: > { %p4409_p6 = scmp.eq.s32.totalorder %s5362_s22, 1  ;;  %s5145_s26 = smov [#allocation11]  }
0x1134   : > { %s3764_s10 = sshll.u32 %s5145_s26, 4  ;;  %s3765_s10 = int_to_ptr.vmem [resolvable:$true] %s3764_s10 }
0x1135   : > { %s5014_s28 = scalar_lea.vmem %s3765_s10, 512  ;;  %p5021_p12 = scmp.lt.s32.totalorder %s3765_s10, %s3765_s10 }
0x1136   : > { %p5015_p7 = scmp.ne.s32.totalorder %s3765_s10, %s5014_s28  ;;  %p5022_p1 = scmp.lt.s32.totalorder %s5014_s28, %s5014_s28 }
0x1138   : > { %p5016_p8 = pnand %p5015_p7, %p4409_p6  ;;  %p5023_p9 = por %p5022_p1, %p5021_p12 }
0x113a   : > { %p5017_p10 = pneg %p5016_p8 }
0x113c   : > { %p5024_p5 = pnand %p5023_p9, %p5017_p10 }
0x113e   : > { %5027 = shalt.err (!%p5024_p5)
}
0x113f   : > { %s6617_s21 = sld [smem:[#allocation30_spill]] }
0x1145   : > { %s6618_s6 = smov %s6617_s21  ;;  %s5028_s14 = scalar_lea.hbm %s6617_s21, 512 }
0x1146   : > { %p5029_p0 = scmp.ne.s32.totalorder %s6618_s6, %s5028_s14  ;;  %p5034_p2 = scmp.lt.u32.totalorder %s5028_s14, %s6618_s6 }
0x1148   : > { %p5030_p13 = pnand %p5029_p0, %p4409_p6 }
0x114a   : > { %p5031_p3 = pneg %p5030_p13 }
0x114c   : > { %p5036_p4 = pnand %p5034_p2, %p5031_p3 }
0x114e   : > { %5039 = shalt.err (!%p5036_p4)
}
0x114f   : > { %s5146_s0 = smov 128   ;;  %s5147_s20 = smov 8  }
0x1150   : > { %4382 = dma.vmem_to_hbm [thread:$0]  (%p4409_p6), %s3765_s10, 512, %s6618_s6, [#allocation4], %s5146_s0, %s5146_s0, %s5147_s20  }
0x1151   : > { %s5148_s12 = smov [#allocation12]  }
0x1152   : > { %s3777_s16 = sshll.u32 %s5148_s12, 4  ;;  %s3778_s16 = int_to_ptr.vmem [resolvable:$true] %s3777_s16 }
0x1153   : > { %s5040_s26 = scalar_lea.vmem %s3778_s16, 256  ;;  %p5047_p10 = scmp.lt.s32.totalorder %s3778_s16, %s3778_s16 }
0x1154   : > { %p5041_p11 = scmp.ne.s32.totalorder %s3778_s16, %s5040_s26  ;;  %p5048_p12 = scmp.lt.s32.totalorder %s5040_s26, %s5040_s26 }
0x1156   : > { %p5042_p7 = pnand %p5041_p11, %p4409_p6  ;;  %p5049_p1 = por %p5048_p12, %p5047_p10 }
0x1158   : > { %p5043_p8 = pneg %p5042_p7 }
0x115a   : > { %p5050_p9 = pnand %p5049_p1, %p5043_p8 }
0x115c   : > { %5053 = shalt.err (!%p5050_p9)
}
0x115d   : > { %s6619_s4 = sld [smem:[#allocation31_spill]] }
0x1163   : > { %s5054_s21 = scalar_lea.hbm %s6619_s4, 256 }
0x1164   : > { %p5055_p5 = scmp.ne.s32.totalorder %s6619_s4, %s5054_s21  ;;  %p5060_p3 = scmp.lt.u32.totalorder %s5054_s21, %s6619_s4 }
0x1166   : > { %p5056_p0 = pnand %p5055_p5, %p4409_p6 }
0x1168   : > { %p5057_p13 = pneg %p5056_p0 }
0x116a   : > { %p5062_p2 = pnand %p5060_p3, %p5057_p13 }
0x116c   : > { %5065 = shalt.err (!%p5062_p2)
}
0x116d   : > { %4384 = dma.vmem_to_hbm [thread:$0]  (%p4409_p6), %s3778_s16, 256, %s6619_s4, [#allocation13], %s5142_s15, %s5142_s15, %s5133_s25  }
0x116e   : > { %5095 = dma.done.wait (%p4409_p6), [#allocation4], 512  }
0x116f   : > { %5097 = vsyncadd (%p4409_p6), [#allocation4], 4294966784 }
0x1170   : > { %5099 = dma.done.wait (%p4409_p6), [#allocation13], 256  }
0x1171   : > { %5101 = vsyncadd (%p4409_p6), [#allocation13], 4294967040 }
0x1172 PF: > { %s6620_s21 = sld [smem:[#allocation20_spill]]  ;;  %s6621_s0 = sld [smem:[#allocation19_spill]] }
0x1173   : > { %s6622_s20 = sld [smem:[#allocation21_spill]]  ;;  %s6623_s18 = smov %s5108_s19 }
0x1178   : > { %p32_p4 = scmp.ge.s32.totalorder %s6620_s21, 4   ;;  %s6624_s19 = smov %s6621_s0 }
0x117a   :  { %34 = sbr.rel (!%p32_p4) target bundleno = 19 (0x13), region = 181 }
0x1181   :  { %3797 = vsyncpa [#allocation3], 1 }
0x1182   :  { %3799 = vsyncpa [#allocation3 + $0x1], 1 }
0x1183   :  { %3800 = vsyncpa [#allocation6], 1 }
0x1184   :  { %3802 = vsyncpa [#allocation6 + $0x1], 1 }
0x1185   :  { %3803 = vsyncpa [#allocation9], 1 }
0x1186   :  { %3805 = vsyncpa [#allocation9 + $0x1], 1 }
0x1187   :  { %3806 = vsyncpa [#allocation4], 1 }
0x1188   :  { %3808 = vsyncpa [#allocation4 + $0x1], 1 }
0x1189   :  { %3809 = vsyncpa [#allocation13], 1 }

</bundles_post_ra>
